<compile_context>
chip_gen: v6e
topology: v6e:2x2x1
jax: 0.10.0
libtpu: 0.0.40
codegen_flags: <defaults>
</compile_context>

<pallas_src>
import functools
import jax
import jax.numpy as jnp
from jax.experimental import pallas as pl

# ----------------------------- config -----------------------------
MODALITIES = ["OCT"]
B, C, IMG = 2, 1, 16          # batch, channels, spatial
P = 4                         # patch size
NP = (IMG // P) ** 2          # 16 patches
D = 32                        # encoder embed dim
DEPTH, HEADS = 2, 2
DD = 32                       # decoder embed dim
DEC_DEPTH, DEC_HEADS = 1, 2
MLP_RATIO = 4
N_KEEP = 8                    # visible patches under the MAE mask
FIRST_PATCH_IDX = 1           # cls token occupies position 0
PPC = P * P * C               # per-patch reconstruction size
LN_EPS = 1e-6                 # TODO(synk): PyTorch nn.LayerNorm default eps is 1e-5 (MAE repos use 1e-6).


# ----------------------- in-kernel building blocks -----------------------

def _ln(x, g_ref, b_ref):
    x = x.astype(jnp.float32)
    mu = jnp.mean(x, axis=-1, keepdims=True)
    var = jnp.mean((x - mu) * (x - mu), axis=-1, keepdims=True)
    return (x - mu) * jax.lax.rsqrt(var + LN_EPS) * g_ref[...] + b_ref[...]


def _lin(x, w_ref, b_ref, activation=None):
    y = jnp.dot(x, w_ref[...], preferred_element_type=jnp.float32) + b_ref[...]
    if activation == "gelu":
        # TODO(synk): PyTorch nn.GELU defaults to exact erf; tanh approximation used here.
        y = jax.nn.gelu(y, approximate=True)
    return y


def _attention_rows(qkv, t, d, num_heads, proj_w):
    """qkv: [B*t, 3d] rows -> (concat-over-heads softmax(qk^T/sqrt(dh)) v) @ proj_w, [B*t, d]."""
    dh = d // num_heads
    scale = 1.0 / float(dh) ** 0.5
    outs = []
    for b in range(B):
        r0 = b * t
        acc = None
        for h in range(num_heads):
            q = qkv[r0:r0 + t, h * dh:(h + 1) * dh]
            k = qkv[r0:r0 + t, d + h * dh:d + (h + 1) * dh]
            v = qkv[r0:r0 + t, 2 * d + h * dh:2 * d + (h + 1) * dh]
            s = jax.lax.dot_general(q, k, (((1,), (1,)), ((), ())),
                                    preferred_element_type=jnp.float32) * scale
            m = jnp.max(s, axis=-1, keepdims=True)
            e = jnp.exp(s - m)
            p_attn = e * pl.reciprocal(jnp.sum(e, axis=-1, keepdims=True), approx=True)
            o = jnp.dot(p_attn, v, preferred_element_type=jnp.float32)
            # concat-over-heads followed by proj == sum_h o_h @ proj_w[h*dh:(h+1)*dh, :]
            c = jnp.dot(o, proj_w[h * dh:(h + 1) * dh, :], preferred_element_type=jnp.float32)
            acc = c if acc is None else acc + c
        outs.append(acc)
    return jnp.concatenate(outs, axis=0)


def _block_rows(x, bp, t, num_heads):
    d = x.shape[-1]
    h = _ln(x, bp["ln1_g"], bp["ln1_b"])
    qkv = _lin(h, bp["qkv_w"], bp["qkv_b"])
    x = x + _attention_rows(qkv, t, d, num_heads, bp["proj_w"][...]) + bp["proj_b"][...]
    h = _ln(x, bp["ln2_g"], bp["ln2_b"])
    h = _lin(h, bp["fc1_w"], bp["fc1_b"], activation="gelu")
    h = _lin(h, bp["fc2_w"], bp["fc2_b"])
    return x + h


# ----------------------------- fused kernel -----------------------------

def _fused_mae_kernel(*refs, treedef, n_leaves, masked):
    out_ref = refs[-1]
    in_refs = refs[:-1]
    p = jax.tree_util.tree_unflatten(treedef, list(in_refs[:n_leaves]))
    extra = in_refs[n_leaves:]
    patches_ref = extra[0]                                   # [B*NP, C*P*P]

    # ----------------- encoder -----------------
    t_enc = 1 + (N_KEEP if masked else NP)
    tok = _lin(patches_ref[...], p["pe_w"], p["pe_b"])       # [B*NP, D]
    pos = p["pos"][...]                                      # [1+NP, D]
    cls_row = p["cls"][...] + pos[:1, :]                     # [1, D]
    pos_patch = pos[1:, :]                                   # [NP, D]
    if masked:
        oh_keep = extra[1][...]                              # [B*N_KEEP, NP] one-hot gather

    seqs = []
    for b in range(B):
        tok_b = tok[b * NP:(b + 1) * NP, :] + pos_patch
        if masked:
            tok_b = jnp.dot(oh_keep[b * N_KEEP:(b + 1) * N_KEEP, :], tok_b,
                            preferred_element_type=jnp.float32)      # keep visible patches
        seqs.append(jnp.concatenate([cls_row, tok_b], axis=0))
    x = jnp.concatenate(seqs, axis=0)                        # [B*t_enc, D]

    for bp in p["enc_blocks"]:
        x = _block_rows(x, bp, t_enc, HEADS)
    x = _ln(x, p["enc_ng"], p["enc_nb"])

    if not masked:
        # standard path: head applied directly to encoder embedding (cls + patches)
        out_ref[...] = _lin(x, p["head_w"], p["head_b"]).astype(out_ref.dtype)
        return

    # ----------------- decoder (masked MAE path) -----------------
    oh_rest = extra[2][...]                                  # [B*NP, NP] one-hot unshuffle
    emb = jnp.concatenate(
        [x[b * t_enc + FIRST_PATCH_IDX:(b + 1) * t_enc, :] for b in range(B)], axis=0)  # drop cls
    y = _lin(emb, p["dec_emb_w"], p["dec_emb_b"])            # [B*N_KEEP, DD]
    mask_rows = jnp.broadcast_to(p["mask_tok"][...], (NP - N_KEEP, DD))
    dec_pos = p["dec_pos"][...]                              # [NP, DD]

    rows = []
    for b in range(B):
        shuf_b = jnp.concatenate([y[b * N_KEEP:(b + 1) * N_KEEP, :], mask_rows], axis=0)
        z_b = jnp.dot(oh_rest[b * NP:(b + 1) * NP, :], shuf_b,
                      preferred_element_type=jnp.float32)    # unshuffle to original order
        rows.append(z_b + dec_pos)
    z = jnp.concatenate(rows, axis=0)                        # [B*NP, DD]

    for bp in p["dec_blocks"]:
        z = _block_rows(z, bp, NP, DEC_HEADS)
    z = _ln(z, p["dec_ng"], p["dec_nb"])
    out_ref[...] = _lin(z, p["head_w"], p["head_b"]).astype(out_ref.dtype)


# ----------------------------- wrapper / glue -----------------------------

def _im2col(x):
    """NCHW [B, C, H, W] -> [B, Np, C*P*P], patch vector ordered (c, ph, pw)."""
    b, c, h, w = x.shape
    x = x.reshape(b, c, h // P, P, w // P, P)
    x = jnp.transpose(x, (0, 2, 4, 1, 3, 5))                 # [B, gh, gw, C, P, P]
    return x.reshape(b, (h // P) * (w // P), c * P * P)


def _one_hot_rows(ids, depth):
    """[B, K] int32 -> [B*K, depth] f32 one-hot matrix (gather applied in-kernel as a matmul)."""
    flat = ids.reshape(-1)
    return (flat[:, None] == jnp.arange(depth, dtype=ids.dtype)[None, :]).astype(jnp.float32)


def _full_spec(a):
    nd = a.ndim
    return pl.BlockSpec(a.shape, lambda i, _nd=nd: (0,) * _nd)


def multimodal_mae_forward(params, x, mask_dict=None, modality="OCT"):
    assert modality in MODALITIES
    assert x.shape == (B, C, IMG, IMG)
    patches = _im2col(x).reshape(B * NP, C * P * P)

    enc = params["encoder"]
    masked = mask_dict is not None
    p = {
        "pe_w": enc["patch_embed"][modality]["w"], "pe_b": enc["patch_embed"][modality]["b"],
        "cls": enc["cls_token"], "pos": enc["pos_embed"],
        "enc_blocks": enc["blocks"], "enc_ng": enc["norm_g"], "enc_nb": enc["norm_b"],
        "head_w": params["heads"][modality]["w"], "head_b": params["heads"][modality]["b"],
    }
    extra = [patches]
    if masked:
        dec = params["decoders"][modality]
        p.update({
            "dec_emb_w": dec["embed_w"], "dec_emb_b": dec["embed_b"],
            "mask_tok": dec["mask_token"], "dec_pos": dec["dec_pos_embed"],
            "dec_blocks": dec["blocks"], "dec_ng": dec["norm_g"], "dec_nb": dec["norm_b"],
        })
        extra.append(_one_hot_rows(mask_dict["ids_keep"], NP))
        extra.append(_one_hot_rows(mask_dict["ids_restore"], NP))
        t_out = NP
    else:
        t_out = 1 + NP

    leaves, treedef = jax.tree_util.tree_flatten(p)
    inputs = list(leaves) + extra
    kernel = functools.partial(_fused_mae_kernel, treedef=treedef,
                               n_leaves=len(leaves), masked=masked)
    out = pl.pallas_call(
        kernel,
        out_shape=jax.ShapeDtypeStruct((B * t_out, PPC), jnp.float32),
        grid=(1,),
        in_specs=[_full_spec(a) for a in inputs],
        out_specs=pl.BlockSpec((B * t_out, PPC), lambda i: (0, 0)),
    )(*inputs)
    return out.reshape(B, t_out, PPC)


# ----------------------------- parameter init -----------------------------

def _dense(key, fan_in, fan_out):
    w = 0.02 * jax.random.normal(key, (fan_in, fan_out), jnp.float32)
    b = jnp.zeros((1, fan_out), jnp.float32)
    return w, b


def _block_params(key, dim, mlp_ratio):
    ks = jax.random.split(key, 4)
    qkv_w, qkv_b = _dense(ks[0], dim, 3 * dim)
    proj_w, proj_b = _dense(ks[1], dim, dim)
    fc1_w, fc1_b = _dense(ks[2], dim, mlp_ratio * dim)
    fc2_w, fc2_b = _dense(ks[3], mlp_ratio * dim, dim)
    return dict(
        ln1_g=jnp.ones((1, dim), jnp.float32), ln1_b=jnp.zeros((1, dim), jnp.float32),
        qkv_w=qkv_w, qkv_b=qkv_b, proj_w=proj_w, proj_b=proj_b,
        ln2_g=jnp.ones((1, dim), jnp.float32), ln2_b=jnp.zeros((1, dim), jnp.float32),
        fc1_w=fc1_w, fc1_b=fc1_b, fc2_w=fc2_w, fc2_b=fc2_b,
    )


def init_params(key):
    k_enc, k_dec, k_head = jax.random.split(key, 3)

    ek = jax.random.split(k_enc, 4 + DEPTH)
    pe_w, pe_b = _dense(ek[0], C * P * P, D)                 # Conv2d(C, D, P, P) as im2col matmul
    encoder = dict(
        patch_embed={m: dict(w=pe_w, b=pe_b) for m in MODALITIES},
        cls_token=0.02 * jax.random.normal(ek[1], (1, D), jnp.float32),
        pos_embed=0.02 * jax.random.normal(ek[2], (1 + NP, D), jnp.float32),
        blocks=[_block_params(ek[4 + i], D, MLP_RATIO) for i in range(DEPTH)],
        norm_g=jnp.ones((1, D), jnp.float32), norm_b=jnp.zeros((1, D), jnp.float32),
    )

    dk = jax.random.split(k_dec, 3 + DEC_DEPTH)
    emb_w, emb_b = _dense(dk[0], D, DD)
    decoder = dict(
        embed_w=emb_w, embed_b=emb_b,
        mask_token=0.02 * jax.random.normal(dk[1], (1, DD), jnp.float32),
        dec_pos_embed=0.02 * jax.random.normal(dk[2], (NP, DD), jnp.float32),
        blocks=[_block_params(dk[3 + i], DD, MLP_RATIO) for i in range(DEC_DEPTH)],
        norm_g=jnp.ones((1, DD), jnp.float32), norm_b=jnp.zeros((1, DD), jnp.float32),
    )

    hw, hb = _dense(k_head, DD, PPC)
    return dict(
        encoder=encoder,
        decoders={m: decoder for m in MODALITIES},
        heads={m: dict(w=hw, b=hb) for m in MODALITIES},
    )


def make_mask_dict(key):
    noise = jax.random.uniform(key, (B, NP))
    ids_shuffle = jnp.argsort(noise, axis=1).astype(jnp.int32)
    ids_restore = jnp.argsort(ids_shuffle, axis=1).astype(jnp.int32)
    return {"ids_keep": ids_shuffle[:, :N_KEEP], "ids_restore": ids_restore}


# ----------------------------- main -----------------------------

if __name__ == "__main__":
    root = jax.random.PRNGKey(0)
    k_param, k_x, k_mask = jax.random.split(root, 3)

    params = init_params(k_param)
    x = jax.random.normal(k_x, (B, C, IMG, IMG), jnp.float32)  # NCHW like PyTorch
    mask_dict = make_mask_dict(k_mask)

    fwd = jax.jit(multimodal_mae_forward, static_argnames=("modality",))

    # masked MAE path: encode visible patches -> decode full sequence -> per-patch reconstruction
    out_masked = jax.block_until_ready(fwd(params, x, mask_dict, modality="OCT"))
    assert out_masked.shape == (B, NP, PPC), out_masked.shape

    # standard path: head applied directly to encoder embedding (cls + patches)
    out_std = jax.block_until_ready(fwd(params, x, None, modality="OCT"))
    assert out_std.shape == (B, 1 + NP, PPC), out_std.shape

    print("KERNEL_OK")
</pallas_src>

<mosaic_0001>
module attributes {stable_mosaic.version = 11 : i64} {
  func.func @_fused_mae_kernel(%arg0: i32, %arg1: memref<1x32xf32, #tpu.memory_space<vmem>>, %arg2: memref<1x128xf32, #tpu.memory_space<vmem>>, %arg3: memref<32x128xf32, #tpu.memory_space<vmem>>, %arg4: memref<1x32xf32, #tpu.memory_space<vmem>>, %arg5: memref<128x32xf32, #tpu.memory_space<vmem>>, %arg6: memref<1x32xf32, #tpu.memory_space<vmem>>, %arg7: memref<1x32xf32, #tpu.memory_space<vmem>>, %arg8: memref<1x32xf32, #tpu.memory_space<vmem>>, %arg9: memref<1x32xf32, #tpu.memory_space<vmem>>, %arg10: memref<1x32xf32, #tpu.memory_space<vmem>>, %arg11: memref<32x32xf32, #tpu.memory_space<vmem>>, %arg12: memref<1x96xf32, #tpu.memory_space<vmem>>, %arg13: memref<32x96xf32, #tpu.memory_space<vmem>>, %arg14: memref<1x32xf32, #tpu.memory_space<vmem>>, %arg15: memref<32x32xf32, #tpu.memory_space<vmem>>, %arg16: memref<1x32xf32, #tpu.memory_space<vmem>>, %arg17: memref<1x32xf32, #tpu.memory_space<vmem>>, %arg18: memref<16x32xf32, #tpu.memory_space<vmem>>, %arg19: memref<1x128xf32, #tpu.memory_space<vmem>>, %arg20: memref<32x128xf32, #tpu.memory_space<vmem>>, %arg21: memref<1x32xf32, #tpu.memory_space<vmem>>, %arg22: memref<128x32xf32, #tpu.memory_space<vmem>>, %arg23: memref<1x32xf32, #tpu.memory_space<vmem>>, %arg24: memref<1x32xf32, #tpu.memory_space<vmem>>, %arg25: memref<1x32xf32, #tpu.memory_space<vmem>>, %arg26: memref<1x32xf32, #tpu.memory_space<vmem>>, %arg27: memref<1x32xf32, #tpu.memory_space<vmem>>, %arg28: memref<32x32xf32, #tpu.memory_space<vmem>>, %arg29: memref<1x96xf32, #tpu.memory_space<vmem>>, %arg30: memref<32x96xf32, #tpu.memory_space<vmem>>, %arg31: memref<1x128xf32, #tpu.memory_space<vmem>>, %arg32: memref<32x128xf32, #tpu.memory_space<vmem>>, %arg33: memref<1x32xf32, #tpu.memory_space<vmem>>, %arg34: memref<128x32xf32, #tpu.memory_space<vmem>>, %arg35: memref<1x32xf32, #tpu.memory_space<vmem>>, %arg36: memref<1x32xf32, #tpu.memory_space<vmem>>, %arg37: memref<1x32xf32, #tpu.memory_space<vmem>>, %arg38: memref<1x32xf32, #tpu.memory_space<vmem>>, %arg39: memref<1x32xf32, #tpu.memory_space<vmem>>, %arg40: memref<32x32xf32, #tpu.memory_space<vmem>>, %arg41: memref<1x96xf32, #tpu.memory_space<vmem>>, %arg42: memref<32x96xf32, #tpu.memory_space<vmem>>, %arg43: memref<1x32xf32, #tpu.memory_space<vmem>>, %arg44: memref<1x32xf32, #tpu.memory_space<vmem>>, %arg45: memref<1x16xf32, #tpu.memory_space<vmem>>, %arg46: memref<32x16xf32, #tpu.memory_space<vmem>>, %arg47: memref<1x32xf32, #tpu.memory_space<vmem>>, %arg48: memref<1x32xf32, #tpu.memory_space<vmem>>, %arg49: memref<16x32xf32, #tpu.memory_space<vmem>>, %arg50: memref<17x32xf32, #tpu.memory_space<vmem>>, %arg51: memref<32x16xf32, #tpu.memory_space<vmem>>, %arg52: memref<16x16xf32, #tpu.memory_space<vmem>>, %arg53: memref<32x16xf32, #tpu.memory_space<vmem>>, %arg54: memref<32x16xf32, #tpu.memory_space<vmem>>) attributes {dimension_semantics = [#tpu.dimension_semantics<arbitrary>], iteration_bounds = array<i64: 1>, scalar_prefetch = 0 : i64, scratch_operands = 0 : i64, tpu.core_type = #tpu.core_type<tc>, window_params = [{pipeline_mode = #tpu.pipeline_mode<synchronous>, transform_indices = @transform_0, window_bounds = array<i64: 1, 32>}, {pipeline_mode = #tpu.pipeline_mode<synchronous>, transform_indices = @transform_1, window_bounds = array<i64: 1, 128>}, {pipeline_mode = #tpu.pipeline_mode<synchronous>, transform_indices = @transform_2, window_bounds = array<i64: 32, 128>}, {pipeline_mode = #tpu.pipeline_mode<synchronous>, transform_indices = @transform_3, window_bounds = array<i64: 1, 32>}, {pipeline_mode = #tpu.pipeline_mode<synchronous>, transform_indices = @transform_4, window_bounds = array<i64: 128, 32>}, {pipeline_mode = #tpu.pipeline_mode<synchronous>, transform_indices = @transform_5, window_bounds = array<i64: 1, 32>}, {pipeline_mode = #tpu.pipeline_mode<synchronous>, transform_indices = @transform_6, window_bounds = array<i64: 1, 32>}, {pipeline_mode = #tpu.pipeline_mode<synchronous>, transform_indices = @transform_7, window_bounds = array<i64: 1, 32>}, {pipeline_mode = #tpu.pipeline_mode<synchronous>, transform_indices = @transform_8, window_bounds = array<i64: 1, 32>}, {pipeline_mode = #tpu.pipeline_mode<synchronous>, transform_indices = @transform_9, window_bounds = array<i64: 1, 32>}, {pipeline_mode = #tpu.pipeline_mode<synchronous>, transform_indices = @transform_10, window_bounds = array<i64: 32, 32>}, {pipeline_mode = #tpu.pipeline_mode<synchronous>, transform_indices = @transform_11, window_bounds = array<i64: 1, 96>}, {pipeline_mode = #tpu.pipeline_mode<synchronous>, transform_indices = @transform_12, window_bounds = array<i64: 32, 96>}, {pipeline_mode = #tpu.pipeline_mode<synchronous>, transform_indices = @transform_13, window_bounds = array<i64: 1, 32>}, {pipeline_mode = #tpu.pipeline_mode<synchronous>, transform_indices = @transform_14, window_bounds = array<i64: 32, 32>}, {pipeline_mode = #tpu.pipeline_mode<synchronous>, transform_indices = @transform_15, window_bounds = array<i64: 1, 32>}, {pipeline_mode = #tpu.pipeline_mode<synchronous>, transform_indices = @transform_16, window_bounds = array<i64: 1, 32>}, {pipeline_mode = #tpu.pipeline_mode<synchronous>, transform_indices = @transform_17, window_bounds = array<i64: 16, 32>}, {pipeline_mode = #tpu.pipeline_mode<synchronous>, transform_indices = @transform_18, window_bounds = array<i64: 1, 128>}, {pipeline_mode = #tpu.pipeline_mode<synchronous>, transform_indices = @transform_19, window_bounds = array<i64: 32, 128>}, {pipeline_mode = #tpu.pipeline_mode<synchronous>, transform_indices = @transform_20, window_bounds = array<i64: 1, 32>}, {pipeline_mode = #tpu.pipeline_mode<synchronous>, transform_indices = @transform_21, window_bounds = array<i64: 128, 32>}, {pipeline_mode = #tpu.pipeline_mode<synchronous>, transform_indices = @transform_22, window_bounds = array<i64: 1, 32>}, {pipeline_mode = #tpu.pipeline_mode<synchronous>, transform_indices = @transform_23, window_bounds = array<i64: 1, 32>}, {pipeline_mode = #tpu.pipeline_mode<synchronous>, transform_indices = @transform_24, window_bounds = array<i64: 1, 32>}, {pipeline_mode = #tpu.pipeline_mode<synchronous>, transform_indices = @transform_25, window_bounds = array<i64: 1, 32>}, {pipeline_mode = #tpu.pipeline_mode<synchronous>, transform_indices = @transform_26, window_bounds = array<i64: 1, 32>}, {pipeline_mode = #tpu.pipeline_mode<synchronous>, transform_indices = @transform_27, window_bounds = array<i64: 32, 32>}, {pipeline_mode = #tpu.pipeline_mode<synchronous>, transform_indices = @transform_28, window_bounds = array<i64: 1, 96>}, {pipeline_mode = #tpu.pipeline_mode<synchronous>, transform_indices = @transform_29, window_bounds = array<i64: 32, 96>}, {pipeline_mode = #tpu.pipeline_mode<synchronous>, transform_indices = @transform_30, window_bounds = array<i64: 1, 128>}, {pipeline_mode = #tpu.pipeline_mode<synchronous>, transform_indices = @transform_31, window_bounds = array<i64: 32, 128>}, {pipeline_mode = #tpu.pipeline_mode<synchronous>, transform_indices = @transform_32, window_bounds = array<i64: 1, 32>}, {pipeline_mode = #tpu.pipeline_mode<synchronous>, transform_indices = @transform_33, window_bounds = array<i64: 128, 32>}, {pipeline_mode = #tpu.pipeline_mode<synchronous>, transform_indices = @transform_34, window_bounds = array<i64: 1, 32>}, {pipeline_mode = #tpu.pipeline_mode<synchronous>, transform_indices = @transform_35, window_bounds = array<i64: 1, 32>}, {pipeline_mode = #tpu.pipeline_mode<synchronous>, transform_indices = @transform_36, window_bounds = array<i64: 1, 32>}, {pipeline_mode = #tpu.pipeline_mode<synchronous>, transform_indices = @transform_37, window_bounds = array<i64: 1, 32>}, {pipeline_mode = #tpu.pipeline_mode<synchronous>, transform_indices = @transform_38, window_bounds = array<i64: 1, 32>}, {pipeline_mode = #tpu.pipeline_mode<synchronous>, transform_indices = @transform_39, window_bounds = array<i64: 32, 32>}, {pipeline_mode = #tpu.pipeline_mode<synchronous>, transform_indices = @transform_40, window_bounds = array<i64: 1, 96>}, {pipeline_mode = #tpu.pipeline_mode<synchronous>, transform_indices = @transform_41, window_bounds = array<i64: 32, 96>}, {pipeline_mode = #tpu.pipeline_mode<synchronous>, transform_indices = @transform_42, window_bounds = array<i64: 1, 32>}, {pipeline_mode = #tpu.pipeline_mode<synchronous>, transform_indices = @transform_43, window_bounds = array<i64: 1, 32>}, {pipeline_mode = #tpu.pipeline_mode<synchronous>, transform_indices = @transform_44, window_bounds = array<i64: 1, 16>}, {pipeline_mode = #tpu.pipeline_mode<synchronous>, transform_indices = @transform_45, window_bounds = array<i64: 32, 16>}, {pipeline_mode = #tpu.pipeline_mode<synchronous>, transform_indices = @transform_46, window_bounds = array<i64: 1, 32>}, {pipeline_mode = #tpu.pipeline_mode<synchronous>, transform_indices = @transform_47, window_bounds = array<i64: 1, 32>}, {pipeline_mode = #tpu.pipeline_mode<synchronous>, transform_indices = @transform_48, window_bounds = array<i64: 16, 32>}, {pipeline_mode = #tpu.pipeline_mode<synchronous>, transform_indices = @transform_49, window_bounds = array<i64: 17, 32>}, {pipeline_mode = #tpu.pipeline_mode<synchronous>, transform_indices = @transform_50, window_bounds = array<i64: 32, 16>}, {pipeline_mode = #tpu.pipeline_mode<synchronous>, transform_indices = @transform_51, window_bounds = array<i64: 16, 16>}, {pipeline_mode = #tpu.pipeline_mode<synchronous>, transform_indices = @transform_52, window_bounds = array<i64: 32, 16>}, {pipeline_mode = #tpu.pipeline_mode<synchronous>, transform_indices = @transform_53, window_bounds = array<i64: 32, 16>}]} {
    %c0 = arith.constant 0 : index
    %c0_0 = arith.constant 0 : index
    %0 = vector.load %arg51[%c0, %c0_0] : memref<32x16xf32, #tpu.memory_space<vmem>>, vector<32x16xf32>
    %c0_1 = arith.constant 0 : index
    %c0_2 = arith.constant 0 : index
    %1 = vector.load %arg49[%c0_1, %c0_2] : memref<16x32xf32, #tpu.memory_space<vmem>>, vector<16x32xf32>
    %cst = arith.constant dense<0.000000e+00> : vector<32x32xf32>
    %2 = tpu.matmul %0, %1, %cst {dimension_numbers = #tpu.dot_dimension_numbers<[1], [0], [0], [1], [0, 0, 1, 1], [], []>} : vector<32x16xf32>, vector<16x32xf32>, vector<32x32xf32> -> vector<32x32xf32>
    %c0_3 = arith.constant 0 : index
    %c0_4 = arith.constant 0 : index
    %3 = vector.load %arg48[%c0_3, %c0_4] : memref<1x32xf32, #tpu.memory_space<vmem>>, vector<1x32xf32>
    %4 = vector.broadcast %3 : vector<1x32xf32> to vector<32x32xf32>
    %5 = arith.addf %2, %4 : vector<32x32xf32>
    %c0_5 = arith.constant 0 : index
    %c0_6 = arith.constant 0 : index
    %6 = vector.load %arg50[%c0_5, %c0_6] : memref<17x32xf32, #tpu.memory_space<vmem>>, vector<17x32xf32>
    %c0_7 = arith.constant 0 : index
    %c0_8 = arith.constant 0 : index
    %7 = vector.load %arg1[%c0_7, %c0_8] : memref<1x32xf32, #tpu.memory_space<vmem>>, vector<1x32xf32>
    %8 = vector.extract_strided_slice %6 {offsets = [0, 0], sizes = [1, 32], strides = [1, 1]} : vector<17x32xf32> to vector<1x32xf32>
    %9 = arith.addf %7, %8 : vector<1x32xf32>
    %10 = vector.extract_strided_slice %6 {offsets = [1, 0], sizes = [16, 32], strides = [1, 1]} : vector<17x32xf32> to vector<16x32xf32>
    %c0_9 = arith.constant 0 : index
    %c0_10 = arith.constant 0 : index
    %11 = vector.load %arg52[%c0_9, %c0_10] : memref<16x16xf32, #tpu.memory_space<vmem>>, vector<16x16xf32>
    %12 = vector.extract_strided_slice %5 {offsets = [0, 0], sizes = [16, 32], strides = [1, 1]} : vector<32x32xf32> to vector<16x32xf32>
    %13 = arith.addf %12, %10 : vector<16x32xf32>
    %14 = vector.extract_strided_slice %11 {offsets = [0, 0], sizes = [8, 16], strides = [1, 1]} : vector<16x16xf32> to vector<8x16xf32>
    %cst_11 = arith.constant dense<0.000000e+00> : vector<8x32xf32>
    %15 = tpu.matmul %14, %13, %cst_11 {dimension_numbers = #tpu.dot_dimension_numbers<[1], [0], [0], [1], [0, 0, 1, 1], [], []>} : vector<8x16xf32>, vector<16x32xf32>, vector<8x32xf32> -> vector<8x32xf32>
    %16 = tpu.concatenate %9, %15 in 0 : vector<1x32xf32>, vector<8x32xf32> -> vector<9x32xf32>
    %17 = vector.extract_strided_slice %5 {offsets = [16, 0], sizes = [16, 32], strides = [1, 1]} : vector<32x32xf32> to vector<16x32xf32>
    %18 = arith.addf %17, %10 : vector<16x32xf32>
    %19 = vector.extract_strided_slice %11 {offsets = [8, 0], sizes = [8, 16], strides = [1, 1]} : vector<16x16xf32> to vector<8x16xf32>
    %cst_12 = arith.constant dense<0.000000e+00> : vector<8x32xf32>
    %20 = tpu.matmul %19, %18, %cst_12 {dimension_numbers = #tpu.dot_dimension_numbers<[1], [0], [0], [1], [0, 0, 1, 1], [], []>} : vector<8x16xf32>, vector<16x32xf32>, vector<8x32xf32> -> vector<8x32xf32>
    %21 = tpu.concatenate %9, %20 in 0 : vector<1x32xf32>, vector<8x32xf32> -> vector<9x32xf32>
    %22 = tpu.concatenate %16, %21 in 0 : vector<9x32xf32>, vector<9x32xf32> -> vector<18x32xf32>
    %cst_13 = arith.constant dense<0.000000e+00> : vector<18xf32>
    %23 = vector.multi_reduction <add>, %22, %cst_13 [1] : vector<18x32xf32> to vector<18xf32>
    %24 = vector.shape_cast %23 : vector<18xf32> to vector<18x1xf32>
    %cst_14 = arith.constant 3.200000e+01 : f32
    %25 = vector.broadcast %cst_14 : f32 to vector<18x1xf32>
    %26 = arith.divf %24, %25 : vector<18x1xf32>
    %27 = vector.broadcast %26 : vector<18x1xf32> to vector<18x32xf32>
    %28 = arith.subf %22, %27 : vector<18x32xf32>
    %29 = vector.broadcast %26 : vector<18x1xf32> to vector<18x32xf32>
    %30 = arith.subf %22, %29 : vector<18x32xf32>
    %31 = arith.mulf %28, %30 : vector<18x32xf32>
    %cst_15 = arith.constant dense<0.000000e+00> : vector<18xf32>
    %32 = vector.multi_reduction <add>, %31, %cst_15 [1] : vector<18x32xf32> to vector<18xf32>
    %33 = vector.shape_cast %32 : vector<18xf32> to vector<18x1xf32>
    %cst_16 = arith.constant 3.200000e+01 : f32
    %34 = vector.broadcast %cst_16 : f32 to vector<18x1xf32>
    %35 = arith.divf %33, %34 : vector<18x1xf32>
    %36 = vector.broadcast %26 : vector<18x1xf32> to vector<18x32xf32>
    %37 = arith.subf %22, %36 : vector<18x32xf32>
    %cst_17 = arith.constant 9.99999997E-7 : f32
    %38 = vector.broadcast %cst_17 : f32 to vector<18x1xf32>
    %39 = arith.addf %35, %38 : vector<18x1xf32>
    %40 = math.rsqrt %39 : vector<18x1xf32>
    %41 = vector.broadcast %40 : vector<18x1xf32> to vector<18x32xf32>
    %42 = arith.mulf %37, %41 : vector<18x32xf32>
    %c0_18 = arith.constant 0 : index
    %c0_19 = arith.constant 0 : index
    %43 = vector.load %arg24[%c0_18, %c0_19] : memref<1x32xf32, #tpu.memory_space<vmem>>, vector<1x32xf32>
    %44 = vector.broadcast %43 : vector<1x32xf32> to vector<18x32xf32>
    %45 = arith.mulf %42, %44 : vector<18x32xf32>
    %c0_20 = arith.constant 0 : index
    %c0_21 = arith.constant 0 : index
    %46 = vector.load %arg23[%c0_20, %c0_21] : memref<1x32xf32, #tpu.memory_space<vmem>>, vector<1x32xf32>
    %47 = vector.broadcast %46 : vector<1x32xf32> to vector<18x32xf32>
    %48 = arith.addf %45, %47 : vector<18x32xf32>
    %c0_22 = arith.constant 0 : index
    %c0_23 = arith.constant 0 : index
    %49 = vector.load %arg30[%c0_22, %c0_23] : memref<32x96xf32, #tpu.memory_space<vmem>>, vector<32x96xf32>
    %cst_24 = arith.constant dense<0.000000e+00> : vector<18x96xf32>
    %50 = tpu.matmul %48, %49, %cst_24 {dimension_numbers = #tpu.dot_dimension_numbers<[1], [0], [0], [1], [0, 0, 1, 1], [], []>} : vector<18x32xf32>, vector<32x96xf32>, vector<18x96xf32> -> vector<18x96xf32>
    %c0_25 = arith.constant 0 : index
    %c0_26 = arith.constant 0 : index
    %51 = vector.load %arg29[%c0_25, %c0_26] : memref<1x96xf32, #tpu.memory_space<vmem>>, vector<1x96xf32>
    %52 = vector.broadcast %51 : vector<1x96xf32> to vector<18x96xf32>
    %53 = arith.addf %50, %52 : vector<18x96xf32>
    %c0_27 = arith.constant 0 : index
    %c0_28 = arith.constant 0 : index
    %54 = vector.load %arg28[%c0_27, %c0_28] : memref<32x32xf32, #tpu.memory_space<vmem>>, vector<32x32xf32>
    %55 = vector.extract_strided_slice %53 {offsets = [0, 0], sizes = [9, 16], strides = [1, 1]} : vector<18x96xf32> to vector<9x16xf32>
    %56 = vector.extract_strided_slice %53 {offsets = [0, 32], sizes = [9, 16], strides = [1, 1]} : vector<18x96xf32> to vector<9x16xf32>
    %57 = vector.extract_strided_slice %53 {offsets = [0, 64], sizes = [9, 16], strides = [1, 1]} : vector<18x96xf32> to vector<9x16xf32>
    %cst_29 = arith.constant dense<0.000000e+00> : vector<9x9xf32>
    %58 = tpu.matmul %55, %56, %cst_29 {dimension_numbers = #tpu.dot_dimension_numbers<[1], [1], [0], [0], [0, 0, 1, 0], [], []>} : vector<9x16xf32>, vector<9x16xf32>, vector<9x9xf32> -> vector<9x9xf32>
    %cst_30 = arith.constant 2.500000e-01 : f32
    %59 = vector.broadcast %cst_30 : f32 to vector<9x9xf32>
    %60 = arith.mulf %58, %59 : vector<9x9xf32>
    %cst_31 = arith.constant dense<0xFF800000> : vector<9xf32>
    %61 = vector.multi_reduction <maximumf>, %60, %cst_31 [1] : vector<9x9xf32> to vector<9xf32>
    %62 = vector.shape_cast %61 : vector<9xf32> to vector<9x1xf32>
    %63 = vector.broadcast %62 : vector<9x1xf32> to vector<9x9xf32>
    %64 = arith.subf %60, %63 : vector<9x9xf32>
    %65 = math.exp %64 : vector<9x9xf32>
    %cst_32 = arith.constant dense<0.000000e+00> : vector<9xf32>
    %66 = vector.multi_reduction <add>, %65, %cst_32 [1] : vector<9x9xf32> to vector<9xf32>
    %67 = vector.shape_cast %66 : vector<9xf32> to vector<9x1xf32>
    %68 = tpu.reciprocal %67 {approx = true} : vector<9x1xf32> -> vector<9x1xf32>
    %69 = vector.broadcast %68 : vector<9x1xf32> to vector<9x9xf32>
    %70 = arith.mulf %65, %69 : vector<9x9xf32>
    %cst_33 = arith.constant dense<0.000000e+00> : vector<9x16xf32>
    %71 = tpu.matmul %70, %57, %cst_33 {dimension_numbers = #tpu.dot_dimension_numbers<[1], [0], [0], [1], [0, 0, 1, 1], [], []>} : vector<9x9xf32>, vector<9x16xf32>, vector<9x16xf32> -> vector<9x16xf32>
    %72 = vector.extract_strided_slice %54 {offsets = [0, 0], sizes = [16, 32], strides = [1, 1]} : vector<32x32xf32> to vector<16x32xf32>
    %cst_34 = arith.constant dense<0.000000e+00> : vector<9x32xf32>
    %73 = tpu.matmul %71, %72, %cst_34 {dimension_numbers = #tpu.dot_dimension_numbers<[1], [0], [0], [1], [0, 0, 1, 1], [], []>} : vector<9x16xf32>, vector<16x32xf32>, vector<9x32xf32> -> vector<9x32xf32>
    %74 = vector.extract_strided_slice %53 {offsets = [0, 16], sizes = [9, 16], strides = [1, 1]} : vector<18x96xf32> to vector<9x16xf32>
    %75 = vector.extract_strided_slice %53 {offsets = [0, 48], sizes = [9, 16], strides = [1, 1]} : vector<18x96xf32> to vector<9x16xf32>
    %76 = vector.extract_strided_slice %53 {offsets = [0, 80], sizes = [9, 16], strides = [1, 1]} : vector<18x96xf32> to vector<9x16xf32>
    %cst_35 = arith.constant dense<0.000000e+00> : vector<9x9xf32>
    %77 = tpu.matmul %74, %75, %cst_35 {dimension_numbers = #tpu.dot_dimension_numbers<[1], [1], [0], [0], [0, 0, 1, 0], [], []>} : vector<9x16xf32>, vector<9x16xf32>, vector<9x9xf32> -> vector<9x9xf32>
    %cst_36 = arith.constant 2.500000e-01 : f32
    %78 = vector.broadcast %cst_36 : f32 to vector<9x9xf32>
    %79 = arith.mulf %77, %78 : vector<9x9xf32>
    %cst_37 = arith.constant dense<0xFF800000> : vector<9xf32>
    %80 = vector.multi_reduction <maximumf>, %79, %cst_37 [1] : vector<9x9xf32> to vector<9xf32>
    %81 = vector.shape_cast %80 : vector<9xf32> to vector<9x1xf32>
    %82 = vector.broadcast %81 : vector<9x1xf32> to vector<9x9xf32>
    %83 = arith.subf %79, %82 : vector<9x9xf32>
    %84 = math.exp %83 : vector<9x9xf32>
    %cst_38 = arith.constant dense<0.000000e+00> : vector<9xf32>
    %85 = vector.multi_reduction <add>, %84, %cst_38 [1] : vector<9x9xf32> to vector<9xf32>
    %86 = vector.shape_cast %85 : vector<9xf32> to vector<9x1xf32>
    %87 = tpu.reciprocal %86 {approx = true} : vector<9x1xf32> -> vector<9x1xf32>
    %88 = vector.broadcast %87 : vector<9x1xf32> to vector<9x9xf32>
    %89 = arith.mulf %84, %88 : vector<9x9xf32>
    %cst_39 = arith.constant dense<0.000000e+00> : vector<9x16xf32>
    %90 = tpu.matmul %89, %76, %cst_39 {dimension_numbers = #tpu.dot_dimension_numbers<[1], [0], [0], [1], [0, 0, 1, 1], [], []>} : vector<9x9xf32>, vector<9x16xf32>, vector<9x16xf32> -> vector<9x16xf32>
    %91 = vector.extract_strided_slice %54 {offsets = [16, 0], sizes = [16, 32], strides = [1, 1]} : vector<32x32xf32> to vector<16x32xf32>
    %cst_40 = arith.constant dense<0.000000e+00> : vector<9x32xf32>
    %92 = tpu.matmul %90, %91, %cst_40 {dimension_numbers = #tpu.dot_dimension_numbers<[1], [0], [0], [1], [0, 0, 1, 1], [], []>} : vector<9x16xf32>, vector<16x32xf32>, vector<9x32xf32> -> vector<9x32xf32>
    %93 = arith.addf %73, %92 : vector<9x32xf32>
    %94 = vector.extract_strided_slice %53 {offsets = [9, 0], sizes = [9, 16], strides = [1, 1]} : vector<18x96xf32> to vector<9x16xf32>
    %95 = vector.extract_strided_slice %53 {offsets = [9, 32], sizes = [9, 16], strides = [1, 1]} : vector<18x96xf32> to vector<9x16xf32>
    %96 = vector.extract_strided_slice %53 {offsets = [9, 64], sizes = [9, 16], strides = [1, 1]} : vector<18x96xf32> to vector<9x16xf32>
    %cst_41 = arith.constant dense<0.000000e+00> : vector<9x9xf32>
    %97 = tpu.matmul %94, %95, %cst_41 {dimension_numbers = #tpu.dot_dimension_numbers<[1], [1], [0], [0], [0, 0, 1, 0], [], []>} : vector<9x16xf32>, vector<9x16xf32>, vector<9x9xf32> -> vector<9x9xf32>
    %cst_42 = arith.constant 2.500000e-01 : f32
    %98 = vector.broadcast %cst_42 : f32 to vector<9x9xf32>
    %99 = arith.mulf %97, %98 : vector<9x9xf32>
    %cst_43 = arith.constant dense<0xFF800000> : vector<9xf32>
    %100 = vector.multi_reduction <maximumf>, %99, %cst_43 [1] : vector<9x9xf32> to vector<9xf32>
    %101 = vector.shape_cast %100 : vector<9xf32> to vector<9x1xf32>
    %102 = vector.broadcast %101 : vector<9x1xf32> to vector<9x9xf32>
    %103 = arith.subf %99, %102 : vector<9x9xf32>
    %104 = math.exp %103 : vector<9x9xf32>
    %cst_44 = arith.constant dense<0.000000e+00> : vector<9xf32>
    %105 = vector.multi_reduction <add>, %104, %cst_44 [1] : vector<9x9xf32> to vector<9xf32>
    %106 = vector.shape_cast %105 : vector<9xf32> to vector<9x1xf32>
    %107 = tpu.reciprocal %106 {approx = true} : vector<9x1xf32> -> vector<9x1xf32>
    %108 = vector.broadcast %107 : vector<9x1xf32> to vector<9x9xf32>
    %109 = arith.mulf %104, %108 : vector<9x9xf32>
    %cst_45 = arith.constant dense<0.000000e+00> : vector<9x16xf32>
    %110 = tpu.matmul %109, %96, %cst_45 {dimension_numbers = #tpu.dot_dimension_numbers<[1], [0], [0], [1], [0, 0, 1, 1], [], []>} : vector<9x9xf32>, vector<9x16xf32>, vector<9x16xf32> -> vector<9x16xf32>
    %111 = vector.extract_strided_slice %54 {offsets = [0, 0], sizes = [16, 32], strides = [1, 1]} : vector<32x32xf32> to vector<16x32xf32>
    %cst_46 = arith.constant dense<0.000000e+00> : vector<9x32xf32>
    %112 = tpu.matmul %110, %111, %cst_46 {dimension_numbers = #tpu.dot_dimension_numbers<[1], [0], [0], [1], [0, 0, 1, 1], [], []>} : vector<9x16xf32>, vector<16x32xf32>, vector<9x32xf32> -> vector<9x32xf32>
    %113 = vector.extract_strided_slice %53 {offsets = [9, 16], sizes = [9, 16], strides = [1, 1]} : vector<18x96xf32> to vector<9x16xf32>
    %114 = vector.extract_strided_slice %53 {offsets = [9, 48], sizes = [9, 16], strides = [1, 1]} : vector<18x96xf32> to vector<9x16xf32>
    %115 = vector.extract_strided_slice %53 {offsets = [9, 80], sizes = [9, 16], strides = [1, 1]} : vector<18x96xf32> to vector<9x16xf32>
    %cst_47 = arith.constant dense<0.000000e+00> : vector<9x9xf32>
    %116 = tpu.matmul %113, %114, %cst_47 {dimension_numbers = #tpu.dot_dimension_numbers<[1], [1], [0], [0], [0, 0, 1, 0], [], []>} : vector<9x16xf32>, vector<9x16xf32>, vector<9x9xf32> -> vector<9x9xf32>
    %cst_48 = arith.constant 2.500000e-01 : f32
    %117 = vector.broadcast %cst_48 : f32 to vector<9x9xf32>
    %118 = arith.mulf %116, %117 : vector<9x9xf32>
    %cst_49 = arith.constant dense<0xFF800000> : vector<9xf32>
    %119 = vector.multi_reduction <maximumf>, %118, %cst_49 [1] : vector<9x9xf32> to vector<9xf32>
    %120 = vector.shape_cast %119 : vector<9xf32> to vector<9x1xf32>
    %121 = vector.broadcast %120 : vector<9x1xf32> to vector<9x9xf32>
    %122 = arith.subf %118, %121 : vector<9x9xf32>
    %123 = math.exp %122 : vector<9x9xf32>
    %cst_50 = arith.constant dense<0.000000e+00> : vector<9xf32>
    %124 = vector.multi_reduction <add>, %123, %cst_50 [1] : vector<9x9xf32> to vector<9xf32>
    %125 = vector.shape_cast %124 : vector<9xf32> to vector<9x1xf32>
    %126 = tpu.reciprocal %125 {approx = true} : vector<9x1xf32> -> vector<9x1xf32>
    %127 = vector.broadcast %126 : vector<9x1xf32> to vector<9x9xf32>
    %128 = arith.mulf %123, %127 : vector<9x9xf32>
    %cst_51 = arith.constant dense<0.000000e+00> : vector<9x16xf32>
    %129 = tpu.matmul %128, %115, %cst_51 {dimension_numbers = #tpu.dot_dimension_numbers<[1], [0], [0], [1], [0, 0, 1, 1], [], []>} : vector<9x9xf32>, vector<9x16xf32>, vector<9x16xf32> -> vector<9x16xf32>
    %130 = vector.extract_strided_slice %54 {offsets = [16, 0], sizes = [16, 32], strides = [1, 1]} : vector<32x32xf32> to vector<16x32xf32>
    %cst_52 = arith.constant dense<0.000000e+00> : vector<9x32xf32>
    %131 = tpu.matmul %129, %130, %cst_52 {dimension_numbers = #tpu.dot_dimension_numbers<[1], [0], [0], [1], [0, 0, 1, 1], [], []>} : vector<9x16xf32>, vector<16x32xf32>, vector<9x32xf32> -> vector<9x32xf32>
    %132 = arith.addf %112, %131 : vector<9x32xf32>
    %133 = tpu.concatenate %93, %132 in 0 : vector<9x32xf32>, vector<9x32xf32> -> vector<18x32xf32>
    %134 = arith.addf %22, %133 : vector<18x32xf32>
    %c0_53 = arith.constant 0 : index
    %c0_54 = arith.constant 0 : index
    %135 = vector.load %arg27[%c0_53, %c0_54] : memref<1x32xf32, #tpu.memory_space<vmem>>, vector<1x32xf32>
    %136 = vector.broadcast %135 : vector<1x32xf32> to vector<18x32xf32>
    %137 = arith.addf %134, %136 : vector<18x32xf32>
    %cst_55 = arith.constant dense<0.000000e+00> : vector<18xf32>
    %138 = vector.multi_reduction <add>, %137, %cst_55 [1] : vector<18x32xf32> to vector<18xf32>
    %139 = vector.shape_cast %138 : vector<18xf32> to vector<18x1xf32>
    %cst_56 = arith.constant 3.200000e+01 : f32
    %140 = vector.broadcast %cst_56 : f32 to vector<18x1xf32>
    %141 = arith.divf %139, %140 : vector<18x1xf32>
    %142 = vector.broadcast %141 : vector<18x1xf32> to vector<18x32xf32>
    %143 = arith.subf %137, %142 : vector<18x32xf32>
    %144 = vector.broadcast %141 : vector<18x1xf32> to vector<18x32xf32>
    %145 = arith.subf %137, %144 : vector<18x32xf32>
    %146 = arith.mulf %143, %145 : vector<18x32xf32>
    %cst_57 = arith.constant dense<0.000000e+00> : vector<18xf32>
    %147 = vector.multi_reduction <add>, %146, %cst_57 [1] : vector<18x32xf32> to vector<18xf32>
    %148 = vector.shape_cast %147 : vector<18xf32> to vector<18x1xf32>
    %cst_58 = arith.constant 3.200000e+01 : f32
    %149 = vector.broadcast %cst_58 : f32 to vector<18x1xf32>
    %150 = arith.divf %148, %149 : vector<18x1xf32>
    %151 = vector.broadcast %141 : vector<18x1xf32> to vector<18x32xf32>
    %152 = arith.subf %137, %151 : vector<18x32xf32>
    %cst_59 = arith.constant 9.99999997E-7 : f32
    %153 = vector.broadcast %cst_59 : f32 to vector<18x1xf32>
    %154 = arith.addf %150, %153 : vector<18x1xf32>
    %155 = math.rsqrt %154 : vector<18x1xf32>
    %156 = vector.broadcast %155 : vector<18x1xf32> to vector<18x32xf32>
    %157 = arith.mulf %152, %156 : vector<18x32xf32>
    %c0_60 = arith.constant 0 : index
    %c0_61 = arith.constant 0 : index
    %158 = vector.load %arg26[%c0_60, %c0_61] : memref<1x32xf32, #tpu.memory_space<vmem>>, vector<1x32xf32>
    %159 = vector.broadcast %158 : vector<1x32xf32> to vector<18x32xf32>
    %160 = arith.mulf %157, %159 : vector<18x32xf32>
    %c0_62 = arith.constant 0 : index
    %c0_63 = arith.constant 0 : index
    %161 = vector.load %arg25[%c0_62, %c0_63] : memref<1x32xf32, #tpu.memory_space<vmem>>, vector<1x32xf32>
    %162 = vector.broadcast %161 : vector<1x32xf32> to vector<18x32xf32>
    %163 = arith.addf %160, %162 : vector<18x32xf32>
    %c0_64 = arith.constant 0 : index
    %c0_65 = arith.constant 0 : index
    %164 = vector.load %arg20[%c0_64, %c0_65] : memref<32x128xf32, #tpu.memory_space<vmem>>, vector<32x128xf32>
    %cst_66 = arith.constant dense<0.000000e+00> : vector<18x128xf32>
    %165 = tpu.matmul %163, %164, %cst_66 {dimension_numbers = #tpu.dot_dimension_numbers<[1], [0], [0], [1], [0, 0, 1, 1], [], []>} : vector<18x32xf32>, vector<32x128xf32>, vector<18x128xf32> -> vector<18x128xf32>
    %c0_67 = arith.constant 0 : index
    %c0_68 = arith.constant 0 : index
    %166 = vector.load %arg19[%c0_67, %c0_68] : memref<1x128xf32, #tpu.memory_space<vmem>>, vector<1x128xf32>
    %167 = vector.broadcast %166 : vector<1x128xf32> to vector<18x128xf32>
    %168 = arith.addf %165, %167 : vector<18x128xf32>
    %169 = arith.mulf %168, %168 : vector<18x128xf32>
    %170 = arith.mulf %168, %169 : vector<18x128xf32>
    %cst_69 = arith.constant 4.471500e-02 : f32
    %171 = vector.broadcast %cst_69 : f32 to vector<18x128xf32>
    %172 = arith.mulf %171, %170 : vector<18x128xf32>
    %173 = arith.addf %168, %172 : vector<18x128xf32>
    %cst_70 = arith.constant 0.797884583 : f32
    %174 = vector.broadcast %cst_70 : f32 to vector<18x128xf32>
    %175 = arith.mulf %174, %173 : vector<18x128xf32>
    %176 = math.tanh %175 : vector<18x128xf32>
    %cst_71 = arith.constant 1.000000e+00 : f32
    %177 = vector.broadcast %cst_71 : f32 to vector<18x128xf32>
    %178 = arith.addf %177, %176 : vector<18x128xf32>
    %cst_72 = arith.constant 5.000000e-01 : f32
    %179 = vector.broadcast %cst_72 : f32 to vector<18x128xf32>
    %180 = arith.mulf %179, %178 : vector<18x128xf32>
    %181 = arith.mulf %168, %180 : vector<18x128xf32>
    %c0_73 = arith.constant 0 : index
    %c0_74 = arith.constant 0 : index
    %182 = vector.load %arg22[%c0_73, %c0_74] : memref<128x32xf32, #tpu.memory_space<vmem>>, vector<128x32xf32>
    %cst_75 = arith.constant dense<0.000000e+00> : vector<18x32xf32>
    %183 = tpu.matmul %181, %182, %cst_75 {dimension_numbers = #tpu.dot_dimension_numbers<[1], [0], [0], [1], [0, 0, 1, 1], [], []>} : vector<18x128xf32>, vector<128x32xf32>, vector<18x32xf32> -> vector<18x32xf32>
    %c0_76 = arith.constant 0 : index
    %c0_77 = arith.constant 0 : index
    %184 = vector.load %arg21[%c0_76, %c0_77] : memref<1x32xf32, #tpu.memory_space<vmem>>, vector<1x32xf32>
    %185 = vector.broadcast %184 : vector<1x32xf32> to vector<18x32xf32>
    %186 = arith.addf %183, %185 : vector<18x32xf32>
    %187 = arith.addf %137, %186 : vector<18x32xf32>
    %cst_78 = arith.constant dense<0.000000e+00> : vector<18xf32>
    %188 = vector.multi_reduction <add>, %187, %cst_78 [1] : vector<18x32xf32> to vector<18xf32>
    %189 = vector.shape_cast %188 : vector<18xf32> to vector<18x1xf32>
    %cst_79 = arith.constant 3.200000e+01 : f32
    %190 = vector.broadcast %cst_79 : f32 to vector<18x1xf32>
    %191 = arith.divf %189, %190 : vector<18x1xf32>
    %192 = vector.broadcast %191 : vector<18x1xf32> to vector<18x32xf32>
    %193 = arith.subf %187, %192 : vector<18x32xf32>
    %194 = vector.broadcast %191 : vector<18x1xf32> to vector<18x32xf32>
    %195 = arith.subf %187, %194 : vector<18x32xf32>
    %196 = arith.mulf %193, %195 : vector<18x32xf32>
    %cst_80 = arith.constant dense<0.000000e+00> : vector<18xf32>
    %197 = vector.multi_reduction <add>, %196, %cst_80 [1] : vector<18x32xf32> to vector<18xf32>
    %198 = vector.shape_cast %197 : vector<18xf32> to vector<18x1xf32>
    %cst_81 = arith.constant 3.200000e+01 : f32
    %199 = vector.broadcast %cst_81 : f32 to vector<18x1xf32>
    %200 = arith.divf %198, %199 : vector<18x1xf32>
    %201 = vector.broadcast %191 : vector<18x1xf32> to vector<18x32xf32>
    %202 = arith.subf %187, %201 : vector<18x32xf32>
    %cst_82 = arith.constant 9.99999997E-7 : f32
    %203 = vector.broadcast %cst_82 : f32 to vector<18x1xf32>
    %204 = arith.addf %200, %203 : vector<18x1xf32>
    %205 = math.rsqrt %204 : vector<18x1xf32>
    %206 = vector.broadcast %205 : vector<18x1xf32> to vector<18x32xf32>
    %207 = arith.mulf %202, %206 : vector<18x32xf32>
    %c0_83 = arith.constant 0 : index
    %c0_84 = arith.constant 0 : index
    %208 = vector.load %arg36[%c0_83, %c0_84] : memref<1x32xf32, #tpu.memory_space<vmem>>, vector<1x32xf32>
    %209 = vector.broadcast %208 : vector<1x32xf32> to vector<18x32xf32>
    %210 = arith.mulf %207, %209 : vector<18x32xf32>
    %c0_85 = arith.constant 0 : index
    %c0_86 = arith.constant 0 : index
    %211 = vector.load %arg35[%c0_85, %c0_86] : memref<1x32xf32, #tpu.memory_space<vmem>>, vector<1x32xf32>
    %212 = vector.broadcast %211 : vector<1x32xf32> to vector<18x32xf32>
    %213 = arith.addf %210, %212 : vector<18x32xf32>
    %c0_87 = arith.constant 0 : index
    %c0_88 = arith.constant 0 : index
    %214 = vector.load %arg42[%c0_87, %c0_88] : memref<32x96xf32, #tpu.memory_space<vmem>>, vector<32x96xf32>
    %cst_89 = arith.constant dense<0.000000e+00> : vector<18x96xf32>
    %215 = tpu.matmul %213, %214, %cst_89 {dimension_numbers = #tpu.dot_dimension_numbers<[1], [0], [0], [1], [0, 0, 1, 1], [], []>} : vector<18x32xf32>, vector<32x96xf32>, vector<18x96xf32> -> vector<18x96xf32>
    %c0_90 = arith.constant 0 : index
    %c0_91 = arith.constant 0 : index
    %216 = vector.load %arg41[%c0_90, %c0_91] : memref<1x96xf32, #tpu.memory_space<vmem>>, vector<1x96xf32>
    %217 = vector.broadcast %216 : vector<1x96xf32> to vector<18x96xf32>
    %218 = arith.addf %215, %217 : vector<18x96xf32>
    %c0_92 = arith.constant 0 : index
    %c0_93 = arith.constant 0 : index
    %219 = vector.load %arg40[%c0_92, %c0_93] : memref<32x32xf32, #tpu.memory_space<vmem>>, vector<32x32xf32>
    %220 = vector.extract_strided_slice %218 {offsets = [0, 0], sizes = [9, 16], strides = [1, 1]} : vector<18x96xf32> to vector<9x16xf32>
    %221 = vector.extract_strided_slice %218 {offsets = [0, 32], sizes = [9, 16], strides = [1, 1]} : vector<18x96xf32> to vector<9x16xf32>
    %222 = vector.extract_strided_slice %218 {offsets = [0, 64], sizes = [9, 16], strides = [1, 1]} : vector<18x96xf32> to vector<9x16xf32>
    %cst_94 = arith.constant dense<0.000000e+00> : vector<9x9xf32>
    %223 = tpu.matmul %220, %221, %cst_94 {dimension_numbers = #tpu.dot_dimension_numbers<[1], [1], [0], [0], [0, 0, 1, 0], [], []>} : vector<9x16xf32>, vector<9x16xf32>, vector<9x9xf32> -> vector<9x9xf32>
    %cst_95 = arith.constant 2.500000e-01 : f32
    %224 = vector.broadcast %cst_95 : f32 to vector<9x9xf32>
    %225 = arith.mulf %223, %224 : vector<9x9xf32>
    %cst_96 = arith.constant dense<0xFF800000> : vector<9xf32>
    %226 = vector.multi_reduction <maximumf>, %225, %cst_96 [1] : vector<9x9xf32> to vector<9xf32>
    %227 = vector.shape_cast %226 : vector<9xf32> to vector<9x1xf32>
    %228 = vector.broadcast %227 : vector<9x1xf32> to vector<9x9xf32>
    %229 = arith.subf %225, %228 : vector<9x9xf32>
    %230 = math.exp %229 : vector<9x9xf32>
    %cst_97 = arith.constant dense<0.000000e+00> : vector<9xf32>
    %231 = vector.multi_reduction <add>, %230, %cst_97 [1] : vector<9x9xf32> to vector<9xf32>
    %232 = vector.shape_cast %231 : vector<9xf32> to vector<9x1xf32>
    %233 = tpu.reciprocal %232 {approx = true} : vector<9x1xf32> -> vector<9x1xf32>
    %234 = vector.broadcast %233 : vector<9x1xf32> to vector<9x9xf32>
    %235 = arith.mulf %230, %234 : vector<9x9xf32>
    %cst_98 = arith.constant dense<0.000000e+00> : vector<9x16xf32>
    %236 = tpu.matmul %235, %222, %cst_98 {dimension_numbers = #tpu.dot_dimension_numbers<[1], [0], [0], [1], [0, 0, 1, 1], [], []>} : vector<9x9xf32>, vector<9x16xf32>, vector<9x16xf32> -> vector<9x16xf32>
    %237 = vector.extract_strided_slice %219 {offsets = [0, 0], sizes = [16, 32], strides = [1, 1]} : vector<32x32xf32> to vector<16x32xf32>
    %cst_99 = arith.constant dense<0.000000e+00> : vector<9x32xf32>
    %238 = tpu.matmul %236, %237, %cst_99 {dimension_numbers = #tpu.dot_dimension_numbers<[1], [0], [0], [1], [0, 0, 1, 1], [], []>} : vector<9x16xf32>, vector<16x32xf32>, vector<9x32xf32> -> vector<9x32xf32>
    %239 = vector.extract_strided_slice %218 {offsets = [0, 16], sizes = [9, 16], strides = [1, 1]} : vector<18x96xf32> to vector<9x16xf32>
    %240 = vector.extract_strided_slice %218 {offsets = [0, 48], sizes = [9, 16], strides = [1, 1]} : vector<18x96xf32> to vector<9x16xf32>
    %241 = vector.extract_strided_slice %218 {offsets = [0, 80], sizes = [9, 16], strides = [1, 1]} : vector<18x96xf32> to vector<9x16xf32>
    %cst_100 = arith.constant dense<0.000000e+00> : vector<9x9xf32>
    %242 = tpu.matmul %239, %240, %cst_100 {dimension_numbers = #tpu.dot_dimension_numbers<[1], [1], [0], [0], [0, 0, 1, 0], [], []>} : vector<9x16xf32>, vector<9x16xf32>, vector<9x9xf32> -> vector<9x9xf32>
    %cst_101 = arith.constant 2.500000e-01 : f32
    %243 = vector.broadcast %cst_101 : f32 to vector<9x9xf32>
    %244 = arith.mulf %242, %243 : vector<9x9xf32>
    %cst_102 = arith.constant dense<0xFF800000> : vector<9xf32>
    %245 = vector.multi_reduction <maximumf>, %244, %cst_102 [1] : vector<9x9xf32> to vector<9xf32>
    %246 = vector.shape_cast %245 : vector<9xf32> to vector<9x1xf32>
    %247 = vector.broadcast %246 : vector<9x1xf32> to vector<9x9xf32>
    %248 = arith.subf %244, %247 : vector<9x9xf32>
    %249 = math.exp %248 : vector<9x9xf32>
    %cst_103 = arith.constant dense<0.000000e+00> : vector<9xf32>
    %250 = vector.multi_reduction <add>, %249, %cst_103 [1] : vector<9x9xf32> to vector<9xf32>
    %251 = vector.shape_cast %250 : vector<9xf32> to vector<9x1xf32>
    %252 = tpu.reciprocal %251 {approx = true} : vector<9x1xf32> -> vector<9x1xf32>
    %253 = vector.broadcast %252 : vector<9x1xf32> to vector<9x9xf32>
    %254 = arith.mulf %249, %253 : vector<9x9xf32>
    %cst_104 = arith.constant dense<0.000000e+00> : vector<9x16xf32>
    %255 = tpu.matmul %254, %241, %cst_104 {dimension_numbers = #tpu.dot_dimension_numbers<[1], [0], [0], [1], [0, 0, 1, 1], [], []>} : vector<9x9xf32>, vector<9x16xf32>, vector<9x16xf32> -> vector<9x16xf32>
    %256 = vector.extract_strided_slice %219 {offsets = [16, 0], sizes = [16, 32], strides = [1, 1]} : vector<32x32xf32> to vector<16x32xf32>
    %cst_105 = arith.constant dense<0.000000e+00> : vector<9x32xf32>
    %257 = tpu.matmul %255, %256, %cst_105 {dimension_numbers = #tpu.dot_dimension_numbers<[1], [0], [0], [1], [0, 0, 1, 1], [], []>} : vector<9x16xf32>, vector<16x32xf32>, vector<9x32xf32> -> vector<9x32xf32>
    %258 = arith.addf %238, %257 : vector<9x32xf32>
    %259 = vector.extract_strided_slice %218 {offsets = [9, 0], sizes = [9, 16], strides = [1, 1]} : vector<18x96xf32> to vector<9x16xf32>
    %260 = vector.extract_strided_slice %218 {offsets = [9, 32], sizes = [9, 16], strides = [1, 1]} : vector<18x96xf32> to vector<9x16xf32>
    %261 = vector.extract_strided_slice %218 {offsets = [9, 64], sizes = [9, 16], strides = [1, 1]} : vector<18x96xf32> to vector<9x16xf32>
    %cst_106 = arith.constant dense<0.000000e+00> : vector<9x9xf32>
    %262 = tpu.matmul %259, %260, %cst_106 {dimension_numbers = #tpu.dot_dimension_numbers<[1], [1], [0], [0], [0, 0, 1, 0], [], []>} : vector<9x16xf32>, vector<9x16xf32>, vector<9x9xf32> -> vector<9x9xf32>
    %cst_107 = arith.constant 2.500000e-01 : f32
    %263 = vector.broadcast %cst_107 : f32 to vector<9x9xf32>
    %264 = arith.mulf %262, %263 : vector<9x9xf32>
    %cst_108 = arith.constant dense<0xFF800000> : vector<9xf32>
    %265 = vector.multi_reduction <maximumf>, %264, %cst_108 [1] : vector<9x9xf32> to vector<9xf32>
    %266 = vector.shape_cast %265 : vector<9xf32> to vector<9x1xf32>
    %267 = vector.broadcast %266 : vector<9x1xf32> to vector<9x9xf32>
    %268 = arith.subf %264, %267 : vector<9x9xf32>
    %269 = math.exp %268 : vector<9x9xf32>
    %cst_109 = arith.constant dense<0.000000e+00> : vector<9xf32>
    %270 = vector.multi_reduction <add>, %269, %cst_109 [1] : vector<9x9xf32> to vector<9xf32>
    %271 = vector.shape_cast %270 : vector<9xf32> to vector<9x1xf32>
    %272 = tpu.reciprocal %271 {approx = true} : vector<9x1xf32> -> vector<9x1xf32>
    %273 = vector.broadcast %272 : vector<9x1xf32> to vector<9x9xf32>
    %274 = arith.mulf %269, %273 : vector<9x9xf32>
    %cst_110 = arith.constant dense<0.000000e+00> : vector<9x16xf32>
    %275 = tpu.matmul %274, %261, %cst_110 {dimension_numbers = #tpu.dot_dimension_numbers<[1], [0], [0], [1], [0, 0, 1, 1], [], []>} : vector<9x9xf32>, vector<9x16xf32>, vector<9x16xf32> -> vector<9x16xf32>
    %276 = vector.extract_strided_slice %219 {offsets = [0, 0], sizes = [16, 32], strides = [1, 1]} : vector<32x32xf32> to vector<16x32xf32>
    %cst_111 = arith.constant dense<0.000000e+00> : vector<9x32xf32>
    %277 = tpu.matmul %275, %276, %cst_111 {dimension_numbers = #tpu.dot_dimension_numbers<[1], [0], [0], [1], [0, 0, 1, 1], [], []>} : vector<9x16xf32>, vector<16x32xf32>, vector<9x32xf32> -> vector<9x32xf32>
    %278 = vector.extract_strided_slice %218 {offsets = [9, 16], sizes = [9, 16], strides = [1, 1]} : vector<18x96xf32> to vector<9x16xf32>
    %279 = vector.extract_strided_slice %218 {offsets = [9, 48], sizes = [9, 16], strides = [1, 1]} : vector<18x96xf32> to vector<9x16xf32>
    %280 = vector.extract_strided_slice %218 {offsets = [9, 80], sizes = [9, 16], strides = [1, 1]} : vector<18x96xf32> to vector<9x16xf32>
    %cst_112 = arith.constant dense<0.000000e+00> : vector<9x9xf32>
    %281 = tpu.matmul %278, %279, %cst_112 {dimension_numbers = #tpu.dot_dimension_numbers<[1], [1], [0], [0], [0, 0, 1, 0], [], []>} : vector<9x16xf32>, vector<9x16xf32>, vector<9x9xf32> -> vector<9x9xf32>
    %cst_113 = arith.constant 2.500000e-01 : f32
    %282 = vector.broadcast %cst_113 : f32 to vector<9x9xf32>
    %283 = arith.mulf %281, %282 : vector<9x9xf32>
    %cst_114 = arith.constant dense<0xFF800000> : vector<9xf32>
    %284 = vector.multi_reduction <maximumf>, %283, %cst_114 [1] : vector<9x9xf32> to vector<9xf32>
    %285 = vector.shape_cast %284 : vector<9xf32> to vector<9x1xf32>
    %286 = vector.broadcast %285 : vector<9x1xf32> to vector<9x9xf32>
    %287 = arith.subf %283, %286 : vector<9x9xf32>
    %288 = math.exp %287 : vector<9x9xf32>
    %cst_115 = arith.constant dense<0.000000e+00> : vector<9xf32>
    %289 = vector.multi_reduction <add>, %288, %cst_115 [1] : vector<9x9xf32> to vector<9xf32>
    %290 = vector.shape_cast %289 : vector<9xf32> to vector<9x1xf32>
    %291 = tpu.reciprocal %290 {approx = true} : vector<9x1xf32> -> vector<9x1xf32>
    %292 = vector.broadcast %291 : vector<9x1xf32> to vector<9x9xf32>
    %293 = arith.mulf %288, %292 : vector<9x9xf32>
    %cst_116 = arith.constant dense<0.000000e+00> : vector<9x16xf32>
    %294 = tpu.matmul %293, %280, %cst_116 {dimension_numbers = #tpu.dot_dimension_numbers<[1], [0], [0], [1], [0, 0, 1, 1], [], []>} : vector<9x9xf32>, vector<9x16xf32>, vector<9x16xf32> -> vector<9x16xf32>
    %295 = vector.extract_strided_slice %219 {offsets = [16, 0], sizes = [16, 32], strides = [1, 1]} : vector<32x32xf32> to vector<16x32xf32>
    %cst_117 = arith.constant dense<0.000000e+00> : vector<9x32xf32>
    %296 = tpu.matmul %294, %295, %cst_117 {dimension_numbers = #tpu.dot_dimension_numbers<[1], [0], [0], [1], [0, 0, 1, 1], [], []>} : vector<9x16xf32>, vector<16x32xf32>, vector<9x32xf32> -> vector<9x32xf32>
    %297 = arith.addf %277, %296 : vector<9x32xf32>
    %298 = tpu.concatenate %258, %297 in 0 : vector<9x32xf32>, vector<9x32xf32> -> vector<18x32xf32>
    %299 = arith.addf %187, %298 : vector<18x32xf32>
    %c0_118 = arith.constant 0 : index
    %c0_119 = arith.constant 0 : index
    %300 = vector.load %arg39[%c0_118, %c0_119] : memref<1x32xf32, #tpu.memory_space<vmem>>, vector<1x32xf32>
    %301 = vector.broadcast %300 : vector<1x32xf32> to vector<18x32xf32>
    %302 = arith.addf %299, %301 : vector<18x32xf32>
    %cst_120 = arith.constant dense<0.000000e+00> : vector<18xf32>
    %303 = vector.multi_reduction <add>, %302, %cst_120 [1] : vector<18x32xf32> to vector<18xf32>
    %304 = vector.shape_cast %303 : vector<18xf32> to vector<18x1xf32>
    %cst_121 = arith.constant 3.200000e+01 : f32
    %305 = vector.broadcast %cst_121 : f32 to vector<18x1xf32>
    %306 = arith.divf %304, %305 : vector<18x1xf32>
    %307 = vector.broadcast %306 : vector<18x1xf32> to vector<18x32xf32>
    %308 = arith.subf %302, %307 : vector<18x32xf32>
    %309 = vector.broadcast %306 : vector<18x1xf32> to vector<18x32xf32>
    %310 = arith.subf %302, %309 : vector<18x32xf32>
    %311 = arith.mulf %308, %310 : vector<18x32xf32>
    %cst_122 = arith.constant dense<0.000000e+00> : vector<18xf32>
    %312 = vector.multi_reduction <add>, %311, %cst_122 [1] : vector<18x32xf32> to vector<18xf32>
    %313 = vector.shape_cast %312 : vector<18xf32> to vector<18x1xf32>
    %cst_123 = arith.constant 3.200000e+01 : f32
    %314 = vector.broadcast %cst_123 : f32 to vector<18x1xf32>
    %315 = arith.divf %313, %314 : vector<18x1xf32>
    %316 = vector.broadcast %306 : vector<18x1xf32> to vector<18x32xf32>
    %317 = arith.subf %302, %316 : vector<18x32xf32>
    %cst_124 = arith.constant 9.99999997E-7 : f32
    %318 = vector.broadcast %cst_124 : f32 to vector<18x1xf32>
    %319 = arith.addf %315, %318 : vector<18x1xf32>
    %320 = math.rsqrt %319 : vector<18x1xf32>
    %321 = vector.broadcast %320 : vector<18x1xf32> to vector<18x32xf32>
    %322 = arith.mulf %317, %321 : vector<18x32xf32>
    %c0_125 = arith.constant 0 : index
    %c0_126 = arith.constant 0 : index
    %323 = vector.load %arg38[%c0_125, %c0_126] : memref<1x32xf32, #tpu.memory_space<vmem>>, vector<1x32xf32>
    %324 = vector.broadcast %323 : vector<1x32xf32> to vector<18x32xf32>
    %325 = arith.mulf %322, %324 : vector<18x32xf32>
    %c0_127 = arith.constant 0 : index
    %c0_128 = arith.constant 0 : index
    %326 = vector.load %arg37[%c0_127, %c0_128] : memref<1x32xf32, #tpu.memory_space<vmem>>, vector<1x32xf32>
    %327 = vector.broadcast %326 : vector<1x32xf32> to vector<18x32xf32>
    %328 = arith.addf %325, %327 : vector<18x32xf32>
    %c0_129 = arith.constant 0 : index
    %c0_130 = arith.constant 0 : index
    %329 = vector.load %arg32[%c0_129, %c0_130] : memref<32x128xf32, #tpu.memory_space<vmem>>, vector<32x128xf32>
    %cst_131 = arith.constant dense<0.000000e+00> : vector<18x128xf32>
    %330 = tpu.matmul %328, %329, %cst_131 {dimension_numbers = #tpu.dot_dimension_numbers<[1], [0], [0], [1], [0, 0, 1, 1], [], []>} : vector<18x32xf32>, vector<32x128xf32>, vector<18x128xf32> -> vector<18x128xf32>
    %c0_132 = arith.constant 0 : index
    %c0_133 = arith.constant 0 : index
    %331 = vector.load %arg31[%c0_132, %c0_133] : memref<1x128xf32, #tpu.memory_space<vmem>>, vector<1x128xf32>
    %332 = vector.broadcast %331 : vector<1x128xf32> to vector<18x128xf32>
    %333 = arith.addf %330, %332 : vector<18x128xf32>
    %334 = arith.mulf %333, %333 : vector<18x128xf32>
    %335 = arith.mulf %333, %334 : vector<18x128xf32>
    %cst_134 = arith.constant 4.471500e-02 : f32
    %336 = vector.broadcast %cst_134 : f32 to vector<18x128xf32>
    %337 = arith.mulf %336, %335 : vector<18x128xf32>
    %338 = arith.addf %333, %337 : vector<18x128xf32>
    %cst_135 = arith.constant 0.797884583 : f32
    %339 = vector.broadcast %cst_135 : f32 to vector<18x128xf32>
    %340 = arith.mulf %339, %338 : vector<18x128xf32>
    %341 = math.tanh %340 : vector<18x128xf32>
    %cst_136 = arith.constant 1.000000e+00 : f32
    %342 = vector.broadcast %cst_136 : f32 to vector<18x128xf32>
    %343 = arith.addf %342, %341 : vector<18x128xf32>
    %cst_137 = arith.constant 5.000000e-01 : f32
    %344 = vector.broadcast %cst_137 : f32 to vector<18x128xf32>
    %345 = arith.mulf %344, %343 : vector<18x128xf32>
    %346 = arith.mulf %333, %345 : vector<18x128xf32>
    %c0_138 = arith.constant 0 : index
    %c0_139 = arith.constant 0 : index
    %347 = vector.load %arg34[%c0_138, %c0_139] : memref<128x32xf32, #tpu.memory_space<vmem>>, vector<128x32xf32>
    %cst_140 = arith.constant dense<0.000000e+00> : vector<18x32xf32>
    %348 = tpu.matmul %346, %347, %cst_140 {dimension_numbers = #tpu.dot_dimension_numbers<[1], [0], [0], [1], [0, 0, 1, 1], [], []>} : vector<18x128xf32>, vector<128x32xf32>, vector<18x32xf32> -> vector<18x32xf32>
    %c0_141 = arith.constant 0 : index
    %c0_142 = arith.constant 0 : index
    %349 = vector.load %arg33[%c0_141, %c0_142] : memref<1x32xf32, #tpu.memory_space<vmem>>, vector<1x32xf32>
    %350 = vector.broadcast %349 : vector<1x32xf32> to vector<18x32xf32>
    %351 = arith.addf %348, %350 : vector<18x32xf32>
    %352 = arith.addf %302, %351 : vector<18x32xf32>
    %cst_143 = arith.constant dense<0.000000e+00> : vector<18xf32>
    %353 = vector.multi_reduction <add>, %352, %cst_143 [1] : vector<18x32xf32> to vector<18xf32>
    %354 = vector.shape_cast %353 : vector<18xf32> to vector<18x1xf32>
    %cst_144 = arith.constant 3.200000e+01 : f32
    %355 = vector.broadcast %cst_144 : f32 to vector<18x1xf32>
    %356 = arith.divf %354, %355 : vector<18x1xf32>
    %357 = vector.broadcast %356 : vector<18x1xf32> to vector<18x32xf32>
    %358 = arith.subf %352, %357 : vector<18x32xf32>
    %359 = vector.broadcast %356 : vector<18x1xf32> to vector<18x32xf32>
    %360 = arith.subf %352, %359 : vector<18x32xf32>
    %361 = arith.mulf %358, %360 : vector<18x32xf32>
    %cst_145 = arith.constant dense<0.000000e+00> : vector<18xf32>
    %362 = vector.multi_reduction <add>, %361, %cst_145 [1] : vector<18x32xf32> to vector<18xf32>
    %363 = vector.shape_cast %362 : vector<18xf32> to vector<18x1xf32>
    %cst_146 = arith.constant 3.200000e+01 : f32
    %364 = vector.broadcast %cst_146 : f32 to vector<18x1xf32>
    %365 = arith.divf %363, %364 : vector<18x1xf32>
    %366 = vector.broadcast %356 : vector<18x1xf32> to vector<18x32xf32>
    %367 = arith.subf %352, %366 : vector<18x32xf32>
    %cst_147 = arith.constant 9.99999997E-7 : f32
    %368 = vector.broadcast %cst_147 : f32 to vector<18x1xf32>
    %369 = arith.addf %365, %368 : vector<18x1xf32>
    %370 = math.rsqrt %369 : vector<18x1xf32>
    %371 = vector.broadcast %370 : vector<18x1xf32> to vector<18x32xf32>
    %372 = arith.mulf %367, %371 : vector<18x32xf32>
    %c0_148 = arith.constant 0 : index
    %c0_149 = arith.constant 0 : index
    %373 = vector.load %arg44[%c0_148, %c0_149] : memref<1x32xf32, #tpu.memory_space<vmem>>, vector<1x32xf32>
    %374 = vector.broadcast %373 : vector<1x32xf32> to vector<18x32xf32>
    %375 = arith.mulf %372, %374 : vector<18x32xf32>
    %c0_150 = arith.constant 0 : index
    %c0_151 = arith.constant 0 : index
    %376 = vector.load %arg43[%c0_150, %c0_151] : memref<1x32xf32, #tpu.memory_space<vmem>>, vector<1x32xf32>
    %377 = vector.broadcast %376 : vector<1x32xf32> to vector<18x32xf32>
    %378 = arith.addf %375, %377 : vector<18x32xf32>
    %c0_152 = arith.constant 0 : index
    %c0_153 = arith.constant 0 : index
    %379 = vector.load %arg53[%c0_152, %c0_153] : memref<32x16xf32, #tpu.memory_space<vmem>>, vector<32x16xf32>
    %380 = vector.extract_strided_slice %378 {offsets = [1, 0], sizes = [8, 32], strides = [1, 1]} : vector<18x32xf32> to vector<8x32xf32>
    %381 = vector.extract_strided_slice %378 {offsets = [10, 0], sizes = [8, 32], strides = [1, 1]} : vector<18x32xf32> to vector<8x32xf32>
    %382 = tpu.concatenate %380, %381 in 0 : vector<8x32xf32>, vector<8x32xf32> -> vector<16x32xf32>
    %c0_154 = arith.constant 0 : index
    %c0_155 = arith.constant 0 : index
    %383 = vector.load %arg15[%c0_154, %c0_155] : memref<32x32xf32, #tpu.memory_space<vmem>>, vector<32x32xf32>
    %cst_156 = arith.constant dense<0.000000e+00> : vector<16x32xf32>
    %384 = tpu.matmul %382, %383, %cst_156 {dimension_numbers = #tpu.dot_dimension_numbers<[1], [0], [0], [1], [0, 0, 1, 1], [], []>} : vector<16x32xf32>, vector<32x32xf32>, vector<16x32xf32> -> vector<16x32xf32>
    %c0_157 = arith.constant 0 : index
    %c0_158 = arith.constant 0 : index
    %385 = vector.load %arg14[%c0_157, %c0_158] : memref<1x32xf32, #tpu.memory_space<vmem>>, vector<1x32xf32>
    %386 = vector.broadcast %385 : vector<1x32xf32> to vector<16x32xf32>
    %387 = arith.addf %384, %386 : vector<16x32xf32>
    %c0_159 = arith.constant 0 : index
    %c0_160 = arith.constant 0 : index
    %388 = vector.load %arg47[%c0_159, %c0_160] : memref<1x32xf32, #tpu.memory_space<vmem>>, vector<1x32xf32>
    %389 = vector.shape_cast %388 : vector<1x32xf32> to vector<1x32xf32>
    %390 = vector.broadcast %389 : vector<1x32xf32> to vector<8x32xf32>
    %c0_161 = arith.constant 0 : index
    %c0_162 = arith.constant 0 : index
    %391 = vector.load %arg18[%c0_161, %c0_162] : memref<16x32xf32, #tpu.memory_space<vmem>>, vector<16x32xf32>
    %392 = vector.extract_strided_slice %387 {offsets = [0, 0], sizes = [8, 32], strides = [1, 1]} : vector<16x32xf32> to vector<8x32xf32>
    %393 = tpu.concatenate %392, %390 in 0 : vector<8x32xf32>, vector<8x32xf32> -> vector<16x32xf32>
    %394 = vector.extract_strided_slice %379 {offsets = [0, 0], sizes = [16, 16], strides = [1, 1]} : vector<32x16xf32> to vector<16x16xf32>
    %cst_163 = arith.constant dense<0.000000e+00> : vector<16x32xf32>
    %395 = tpu.matmul %394, %393, %cst_163 {dimension_numbers = #tpu.dot_dimension_numbers<[1], [0], [0], [1], [0, 0, 1, 1], [], []>} : vector<16x16xf32>, vector<16x32xf32>, vector<16x32xf32> -> vector<16x32xf32>
    %396 = arith.addf %395, %391 : vector<16x32xf32>
    %397 = vector.extract_strided_slice %387 {offsets = [8, 0], sizes = [8, 32], strides = [1, 1]} : vector<16x32xf32> to vector<8x32xf32>
    %398 = tpu.concatenate %397, %390 in 0 : vector<8x32xf32>, vector<8x32xf32> -> vector<16x32xf32>
    %399 = vector.extract_strided_slice %379 {offsets = [16, 0], sizes = [16, 16], strides = [1, 1]} : vector<32x16xf32> to vector<16x16xf32>
    %cst_164 = arith.constant dense<0.000000e+00> : vector<16x32xf32>
    %400 = tpu.matmul %399, %398, %cst_164 {dimension_numbers = #tpu.dot_dimension_numbers<[1], [0], [0], [1], [0, 0, 1, 1], [], []>} : vector<16x16xf32>, vector<16x32xf32>, vector<16x32xf32> -> vector<16x32xf32>
    %401 = arith.addf %400, %391 : vector<16x32xf32>
    %402 = tpu.concatenate %396, %401 in 0 : vector<16x32xf32>, vector<16x32xf32> -> vector<32x32xf32>
    %cst_165 = arith.constant dense<0.000000e+00> : vector<32xf32>
    %403 = vector.multi_reduction <add>, %402, %cst_165 [1] : vector<32x32xf32> to vector<32xf32>
    %404 = vector.shape_cast %403 : vector<32xf32> to vector<32x1xf32>
    %cst_166 = arith.constant 3.200000e+01 : f32
    %405 = vector.broadcast %cst_166 : f32 to vector<32x1xf32>
    %406 = arith.divf %404, %405 : vector<32x1xf32>
    %407 = vector.broadcast %406 : vector<32x1xf32> to vector<32x32xf32>
    %408 = arith.subf %402, %407 : vector<32x32xf32>
    %409 = vector.broadcast %406 : vector<32x1xf32> to vector<32x32xf32>
    %410 = arith.subf %402, %409 : vector<32x32xf32>
    %411 = arith.mulf %408, %410 : vector<32x32xf32>
    %cst_167 = arith.constant dense<0.000000e+00> : vector<32xf32>
    %412 = vector.multi_reduction <add>, %411, %cst_167 [1] : vector<32x32xf32> to vector<32xf32>
    %413 = vector.shape_cast %412 : vector<32xf32> to vector<32x1xf32>
    %cst_168 = arith.constant 3.200000e+01 : f32
    %414 = vector.broadcast %cst_168 : f32 to vector<32x1xf32>
    %415 = arith.divf %413, %414 : vector<32x1xf32>
    %416 = vector.broadcast %406 : vector<32x1xf32> to vector<32x32xf32>
    %417 = arith.subf %402, %416 : vector<32x32xf32>
    %cst_169 = arith.constant 9.99999997E-7 : f32
    %418 = vector.broadcast %cst_169 : f32 to vector<32x1xf32>
    %419 = arith.addf %415, %418 : vector<32x1xf32>
    %420 = math.rsqrt %419 : vector<32x1xf32>
    %421 = vector.broadcast %420 : vector<32x1xf32> to vector<32x32xf32>
    %422 = arith.mulf %417, %421 : vector<32x32xf32>
    %c0_170 = arith.constant 0 : index
    %c0_171 = arith.constant 0 : index
    %423 = vector.load %arg7[%c0_170, %c0_171] : memref<1x32xf32, #tpu.memory_space<vmem>>, vector<1x32xf32>
    %424 = vector.broadcast %423 : vector<1x32xf32> to vector<32x32xf32>
    %425 = arith.mulf %422, %424 : vector<32x32xf32>
    %c0_172 = arith.constant 0 : index
    %c0_173 = arith.constant 0 : index
    %426 = vector.load %arg6[%c0_172, %c0_173] : memref<1x32xf32, #tpu.memory_space<vmem>>, vector<1x32xf32>
    %427 = vector.broadcast %426 : vector<1x32xf32> to vector<32x32xf32>
    %428 = arith.addf %425, %427 : vector<32x32xf32>
    %c0_174 = arith.constant 0 : index
    %c0_175 = arith.constant 0 : index
    %429 = vector.load %arg13[%c0_174, %c0_175] : memref<32x96xf32, #tpu.memory_space<vmem>>, vector<32x96xf32>
    %cst_176 = arith.constant dense<0.000000e+00> : vector<32x96xf32>
    %430 = tpu.matmul %428, %429, %cst_176 {dimension_numbers = #tpu.dot_dimension_numbers<[1], [0], [0], [1], [0, 0, 1, 1], [], []>} : vector<32x32xf32>, vector<32x96xf32>, vector<32x96xf32> -> vector<32x96xf32>
    %c0_177 = arith.constant 0 : index
    %c0_178 = arith.constant 0 : index
    %431 = vector.load %arg12[%c0_177, %c0_178] : memref<1x96xf32, #tpu.memory_space<vmem>>, vector<1x96xf32>
    %432 = vector.broadcast %431 : vector<1x96xf32> to vector<32x96xf32>
    %433 = arith.addf %430, %432 : vector<32x96xf32>
    %c0_179 = arith.constant 0 : index
    %c0_180 = arith.constant 0 : index
    %434 = vector.load %arg11[%c0_179, %c0_180] : memref<32x32xf32, #tpu.memory_space<vmem>>, vector<32x32xf32>
    %435 = vector.extract_strided_slice %433 {offsets = [0, 0], sizes = [16, 16], strides = [1, 1]} : vector<32x96xf32> to vector<16x16xf32>
    %436 = vector.extract_strided_slice %433 {offsets = [0, 32], sizes = [16, 16], strides = [1, 1]} : vector<32x96xf32> to vector<16x16xf32>
    %437 = vector.extract_strided_slice %433 {offsets = [0, 64], sizes = [16, 16], strides = [1, 1]} : vector<32x96xf32> to vector<16x16xf32>
    %cst_181 = arith.constant dense<0.000000e+00> : vector<16x16xf32>
    %438 = tpu.matmul %435, %436, %cst_181 {dimension_numbers = #tpu.dot_dimension_numbers<[1], [1], [0], [0], [0, 0, 1, 0], [], []>} : vector<16x16xf32>, vector<16x16xf32>, vector<16x16xf32> -> vector<16x16xf32>
    %cst_182 = arith.constant 2.500000e-01 : f32
    %439 = vector.broadcast %cst_182 : f32 to vector<16x16xf32>
    %440 = arith.mulf %438, %439 : vector<16x16xf32>
    %cst_183 = arith.constant dense<0xFF800000> : vector<16xf32>
    %441 = vector.multi_reduction <maximumf>, %440, %cst_183 [1] : vector<16x16xf32> to vector<16xf32>
    %442 = vector.shape_cast %441 : vector<16xf32> to vector<16x1xf32>
    %443 = vector.broadcast %442 : vector<16x1xf32> to vector<16x16xf32>
    %444 = arith.subf %440, %443 : vector<16x16xf32>
    %445 = math.exp %444 : vector<16x16xf32>
    %cst_184 = arith.constant dense<0.000000e+00> : vector<16xf32>
    %446 = vector.multi_reduction <add>, %445, %cst_184 [1] : vector<16x16xf32> to vector<16xf32>
    %447 = vector.shape_cast %446 : vector<16xf32> to vector<16x1xf32>
    %448 = tpu.reciprocal %447 {approx = true} : vector<16x1xf32> -> vector<16x1xf32>
    %449 = vector.broadcast %448 : vector<16x1xf32> to vector<16x16xf32>
    %450 = arith.mulf %445, %449 : vector<16x16xf32>
    %cst_185 = arith.constant dense<0.000000e+00> : vector<16x16xf32>
    %451 = tpu.matmul %450, %437, %cst_185 {dimension_numbers = #tpu.dot_dimension_numbers<[1], [0], [0], [1], [0, 0, 1, 1], [], []>} : vector<16x16xf32>, vector<16x16xf32>, vector<16x16xf32> -> vector<16x16xf32>
    %452 = vector.extract_strided_slice %434 {offsets = [0, 0], sizes = [16, 32], strides = [1, 1]} : vector<32x32xf32> to vector<16x32xf32>
    %cst_186 = arith.constant dense<0.000000e+00> : vector<16x32xf32>
    %453 = tpu.matmul %451, %452, %cst_186 {dimension_numbers = #tpu.dot_dimension_numbers<[1], [0], [0], [1], [0, 0, 1, 1], [], []>} : vector<16x16xf32>, vector<16x32xf32>, vector<16x32xf32> -> vector<16x32xf32>
    %454 = vector.extract_strided_slice %433 {offsets = [0, 16], sizes = [16, 16], strides = [1, 1]} : vector<32x96xf32> to vector<16x16xf32>
    %455 = vector.extract_strided_slice %433 {offsets = [0, 48], sizes = [16, 16], strides = [1, 1]} : vector<32x96xf32> to vector<16x16xf32>
    %456 = vector.extract_strided_slice %433 {offsets = [0, 80], sizes = [16, 16], strides = [1, 1]} : vector<32x96xf32> to vector<16x16xf32>
    %cst_187 = arith.constant dense<0.000000e+00> : vector<16x16xf32>
    %457 = tpu.matmul %454, %455, %cst_187 {dimension_numbers = #tpu.dot_dimension_numbers<[1], [1], [0], [0], [0, 0, 1, 0], [], []>} : vector<16x16xf32>, vector<16x16xf32>, vector<16x16xf32> -> vector<16x16xf32>
    %cst_188 = arith.constant 2.500000e-01 : f32
    %458 = vector.broadcast %cst_188 : f32 to vector<16x16xf32>
    %459 = arith.mulf %457, %458 : vector<16x16xf32>
    %cst_189 = arith.constant dense<0xFF800000> : vector<16xf32>
    %460 = vector.multi_reduction <maximumf>, %459, %cst_189 [1] : vector<16x16xf32> to vector<16xf32>
    %461 = vector.shape_cast %460 : vector<16xf32> to vector<16x1xf32>
    %462 = vector.broadcast %461 : vector<16x1xf32> to vector<16x16xf32>
    %463 = arith.subf %459, %462 : vector<16x16xf32>
    %464 = math.exp %463 : vector<16x16xf32>
    %cst_190 = arith.constant dense<0.000000e+00> : vector<16xf32>
    %465 = vector.multi_reduction <add>, %464, %cst_190 [1] : vector<16x16xf32> to vector<16xf32>
    %466 = vector.shape_cast %465 : vector<16xf32> to vector<16x1xf32>
    %467 = tpu.reciprocal %466 {approx = true} : vector<16x1xf32> -> vector<16x1xf32>
    %468 = vector.broadcast %467 : vector<16x1xf32> to vector<16x16xf32>
    %469 = arith.mulf %464, %468 : vector<16x16xf32>
    %cst_191 = arith.constant dense<0.000000e+00> : vector<16x16xf32>
    %470 = tpu.matmul %469, %456, %cst_191 {dimension_numbers = #tpu.dot_dimension_numbers<[1], [0], [0], [1], [0, 0, 1, 1], [], []>} : vector<16x16xf32>, vector<16x16xf32>, vector<16x16xf32> -> vector<16x16xf32>
    %471 = vector.extract_strided_slice %434 {offsets = [16, 0], sizes = [16, 32], strides = [1, 1]} : vector<32x32xf32> to vector<16x32xf32>
    %cst_192 = arith.constant dense<0.000000e+00> : vector<16x32xf32>
    %472 = tpu.matmul %470, %471, %cst_192 {dimension_numbers = #tpu.dot_dimension_numbers<[1], [0], [0], [1], [0, 0, 1, 1], [], []>} : vector<16x16xf32>, vector<16x32xf32>, vector<16x32xf32> -> vector<16x32xf32>
    %473 = arith.addf %453, %472 : vector<16x32xf32>
    %474 = vector.extract_strided_slice %433 {offsets = [16, 0], sizes = [16, 16], strides = [1, 1]} : vector<32x96xf32> to vector<16x16xf32>
    %475 = vector.extract_strided_slice %433 {offsets = [16, 32], sizes = [16, 16], strides = [1, 1]} : vector<32x96xf32> to vector<16x16xf32>
    %476 = vector.extract_strided_slice %433 {offsets = [16, 64], sizes = [16, 16], strides = [1, 1]} : vector<32x96xf32> to vector<16x16xf32>
    %cst_193 = arith.constant dense<0.000000e+00> : vector<16x16xf32>
    %477 = tpu.matmul %474, %475, %cst_193 {dimension_numbers = #tpu.dot_dimension_numbers<[1], [1], [0], [0], [0, 0, 1, 0], [], []>} : vector<16x16xf32>, vector<16x16xf32>, vector<16x16xf32> -> vector<16x16xf32>
    %cst_194 = arith.constant 2.500000e-01 : f32
    %478 = vector.broadcast %cst_194 : f32 to vector<16x16xf32>
    %479 = arith.mulf %477, %478 : vector<16x16xf32>
    %cst_195 = arith.constant dense<0xFF800000> : vector<16xf32>
    %480 = vector.multi_reduction <maximumf>, %479, %cst_195 [1] : vector<16x16xf32> to vector<16xf32>
    %481 = vector.shape_cast %480 : vector<16xf32> to vector<16x1xf32>
    %482 = vector.broadcast %481 : vector<16x1xf32> to vector<16x16xf32>
    %483 = arith.subf %479, %482 : vector<16x16xf32>
    %484 = math.exp %483 : vector<16x16xf32>
    %cst_196 = arith.constant dense<0.000000e+00> : vector<16xf32>
    %485 = vector.multi_reduction <add>, %484, %cst_196 [1] : vector<16x16xf32> to vector<16xf32>
    %486 = vector.shape_cast %485 : vector<16xf32> to vector<16x1xf32>
    %487 = tpu.reciprocal %486 {approx = true} : vector<16x1xf32> -> vector<16x1xf32>
    %488 = vector.broadcast %487 : vector<16x1xf32> to vector<16x16xf32>
    %489 = arith.mulf %484, %488 : vector<16x16xf32>
    %cst_197 = arith.constant dense<0.000000e+00> : vector<16x16xf32>
    %490 = tpu.matmul %489, %476, %cst_197 {dimension_numbers = #tpu.dot_dimension_numbers<[1], [0], [0], [1], [0, 0, 1, 1], [], []>} : vector<16x16xf32>, vector<16x16xf32>, vector<16x16xf32> -> vector<16x16xf32>
    %491 = vector.extract_strided_slice %434 {offsets = [0, 0], sizes = [16, 32], strides = [1, 1]} : vector<32x32xf32> to vector<16x32xf32>
    %cst_198 = arith.constant dense<0.000000e+00> : vector<16x32xf32>
    %492 = tpu.matmul %490, %491, %cst_198 {dimension_numbers = #tpu.dot_dimension_numbers<[1], [0], [0], [1], [0, 0, 1, 1], [], []>} : vector<16x16xf32>, vector<16x32xf32>, vector<16x32xf32> -> vector<16x32xf32>
    %493 = vector.extract_strided_slice %433 {offsets = [16, 16], sizes = [16, 16], strides = [1, 1]} : vector<32x96xf32> to vector<16x16xf32>
    %494 = vector.extract_strided_slice %433 {offsets = [16, 48], sizes = [16, 16], strides = [1, 1]} : vector<32x96xf32> to vector<16x16xf32>
    %495 = vector.extract_strided_slice %433 {offsets = [16, 80], sizes = [16, 16], strides = [1, 1]} : vector<32x96xf32> to vector<16x16xf32>
    %cst_199 = arith.constant dense<0.000000e+00> : vector<16x16xf32>
    %496 = tpu.matmul %493, %494, %cst_199 {dimension_numbers = #tpu.dot_dimension_numbers<[1], [1], [0], [0], [0, 0, 1, 0], [], []>} : vector<16x16xf32>, vector<16x16xf32>, vector<16x16xf32> -> vector<16x16xf32>
    %cst_200 = arith.constant 2.500000e-01 : f32
    %497 = vector.broadcast %cst_200 : f32 to vector<16x16xf32>
    %498 = arith.mulf %496, %497 : vector<16x16xf32>
    %cst_201 = arith.constant dense<0xFF800000> : vector<16xf32>
    %499 = vector.multi_reduction <maximumf>, %498, %cst_201 [1] : vector<16x16xf32> to vector<16xf32>
    %500 = vector.shape_cast %499 : vector<16xf32> to vector<16x1xf32>
    %501 = vector.broadcast %500 : vector<16x1xf32> to vector<16x16xf32>
    %502 = arith.subf %498, %501 : vector<16x16xf32>
    %503 = math.exp %502 : vector<16x16xf32>
    %cst_202 = arith.constant dense<0.000000e+00> : vector<16xf32>
    %504 = vector.multi_reduction <add>, %503, %cst_202 [1] : vector<16x16xf32> to vector<16xf32>
    %505 = vector.shape_cast %504 : vector<16xf32> to vector<16x1xf32>
    %506 = tpu.reciprocal %505 {approx = true} : vector<16x1xf32> -> vector<16x1xf32>
    %507 = vector.broadcast %506 : vector<16x1xf32> to vector<16x16xf32>
    %508 = arith.mulf %503, %507 : vector<16x16xf32>
    %cst_203 = arith.constant dense<0.000000e+00> : vector<16x16xf32>
    %509 = tpu.matmul %508, %495, %cst_203 {dimension_numbers = #tpu.dot_dimension_numbers<[1], [0], [0], [1], [0, 0, 1, 1], [], []>} : vector<16x16xf32>, vector<16x16xf32>, vector<16x16xf32> -> vector<16x16xf32>
    %510 = vector.extract_strided_slice %434 {offsets = [16, 0], sizes = [16, 32], strides = [1, 1]} : vector<32x32xf32> to vector<16x32xf32>
    %cst_204 = arith.constant dense<0.000000e+00> : vector<16x32xf32>
    %511 = tpu.matmul %509, %510, %cst_204 {dimension_numbers = #tpu.dot_dimension_numbers<[1], [0], [0], [1], [0, 0, 1, 1], [], []>} : vector<16x16xf32>, vector<16x32xf32>, vector<16x32xf32> -> vector<16x32xf32>
    %512 = arith.addf %492, %511 : vector<16x32xf32>
    %513 = tpu.concatenate %473, %512 in 0 : vector<16x32xf32>, vector<16x32xf32> -> vector<32x32xf32>
    %514 = arith.addf %402, %513 : vector<32x32xf32>
    %c0_205 = arith.constant 0 : index
    %c0_206 = arith.constant 0 : index
    %515 = vector.load %arg10[%c0_205, %c0_206] : memref<1x32xf32, #tpu.memory_space<vmem>>, vector<1x32xf32>
    %516 = vector.broadcast %515 : vector<1x32xf32> to vector<32x32xf32>
    %517 = arith.addf %514, %516 : vector<32x32xf32>
    %cst_207 = arith.constant dense<0.000000e+00> : vector<32xf32>
    %518 = vector.multi_reduction <add>, %517, %cst_207 [1] : vector<32x32xf32> to vector<32xf32>
    %519 = vector.shape_cast %518 : vector<32xf32> to vector<32x1xf32>
    %cst_208 = arith.constant 3.200000e+01 : f32
    %520 = vector.broadcast %cst_208 : f32 to vector<32x1xf32>
    %521 = arith.divf %519, %520 : vector<32x1xf32>
    %522 = vector.broadcast %521 : vector<32x1xf32> to vector<32x32xf32>
    %523 = arith.subf %517, %522 : vector<32x32xf32>
    %524 = vector.broadcast %521 : vector<32x1xf32> to vector<32x32xf32>
    %525 = arith.subf %517, %524 : vector<32x32xf32>
    %526 = arith.mulf %523, %525 : vector<32x32xf32>
    %cst_209 = arith.constant dense<0.000000e+00> : vector<32xf32>
    %527 = vector.multi_reduction <add>, %526, %cst_209 [1] : vector<32x32xf32> to vector<32xf32>
    %528 = vector.shape_cast %527 : vector<32xf32> to vector<32x1xf32>
    %cst_210 = arith.constant 3.200000e+01 : f32
    %529 = vector.broadcast %cst_210 : f32 to vector<32x1xf32>
    %530 = arith.divf %528, %529 : vector<32x1xf32>
    %531 = vector.broadcast %521 : vector<32x1xf32> to vector<32x32xf32>
    %532 = arith.subf %517, %531 : vector<32x32xf32>
    %cst_211 = arith.constant 9.99999997E-7 : f32
    %533 = vector.broadcast %cst_211 : f32 to vector<32x1xf32>
    %534 = arith.addf %530, %533 : vector<32x1xf32>
    %535 = math.rsqrt %534 : vector<32x1xf32>
    %536 = vector.broadcast %535 : vector<32x1xf32> to vector<32x32xf32>
    %537 = arith.mulf %532, %536 : vector<32x32xf32>
    %c0_212 = arith.constant 0 : index
    %c0_213 = arith.constant 0 : index
    %538 = vector.load %arg9[%c0_212, %c0_213] : memref<1x32xf32, #tpu.memory_space<vmem>>, vector<1x32xf32>
    %539 = vector.broadcast %538 : vector<1x32xf32> to vector<32x32xf32>
    %540 = arith.mulf %537, %539 : vector<32x32xf32>
    %c0_214 = arith.constant 0 : index
    %c0_215 = arith.constant 0 : index
    %541 = vector.load %arg8[%c0_214, %c0_215] : memref<1x32xf32, #tpu.memory_space<vmem>>, vector<1x32xf32>
    %542 = vector.broadcast %541 : vector<1x32xf32> to vector<32x32xf32>
    %543 = arith.addf %540, %542 : vector<32x32xf32>
    %c0_216 = arith.constant 0 : index
    %c0_217 = arith.constant 0 : index
    %544 = vector.load %arg3[%c0_216, %c0_217] : memref<32x128xf32, #tpu.memory_space<vmem>>, vector<32x128xf32>
    %cst_218 = arith.constant dense<0.000000e+00> : vector<32x128xf32>
    %545 = tpu.matmul %543, %544, %cst_218 {dimension_numbers = #tpu.dot_dimension_numbers<[1], [0], [0], [1], [0, 0, 1, 1], [], []>} : vector<32x32xf32>, vector<32x128xf32>, vector<32x128xf32> -> vector<32x128xf32>
    %c0_219 = arith.constant 0 : index
    %c0_220 = arith.constant 0 : index
    %546 = vector.load %arg2[%c0_219, %c0_220] : memref<1x128xf32, #tpu.memory_space<vmem>>, vector<1x128xf32>
    %547 = vector.broadcast %546 : vector<1x128xf32> to vector<32x128xf32>
    %548 = arith.addf %545, %547 : vector<32x128xf32>
    %549 = arith.mulf %548, %548 : vector<32x128xf32>
    %550 = arith.mulf %548, %549 : vector<32x128xf32>
    %cst_221 = arith.constant 4.471500e-02 : f32
    %551 = vector.broadcast %cst_221 : f32 to vector<32x128xf32>
    %552 = arith.mulf %551, %550 : vector<32x128xf32>
    %553 = arith.addf %548, %552 : vector<32x128xf32>
    %cst_222 = arith.constant 0.797884583 : f32
    %554 = vector.broadcast %cst_222 : f32 to vector<32x128xf32>
    %555 = arith.mulf %554, %553 : vector<32x128xf32>
    %556 = math.tanh %555 : vector<32x128xf32>
    %cst_223 = arith.constant 1.000000e+00 : f32
    %557 = vector.broadcast %cst_223 : f32 to vector<32x128xf32>
    %558 = arith.addf %557, %556 : vector<32x128xf32>
    %cst_224 = arith.constant 5.000000e-01 : f32
    %559 = vector.broadcast %cst_224 : f32 to vector<32x128xf32>
    %560 = arith.mulf %559, %558 : vector<32x128xf32>
    %561 = arith.mulf %548, %560 : vector<32x128xf32>
    %c0_225 = arith.constant 0 : index
    %c0_226 = arith.constant 0 : index
    %562 = vector.load %arg5[%c0_225, %c0_226] : memref<128x32xf32, #tpu.memory_space<vmem>>, vector<128x32xf32>
    %cst_227 = arith.constant dense<0.000000e+00> : vector<32x32xf32>
    %563 = tpu.matmul %561, %562, %cst_227 {dimension_numbers = #tpu.dot_dimension_numbers<[1], [0], [0], [1], [0, 0, 1, 1], [], []>} : vector<32x128xf32>, vector<128x32xf32>, vector<32x32xf32> -> vector<32x32xf32>
    %c0_228 = arith.constant 0 : index
    %c0_229 = arith.constant 0 : index
    %564 = vector.load %arg4[%c0_228, %c0_229] : memref<1x32xf32, #tpu.memory_space<vmem>>, vector<1x32xf32>
    %565 = vector.broadcast %564 : vector<1x32xf32> to vector<32x32xf32>
    %566 = arith.addf %563, %565 : vector<32x32xf32>
    %567 = arith.addf %517, %566 : vector<32x32xf32>
    %cst_230 = arith.constant dense<0.000000e+00> : vector<32xf32>
    %568 = vector.multi_reduction <add>, %567, %cst_230 [1] : vector<32x32xf32> to vector<32xf32>
    %569 = vector.shape_cast %568 : vector<32xf32> to vector<32x1xf32>
    %cst_231 = arith.constant 3.200000e+01 : f32
    %570 = vector.broadcast %cst_231 : f32 to vector<32x1xf32>
    %571 = arith.divf %569, %570 : vector<32x1xf32>
    %572 = vector.broadcast %571 : vector<32x1xf32> to vector<32x32xf32>
    %573 = arith.subf %567, %572 : vector<32x32xf32>
    %574 = vector.broadcast %571 : vector<32x1xf32> to vector<32x32xf32>
    %575 = arith.subf %567, %574 : vector<32x32xf32>
    %576 = arith.mulf %573, %575 : vector<32x32xf32>
    %cst_232 = arith.constant dense<0.000000e+00> : vector<32xf32>
    %577 = vector.multi_reduction <add>, %576, %cst_232 [1] : vector<32x32xf32> to vector<32xf32>
    %578 = vector.shape_cast %577 : vector<32xf32> to vector<32x1xf32>
    %cst_233 = arith.constant 3.200000e+01 : f32
    %579 = vector.broadcast %cst_233 : f32 to vector<32x1xf32>
    %580 = arith.divf %578, %579 : vector<32x1xf32>
    %581 = vector.broadcast %571 : vector<32x1xf32> to vector<32x32xf32>
    %582 = arith.subf %567, %581 : vector<32x32xf32>
    %cst_234 = arith.constant 9.99999997E-7 : f32
    %583 = vector.broadcast %cst_234 : f32 to vector<32x1xf32>
    %584 = arith.addf %580, %583 : vector<32x1xf32>
    %585 = math.rsqrt %584 : vector<32x1xf32>
    %586 = vector.broadcast %585 : vector<32x1xf32> to vector<32x32xf32>
    %587 = arith.mulf %582, %586 : vector<32x32xf32>
    %c0_235 = arith.constant 0 : index
    %c0_236 = arith.constant 0 : index
    %588 = vector.load %arg17[%c0_235, %c0_236] : memref<1x32xf32, #tpu.memory_space<vmem>>, vector<1x32xf32>
    %589 = vector.broadcast %588 : vector<1x32xf32> to vector<32x32xf32>
    %590 = arith.mulf %587, %589 : vector<32x32xf32>
    %c0_237 = arith.constant 0 : index
    %c0_238 = arith.constant 0 : index
    %591 = vector.load %arg16[%c0_237, %c0_238] : memref<1x32xf32, #tpu.memory_space<vmem>>, vector<1x32xf32>
    %592 = vector.broadcast %591 : vector<1x32xf32> to vector<32x32xf32>
    %593 = arith.addf %590, %592 : vector<32x32xf32>
    %c0_239 = arith.constant 0 : index
    %c0_240 = arith.constant 0 : index
    %594 = vector.load %arg46[%c0_239, %c0_240] : memref<32x16xf32, #tpu.memory_space<vmem>>, vector<32x16xf32>
    %cst_241 = arith.constant dense<0.000000e+00> : vector<32x16xf32>
    %595 = tpu.matmul %593, %594, %cst_241 {dimension_numbers = #tpu.dot_dimension_numbers<[1], [0], [0], [1], [0, 0, 1, 1], [], []>} : vector<32x32xf32>, vector<32x16xf32>, vector<32x16xf32> -> vector<32x16xf32>
    %c0_242 = arith.constant 0 : index
    %c0_243 = arith.constant 0 : index
    %596 = vector.load %arg45[%c0_242, %c0_243] : memref<1x16xf32, #tpu.memory_space<vmem>>, vector<1x16xf32>
    %597 = vector.broadcast %596 : vector<1x16xf32> to vector<32x16xf32>
    %598 = arith.addf %595, %597 : vector<32x16xf32>
    %c0_244 = arith.constant 0 : index
    %c0_245 = arith.constant 0 : index
    %599 = vector.load %arg54[%c0_244, %c0_245] : memref<32x16xf32, #tpu.memory_space<vmem>>, vector<32x16xf32>
    tpu.vector_store %arg54[%c0_244, %c0_245], %598 {strides = array<i32>} : memref<32x16xf32, #tpu.memory_space<vmem>>, vector<32x16xf32>,
    return
  }
  func.func @transform_0(%arg0: i32) -> (i32, i32) {
    %c0_i32 = arith.constant 0 : i32
    %c0_i32_0 = arith.constant 0 : i32
    %c0_i32_1 = arith.constant 0 : i32
    return %c0_i32, %c0_i32_0 : i32, i32
  }
  func.func @transform_1(%arg0: i32) -> (i32, i32) {
    %c0_i32 = arith.constant 0 : i32
    %c0_i32_0 = arith.constant 0 : i32
    %c0_i32_1 = arith.constant 0 : i32
    return %c0_i32, %c0_i32_0 : i32, i32
  }
  func.func @transform_2(%arg0: i32) -> (i32, i32) {
    %c0_i32 = arith.constant 0 : i32
    %c0_i32_0 = arith.constant 0 : i32
    %c0_i32_1 = arith.constant 0 : i32
    return %c0_i32, %c0_i32_0 : i32, i32
  }
  func.func @transform_3(%arg0: i32) -> (i32, i32) {
    %c0_i32 = arith.constant 0 : i32
    %c0_i32_0 = arith.constant 0 : i32
    %c0_i32_1 = arith.constant 0 : i32
    return %c0_i32, %c0_i32_0 : i32, i32
  }
  func.func @transform_4(%arg0: i32) -> (i32, i32) {
    %c0_i32 = arith.constant 0 : i32
    %c0_i32_0 = arith.constant 0 : i32
    %c0_i32_1 = arith.constant 0 : i32
    return %c0_i32, %c0_i32_0 : i32, i32
  }
  func.func @transform_5(%arg0: i32) -> (i32, i32) {
    %c0_i32 = arith.constant 0 : i32
    %c0_i32_0 = arith.constant 0 : i32
    %c0_i32_1 = arith.constant 0 : i32
    return %c0_i32, %c0_i32_0 : i32, i32
  }
  func.func @transform_6(%arg0: i32) -> (i32, i32) {
    %c0_i32 = arith.constant 0 : i32
    %c0_i32_0 = arith.constant 0 : i32
    %c0_i32_1 = arith.constant 0 : i32
    return %c0_i32, %c0_i32_0 : i32, i32
  }
  func.func @transform_7(%arg0: i32) -> (i32, i32) {
    %c0_i32 = arith.constant 0 : i32
    %c0_i32_0 = arith.constant 0 : i32
    %c0_i32_1 = arith.constant 0 : i32
    return %c0_i32, %c0_i32_0 : i32, i32
  }
  func.func @transform_8(%arg0: i32) -> (i32, i32) {
    %c0_i32 = arith.constant 0 : i32
    %c0_i32_0 = arith.constant 0 : i32
    %c0_i32_1 = arith.constant 0 : i32
    return %c0_i32, %c0_i32_0 : i32, i32
  }
  func.func @transform_9(%arg0: i32) -> (i32, i32) {
    %c0_i32 = arith.constant 0 : i32
    %c0_i32_0 = arith.constant 0 : i32
    %c0_i32_1 = arith.constant 0 : i32
    return %c0_i32, %c0_i32_0 : i32, i32
  }
  func.func @transform_10(%arg0: i32) -> (i32, i32) {
    %c0_i32 = arith.constant 0 : i32
    %c0_i32_0 = arith.constant 0 : i32
    %c0_i32_1 = arith.constant 0 : i32
    return %c0_i32, %c0_i32_0 : i32, i32
  }
  func.func @transform_11(%arg0: i32) -> (i32, i32) {
    %c0_i32 = arith.constant 0 : i32
    %c0_i32_0 = arith.constant 0 : i32
    %c0_i32_1 = arith.constant 0 : i32
    return %c0_i32, %c0_i32_0 : i32, i32
  }
  func.func @transform_12(%arg0: i32) -> (i32, i32) {
    %c0_i32 = arith.constant 0 : i32
    %c0_i32_0 = arith.constant 0 : i32
    %c0_i32_1 = arith.constant 0 : i32
    return %c0_i32, %c0_i32_0 : i32, i32
  }
  func.func @transform_13(%arg0: i32) -> (i32, i32) {
    %c0_i32 = arith.constant 0 : i32
    %c0_i32_0 = arith.constant 0 : i32
    %c0_i32_1 = arith.constant 0 : i32
    return %c0_i32, %c0_i32_0 : i32, i32
  }
  func.func @transform_14(%arg0: i32) -> (i32, i32) {
    %c0_i32 = arith.constant 0 : i32
    %c0_i32_0 = arith.constant 0 : i32
    %c0_i32_1 = arith.constant 0 : i32
    return %c0_i32, %c0_i32_0 : i32, i32
  }
  func.func @transform_15(%arg0: i32) -> (i32, i32) {
    %c0_i32 = arith.constant 0 : i32
    %c0_i32_0 = arith.constant 0 : i32
    %c0_i32_1 = arith.constant 0 : i32
    return %c0_i32, %c0_i32_0 : i32, i32
  }
  func.func @transform_16(%arg0: i32) -> (i32, i32) {
    %c0_i32 = arith.constant 0 : i32
    %c0_i32_0 = arith.constant 0 : i32
    %c0_i32_1 = arith.constant 0 : i32
    return %c0_i32, %c0_i32_0 : i32, i32
  }
  func.func @transform_17(%arg0: i32) -> (i32, i32) {
    %c0_i32 = arith.constant 0 : i32
    %c0_i32_0 = arith.constant 0 : i32
    %c0_i32_1 = arith.constant 0 : i32
    return %c0_i32, %c0_i32_0 : i32, i32
  }
  func.func @transform_18(%arg0: i32) -> (i32, i32) {
    %c0_i32 = arith.constant 0 : i32
    %c0_i32_0 = arith.constant 0 : i32
    %c0_i32_1 = arith.constant 0 : i32
    return %c0_i32, %c0_i32_0 : i32, i32
  }
  func.func @transform_19(%arg0: i32) -> (i32, i32) {
    %c0_i32 = arith.constant 0 : i32
    %c0_i32_0 = arith.constant 0 : i32
    %c0_i32_1 = arith.constant 0 : i32
    return %c0_i32, %c0_i32_0 : i32, i32
  }
  func.func @transform_20(%arg0: i32) -> (i32, i32) {
    %c0_i32 = arith.constant 0 : i32
    %c0_i32_0 = arith.constant 0 : i32
    %c0_i32_1 = arith.constant 0 : i32
    return %c0_i32, %c0_i32_0 : i32, i32
  }
  func.func @transform_21(%arg0: i32) -> (i32, i32) {
    %c0_i32 = arith.constant 0 : i32
    %c0_i32_0 = arith.constant 0 : i32
    %c0_i32_1 = arith.constant 0 : i32
    return %c0_i32, %c0_i32_0 : i32, i32
  }
  func.func @transform_22(%arg0: i32) -> (i32, i32) {
    %c0_i32 = arith.constant 0 : i32
    %c0_i32_0 = arith.constant 0 : i32
    %c0_i32_1 = arith.constant 0 : i32
    return %c0_i32, %c0_i32_0 : i32, i32
  }
  func.func @transform_23(%arg0: i32) -> (i32, i32) {
    %c0_i32 = arith.constant 0 : i32
    %c0_i32_0 = arith.constant 0 : i32
    %c0_i32_1 = arith.constant 0 : i32
    return %c0_i32, %c0_i32_0 : i32, i32
  }
  func.func @transform_24(%arg0: i32) -> (i32, i32) {
    %c0_i32 = arith.constant 0 : i32
    %c0_i32_0 = arith.constant 0 : i32
    %c0_i32_1 = arith.constant 0 : i32
    return %c0_i32, %c0_i32_0 : i32, i32
  }
  func.func @transform_25(%arg0: i32) -> (i32, i32) {
    %c0_i32 = arith.constant 0 : i32
    %c0_i32_0 = arith.constant 0 : i32
    %c0_i32_1 = arith.constant 0 : i32
    return %c0_i32, %c0_i32_0 : i32, i32
  }
  func.func @transform_26(%arg0: i32) -> (i32, i32) {
    %c0_i32 = arith.constant 0 : i32
    %c0_i32_0 = arith.constant 0 : i32
    %c0_i32_1 = arith.constant 0 : i32
    return %c0_i32, %c0_i32_0 : i32, i32
  }
  func.func @transform_27(%arg0: i32) -> (i32, i32) {
    %c0_i32 = arith.constant 0 : i32
    %c0_i32_0 = arith.constant 0 : i32
    %c0_i32_1 = arith.constant 0 : i32
    return %c0_i32, %c0_i32_0 : i32, i32
  }
  func.func @transform_28(%arg0: i32) -> (i32, i32) {
    %c0_i32 = arith.constant 0 : i32
    %c0_i32_0 = arith.constant 0 : i32
    %c0_i32_1 = arith.constant 0 : i32
    return %c0_i32, %c0_i32_0 : i32, i32
  }
  func.func @transform_29(%arg0: i32) -> (i32, i32) {
    %c0_i32 = arith.constant 0 : i32
    %c0_i32_0 = arith.constant 0 : i32
    %c0_i32_1 = arith.constant 0 : i32
    return %c0_i32, %c0_i32_0 : i32, i32
  }
  func.func @transform_30(%arg0: i32) -> (i32, i32) {
    %c0_i32 = arith.constant 0 : i32
    %c0_i32_0 = arith.constant 0 : i32
    %c0_i32_1 = arith.constant 0 : i32
    return %c0_i32, %c0_i32_0 : i32, i32
  }
  func.func @transform_31(%arg0: i32) -> (i32, i32) {
    %c0_i32 = arith.constant 0 : i32
    %c0_i32_0 = arith.constant 0 : i32
    %c0_i32_1 = arith.constant 0 : i32
    return %c0_i32, %c0_i32_0 : i32, i32
  }
  func.func @transform_32(%arg0: i32) -> (i32, i32) {
    %c0_i32 = arith.constant 0 : i32
    %c0_i32_0 = arith.constant 0 : i32
    %c0_i32_1 = arith.constant 0 : i32
    return %c0_i32, %c0_i32_0 : i32, i32
  }
  func.func @transform_33(%arg0: i32) -> (i32, i32) {
    %c0_i32 = arith.constant 0 : i32
    %c0_i32_0 = arith.constant 0 : i32
    %c0_i32_1 = arith.constant 0 : i32
    return %c0_i32, %c0_i32_0 : i32, i32
  }
  func.func @transform_34(%arg0: i32) -> (i32, i32) {
    %c0_i32 = arith.constant 0 : i32
    %c0_i32_0 = arith.constant 0 : i32
    %c0_i32_1 = arith.constant 0 : i32
    return %c0_i32, %c0_i32_0 : i32, i32
  }
  func.func @transform_35(%arg0: i32) -> (i32, i32) {
    %c0_i32 = arith.constant 0 : i32
    %c0_i32_0 = arith.constant 0 : i32
    %c0_i32_1 = arith.constant 0 : i32
    return %c0_i32, %c0_i32_0 : i32, i32
  }
  func.func @transform_36(%arg0: i32) -> (i32, i32) {
    %c0_i32 = arith.constant 0 : i32
    %c0_i32_0 = arith.constant 0 : i32
    %c0_i32_1 = arith.constant 0 : i32
    return %c0_i32, %c0_i32_0 : i32, i32
  }
  func.func @transform_37(%arg0: i32) -> (i32, i32) {
    %c0_i32 = arith.constant 0 : i32
    %c0_i32_0 = arith.constant 0 : i32
    %c0_i32_1 = arith.constant 0 : i32
    return %c0_i32, %c0_i32_0 : i32, i32
  }
  func.func @transform_38(%arg0: i32) -> (i32, i32) {
    %c0_i32 = arith.constant 0 : i32
    %c0_i32_0 = arith.constant 0 : i32
    %c0_i32_1 = arith.constant 0 : i32
    return %c0_i32, %c0_i32_0 : i32, i32
  }
  func.func @transform_39(%arg0: i32) -> (i32, i32) {
    %c0_i32 = arith.constant 0 : i32
    %c0_i32_0 = arith.constant 0 : i32
    %c0_i32_1 = arith.constant 0 : i32
    return %c0_i32, %c0_i32_0 : i32, i32
  }
  func.func @transform_40(%arg0: i32) -> (i32, i32) {
    %c0_i32 = arith.constant 0 : i32
    %c0_i32_0 = arith.constant 0 : i32
    %c0_i32_1 = arith.constant 0 : i32
    return %c0_i32, %c0_i32_0 : i32, i32
  }
  func.func @transform_41(%arg0: i32) -> (i32, i32) {
    %c0_i32 = arith.constant 0 : i32
    %c0_i32_0 = arith.constant 0 : i32
    %c0_i32_1 = arith.constant 0 : i32
    return %c0_i32, %c0_i32_0 : i32, i32
  }
  func.func @transform_42(%arg0: i32) -> (i32, i32) {
    %c0_i32 = arith.constant 0 : i32
    %c0_i32_0 = arith.constant 0 : i32
    %c0_i32_1 = arith.constant 0 : i32
    return %c0_i32, %c0_i32_0 : i32, i32
  }
  func.func @transform_43(%arg0: i32) -> (i32, i32) {
    %c0_i32 = arith.constant 0 : i32
    %c0_i32_0 = arith.constant 0 : i32
    %c0_i32_1 = arith.constant 0 : i32
    return %c0_i32, %c0_i32_0 : i32, i32
  }
  func.func @transform_44(%arg0: i32) -> (i32, i32) {
    %c0_i32 = arith.constant 0 : i32
    %c0_i32_0 = arith.constant 0 : i32
    %c0_i32_1 = arith.constant 0 : i32
    return %c0_i32, %c0_i32_0 : i32, i32
  }
  func.func @transform_45(%arg0: i32) -> (i32, i32) {
    %c0_i32 = arith.constant 0 : i32
    %c0_i32_0 = arith.constant 0 : i32
    %c0_i32_1 = arith.constant 0 : i32
    return %c0_i32, %c0_i32_0 : i32, i32
  }
  func.func @transform_46(%arg0: i32) -> (i32, i32) {
    %c0_i32 = arith.constant 0 : i32
    %c0_i32_0 = arith.constant 0 : i32
    %c0_i32_1 = arith.constant 0 : i32
    return %c0_i32, %c0_i32_0 : i32, i32
  }
  func.func @transform_47(%arg0: i32) -> (i32, i32) {
    %c0_i32 = arith.constant 0 : i32
    %c0_i32_0 = arith.constant 0 : i32
    %c0_i32_1 = arith.constant 0 : i32
    return %c0_i32, %c0_i32_0 : i32, i32
  }
  func.func @transform_48(%arg0: i32) -> (i32, i32) {
    %c0_i32 = arith.constant 0 : i32
    %c0_i32_0 = arith.constant 0 : i32
    %c0_i32_1 = arith.constant 0 : i32
    return %c0_i32, %c0_i32_0 : i32, i32
  }
  func.func @transform_49(%arg0: i32) -> (i32, i32) {
    %c0_i32 = arith.constant 0 : i32
    %c0_i32_0 = arith.constant 0 : i32
    %c0_i32_1 = arith.constant 0 : i32
    return %c0_i32, %c0_i32_0 : i32, i32
  }
  func.func @transform_50(%arg0: i32) -> (i32, i32) {
    %c0_i32 = arith.constant 0 : i32
    %c0_i32_0 = arith.constant 0 : i32
    %c0_i32_1 = arith.constant 0 : i32
    return %c0_i32, %c0_i32_0 : i32, i32
  }
  func.func @transform_51(%arg0: i32) -> (i32, i32) {
    %c0_i32 = arith.constant 0 : i32
    %c0_i32_0 = arith.constant 0 : i32
    %c0_i32_1 = arith.constant 0 : i32
    return %c0_i32, %c0_i32_0 : i32, i32
  }
  func.func @transform_52(%arg0: i32) -> (i32, i32) {
    %c0_i32 = arith.constant 0 : i32
    %c0_i32_0 = arith.constant 0 : i32
    %c0_i32_1 = arith.constant 0 : i32
    return %c0_i32, %c0_i32_0 : i32, i32
  }
  func.func @transform_53(%arg0: i32) -> (i32, i32) {
    %c0_i32 = arith.constant 0 : i32
    %c0_i32_0 = arith.constant 0 : i32
    %c0_i32_1 = arith.constant 0 : i32
    return %c0_i32, %c0_i32_0 : i32, i32
  }
}

</mosaic_0001>

<bundles_post_ra>
// kernel: eq.22
= control target key start
LH: loop header
LB: loop body
LE: loop exit
PB: predicated region body
PF: predicated region fallthrough
CT: control target
= control target key end

     0   :  { %vm8_vm0 = vcmask 130048   ;;  %vm14_vm1 = vcmask 261248   ;;  %s42_s0 = inlined_call_operand.vmem [shape: s32[2,16], index: 0, kind: input, shape index: {}]   ;;  %s43_s1 = inlined_call_operand.vmem [shape: s32[32], index: 1, kind: output, shape index: {}]  }
   0x1   :  { %v5_v0 = vld [vmem:[%s42_s0] sm:$0x3]  ;;  %s25_s0 = smov 16  }
   0x2   :  { %6 = vst [vmem:[#allocation1] sm:$0x3] %v5_v0 }
   0x9   :  { %v11_v1 = vld [vmem:[#allocation1 + $0x1] sm:$0x1]   ;;  %v7_v2 = vld [vmem:[#allocation1] sm:$0x1]  }
   0xa   :  { %12 = vrot.lane.b32.xlu0 %v11_v1, %s25_s0  ;;  %9 = vst.msk [vmem:[#allocation0] sm:$0x1] %vm8_vm0, %v7_v2  }
  0x7c   :  { %v13_v3 = vpop.permute.xlu0 %12  }
  0x7d   :  { %15 = vst.msk [vmem:[#allocation0] sm:$0x1] %vm14_vm1, %v13_v3  }
  0x84   :  { %v20_v4 = vld [vmem:[#allocation0] sm:$0x1] }
  0x85   :  { %23 = vst [vmem:[%s43_s1] sm:$0x1] %v20_v4 }

// kernel: eq.15
= control target key start
LH: loop header
LB: loop body
LE: loop exit
PB: predicated region body
PF: predicated region fallthrough
CT: control target
= control target key end

     0   :  { %vm8_vm0 = vcmask 64512   ;;  %vm14_vm1 = vcmask 130112   ;;  %s42_s0 = inlined_call_operand.vmem [shape: s32[2,8], index: 0, kind: input, shape index: {}]   ;;  %s43_s1 = inlined_call_operand.vmem [shape: s32[16], index: 1, kind: output, shape index: {}]  }
   0x1   :  { %v5_v0 = vld [vmem:[%s42_s0] sm:$0x3]  ;;  %s25_s0 = smov 8  }
   0x2   :  { %6 = vst [vmem:[#allocation1] sm:$0x3] %v5_v0 }
   0x9   :  { %v11_v1 = vld [vmem:[#allocation1 + $0x1] sm:$0x1]   ;;  %v7_v2 = vld [vmem:[#allocation1] sm:$0x1]  }
   0xa   :  { %12 = vrot.lane.b32.xlu0 %v11_v1, %s25_s0  ;;  %9 = vst.msk [vmem:[#allocation0] sm:$0x1] %vm8_vm0, %v7_v2  }
  0x7c   :  { %v13_v3 = vpop.permute.xlu0 %12  }
  0x7d   :  { %15 = vst.msk [vmem:[#allocation0] sm:$0x1] %vm14_vm1, %v13_v3  }
  0x84   :  { %v20_v4 = vld [vmem:[#allocation0] sm:$0x1] }
  0x85   :  { %23 = vst [vmem:[%s43_s1] sm:$0x1] %v20_v4 }

// kernel: multimodal_mae_forward.1
= control target key start
LH: loop header
LB: loop body
LE: loop exit
PB: predicated region body
PF: predicated region fallthrough
CT: control target
= control target key end

     0   :  { %s7637_s6 = smov 1   ;;  %s7638_s10 = smov 2   ;;  %s8958_s0 = inlined_call_operand.smem [shape: u32[54], index: -1, kind: input, shape index: {}] }
   0x1   :  { %s7720_s5 = sld [smem:[%s8958_s0]]   ;;  %s7639_s14 = smov 3  }
   0x2   :  { %s7725_s9 = sld [smem:[%s8958_s0 + %s7637_s6]]   ;;  %s7640_s18 = smov 4  }
   0x3   :  { %s7730_s13 = sld [smem:[%s8958_s0 + %s7638_s10]]   ;;  %s7641_s22 = smov 5  }
   0x4   :  { %s7735_s17 = sld [smem:[%s8958_s0 + %s7639_s14]]   ;;  %s7642_s26 = smov 6  }
   0x5   :  { %s7740_s21 = sld [smem:[%s8958_s0 + %s7640_s18]]   ;;  %s7643_s30 = smov 7  }
   0x6   :  { %s7745_s25 = sld [smem:[%s8958_s0 + %s7641_s22]]   ;;  %s7644_s4 = smov 8  }
   0x7   :  { %8974 = sst [smem:[#allocation31_spill]] %s7720_s5  ;;  %s7645_s10 = smov 9  }
   0x8   :  { %8975 = sst [smem:[#allocation32_spill]] %s7725_s9  ;;  %s7646_s15 = smov 10  }
   0x9   :  { %8976 = sst [smem:[#allocation33_spill]] %s7730_s13  ;;  %s7647_s20 = smov 11  }
   0xa   :  { %8977 = sst [smem:[#allocation34_spill]] %s7735_s17  ;;  %s7649_s1 = smov 13  }
   0xb   :  { %8978 = sst [smem:[#allocation35_spill]] %s7740_s21  ;;  %s7650_s7 = smov 14  }
   0xc   :  { %8979 = sst [smem:[#allocation36_spill]] %s7745_s25  ;;  %s7652_s22 = smov 16  }
   0xd   :  { %s7750_s29 = sld [smem:[%s8958_s0 + %s7642_s26]]   ;;  %s7648_s26 = smov 12  }
   0xe   :  { %s7755_s3 = sld [smem:[%s8958_s0 + %s7643_s30]]   ;;  %s7653_s28 = smov 17  }
   0xf   :  { %s7760_s8 = sld [smem:[%s8958_s0 + %s7644_s4]]  }
  0x10   :  { %s7765_s14 = sld [smem:[%s8958_s0 + %s7645_s10]]  }
  0x11   :  { %s7770_s19 = sld [smem:[%s8958_s0 + %s7646_s15]]   ;;  %s7651_s15 = smov 15  }
  0x12   :  { %s7775_s24 = sld [smem:[%s8958_s0 + %s7647_s20]]  }
  0x13   :  { %8980 = sst [smem:[#allocation37_spill]] %s7750_s29 }
  0x14   :  { %8981 = sst [smem:[#allocation38_spill]] %s7755_s3 }
  0x15   :  { %8982 = sst [smem:[#allocation39_spill]] %s7760_s8 }
  0x16   :  { %8983 = sst [smem:[#allocation40_spill]] %s7765_s14 }
  0x17   :  { %8984 = sst [smem:[#allocation41_spill]] %s7770_s19 }
  0x18   :  { %8985 = sst [smem:[#allocation42_spill]] %s7775_s24 }
  0x19   :  { %s7780_s30 = sld [smem:[%s8958_s0 + %s7648_s26]]  }
  0x1a   :  { %s7785_s6 = sld [smem:[%s8958_s0 + %s7649_s1]]  }
  0x1b   :  { %s7790_s12 = sld [smem:[%s8958_s0 + %s7650_s7]]   ;;  %s7654_s7 = smov 18  }
  0x1c   :  { %s7795_s20 = sld [smem:[%s8958_s0 + %s7651_s15]]   ;;  %s7655_s15 = smov 19  }
  0x1d   :  { %s7800_s27 = sld [smem:[%s8958_s0 + %s7652_s22]]   ;;  %s7656_s22 = smov 20  }
  0x1e   :  { %s7805_s4 = sld [smem:[%s8958_s0 + %s7653_s28]]   ;;  %s7657_s28 = smov 21  }
  0x1f   :  { %8986 = sst [smem:[#allocation43_spill]] %s7780_s30 }
  0x20   :  { %8987 = sst [smem:[#allocation44_spill]] %s7785_s6 }
  0x21   :  { %8988 = sst [smem:[#allocation45_spill]] %s7790_s12 }
  0x22   :  { %8989 = sst [smem:[#allocation46_spill]] %s7795_s20 }
  0x23   :  { %8990 = sst [smem:[#allocation47_spill]] %s7800_s27 }
  0x24   :  { %8991 = sst [smem:[#allocation48_spill]] %s7805_s4 }
  0x25   :  { %s7810_s17 = sld [smem:[%s8958_s0 + %s7654_s7]]   ;;  %s7658_s7 = smov 22  }
  0x26   :  { %s7815_s20 = sld [smem:[%s8958_s0 + %s7655_s15]]   ;;  %s7659_s15 = smov 23  }
  0x27   :  { %s7820_s27 = sld [smem:[%s8958_s0 + %s7656_s22]]   ;;  %s7660_s22 = smov 24  }
  0x28   :  { %s7825_s9 = sld [smem:[%s8958_s0 + %s7657_s28]]   ;;  %s7661_s28 = smov 25  }
  0x29   :  { %s7830_s21 = sld [smem:[%s8958_s0 + %s7658_s7]]   ;;  %s7662_s7 = smov 26  }
  0x2a   :  { %s7835_s3 = sld [smem:[%s8958_s0 + %s7659_s15]]   ;;  %s7663_s15 = smov 27  }
  0x2b   :  { %8992 = sst [smem:[#allocation49_spill]] %s7810_s17 }
  0x2c   :  { %8993 = sst [smem:[#allocation50_spill]] %s7815_s20 }
  0x2d   :  { %8994 = sst [smem:[#allocation51_spill]] %s7820_s27 }
  0x2e   :  { %8995 = sst [smem:[#allocation52_spill]] %s7825_s9 }
  0x2f   :  { %8996 = sst [smem:[#allocation53_spill]] %s7830_s21 }
  0x30   :  { %8997 = sst [smem:[#allocation54_spill]] %s7835_s3 }
  0x31   :  { %s7840_s8 = sld [smem:[%s8958_s0 + %s7660_s22]]   ;;  %s7664_s22 = smov 28  }
  0x32   :  { %s7845_s13 = sld [smem:[%s8958_s0 + %s7661_s28]]   ;;  %s7665_s28 = smov 29  }
  0x33   :  { %s7850_s14 = sld [smem:[%s8958_s0 + %s7662_s7]]   ;;  %s7666_s7 = smov 30  }
  0x34   :  { %s7855_s19 = sld [smem:[%s8958_s0 + %s7663_s15]]   ;;  %s7667_s15 = smov 31  }
  0x35   :  { %s7860_s24 = sld [smem:[%s8958_s0 + %s7664_s22]]   ;;  %s7668_s22 = smov 32  }
  0x36   :  { %s7865_s25 = sld [smem:[%s8958_s0 + %s7665_s28]]   ;;  %s7669_s28 = smov 33  }
  0x37   :  { %8998 = sst [smem:[#allocation55_spill]] %s7840_s8 }
  0x38   :  { %8999 = sst [smem:[#allocation56_spill]] %s7845_s13 }
  0x39   :  { %9000 = sst [smem:[#allocation57_spill]] %s7850_s14 }
  0x3a   :  { %9001 = sst [smem:[#allocation58_spill]] %s7855_s19 }
  0x3b   :  { %9002 = sst [smem:[#allocation59_spill]] %s7860_s24 }
  0x3c   :  { %9003 = sst [smem:[#allocation60_spill]] %s7865_s25 }
  0x3d   :  { %s7870_s29 = sld [smem:[%s8958_s0 + %s7666_s7]]   ;;  %s7670_s7 = smov 34  }
  0x3e   :  { %s7875_s30 = sld [smem:[%s8958_s0 + %s7667_s15]]   ;;  %s7671_s15 = smov 35  }
  0x3f   :  { %s7880_s4 = sld [smem:[%s8958_s0 + %s7668_s22]]   ;;  %s7672_s22 = smov 36  }
  0x40   :  { %s7885_s6 = sld [smem:[%s8958_s0 + %s7669_s28]]   ;;  %s7673_s28 = smov 37  }
  0x41   :  { %s7890_s12 = sld [smem:[%s8958_s0 + %s7670_s7]]   ;;  %s7674_s7 = smov 38  }
  0x42   :  { %s7910_s27 = sld [smem:[%s8958_s0 + %s7674_s7]]   ;;  %s7678_s7 = smov 42  }
  0x43   :  { %9004 = sst [smem:[#allocation61_spill]] %s7870_s29 }
  0x44   :  { %9005 = sst [smem:[#allocation62_spill]] %s7875_s30 }
  0x45   :  { %s7895_s29 = sld [smem:[%s8958_s0 + %s7671_s15]]   ;;  %s7675_s15 = smov 39  }
  0x46   :  { %9006 = sst [smem:[#allocation63_spill]] %s7885_s6 }
  0x47   :  { %s7900_s30 = sld [smem:[%s8958_s0 + %s7672_s22]]   ;;  %s7676_s22 = smov 40  }
  0x48   :  { %s7905_s6 = sld [smem:[%s8958_s0 + %s7673_s28]]   ;;  %s7677_s28 = smov 41  }
  0x49   :  { %s7915_s17 = sld [smem:[%s8958_s0 + %s7675_s15]]   ;;  %s7679_s15 = smov 43  }
  0x4a   :  { %s7920_s9 = sld [smem:[%s8958_s0 + %s7676_s22]]   ;;  %s7680_s22 = smov 44  }
  0x4b   :  { %s7925_s8 = sld [smem:[%s8958_s0 + %s7677_s28]]   ;;  %s7681_s28 = smov 45  }
  0x4c   :  { %s7930_s13 = sld [smem:[%s8958_s0 + %s7678_s7]]   ;;  %s7682_s7 = smov 46  }
  0x4d   :  { %s7940_s20 = sld [smem:[%s8958_s0 + %s7680_s22]]   ;;  %s7684_s22 = smov 48  }
  0x4e   :  { %s7950_s14 = sld [smem:[%s8958_s0 + %s7682_s7]]   ;;  %s7686_s7 = smov 50  }
  0x4f   :  { %9007 = sst [smem:[#allocation64_spill]] %s7915_s17 }
  0x50   :  { %s7935_s17 = sld [smem:[%s8958_s0 + %s7679_s15]]   ;;  %s7683_s15 = smov 47  }
  0x51   :  { %9008 = sst [smem:[#allocation65_spill]] %s7925_s8 }
  0x52   :  { %s7945_s8 = sld [smem:[%s8958_s0 + %s7681_s28]]   ;;  %s7685_s28 = smov 49  }
  0x53   :  { %s7955_s19 = sld [smem:[%s8958_s0 + %s7683_s15]]   ;;  %s7687_s15 = smov 51  }
  0x54   :  { %s7960_s24 = sld [smem:[%s8958_s0 + %s7684_s22]]   ;;  %s7688_s22 = smov 52  }
  0x55   :  { %s7970_s21 = sld [smem:[%s8958_s0 + %s7686_s7]]  }
  0x56   :  { %s7975_s3 = sld [smem:[%s8958_s0 + %s7687_s15]]  }
  0x57   :  { %s7980_s25 = sld [smem:[%s8958_s0 + %s7688_s22]]  }
  0x58   :  { %9009 = sst [smem:[#allocation66_spill]] %s7945_s8 }
  0x59   :  { %s7965_s8 = sld [smem:[%s8958_s0 + %s7685_s28]]   ;;  %s7689_s28 = smov 53  }
  0x5a   :  { %s7985_s5 = sld [smem:[%s8958_s0 + %s7689_s28]]  }
  0x5b   :  { %112 = vsyncpa [#allocation3], 0 }
  0x5c   :  { %113 = vsyncpa [#allocation6], 0 }
  0x5d   :  { %114 = vsyncpa [#allocation9], 0 }
  0x5e   :  { %115 = vsyncpa [#allocation12], 0 }
  0x5f   :  { %116 = vsyncpa [#allocation15], 0 }
  0x60   :  { %117 = vsyncpa [#allocation18], 0 }
  0x61   :  { %118 = vsyncpa [#allocation21], 0 }
  0x62   :  { %119 = vsyncpa [#allocation4], 0  ;;  %s7690_s7 = smov [#allocation5]   ;;  %s7691_s11 = smov [#allocation8]  }
  0x63   :  { %s202_s10 = sshll.u32 %s7690_s7, 4  ;;  %s222_s15 = sshll.u32 %s7691_s11, 4  ;;  %s203_s10 = int_to_ptr.vmem [resolvable:$true] %s202_s10  ;;  %s223_s15 = int_to_ptr.vmem [resolvable:$true] %s222_s15 }
  0x64   :  { %s7369_s16 = scalar_lea.vmem %s203_s10, 16  ;;  %s7373_s18 = scalar_lea.vmem %s203_s10, 32 }
  0x65   :  { %p7370_p0 = scmp.ne.s32.totalorder %s203_s10, %s7369_s16  ;;  %p7374_p1 = scmp.lt.s32.totalorder %s203_s10, %s203_s10 }
  0x66   :  { %p7375_p2 = scmp.lt.s32.totalorder %s7373_s18, %s7369_s16 }
  0x68   :  { %p7376_p3 = por %p7375_p2, %p7374_p1 }
  0x6a   :  { %p7377_p4 = pnand %p7376_p3, %p7370_p0 }
  0x6c   :  { %7380 = shalt.err (!%p7377_p4)
}
  0x6d   :  { %205 = dma.hbm_to_vmem [thread:$0]  %s7890_s12, 16, %s203_s10, [#allocation6]  }
  0x6e   :  { %s7389_s0 = scalar_lea.vmem %s223_s15, 16  ;;  %s7393_s22 = scalar_lea.vmem %s223_s15, 32 }
  0x6f   :  { %p7390_p5 = scmp.ne.s32.totalorder %s223_s15, %s7389_s0  ;;  %p7394_p6 = scmp.lt.s32.totalorder %s223_s15, %s223_s15 }
  0x70   :  { %p7395_p7 = scmp.lt.s32.totalorder %s7393_s22, %s7389_s0 }
  0x72   :  { %p7396_p8 = por %p7395_p7, %p7394_p6 }
  0x74   :  { %p7397_p9 = pnand %p7396_p8, %p7390_p5 }
  0x76   :  { %7400 = shalt.err (!%p7397_p9)
}
  0x77   :  { %225 = dma.hbm_to_vmem [thread:$0]  %s7900_s30, 16, %s223_s15, [#allocation9]  }
  0x78   :  { %s7692_s23 = smov [#allocation11]   ;;  %s7693_s28 = smov [#allocation14]  }
  0x79   :  { %s242_s26 = sshll.u32 %s7692_s23, 4  ;;  %s266_s1 = sshll.u32 %s7693_s28, 4  ;;  %s243_s26 = int_to_ptr.vmem [resolvable:$true] %s242_s26  ;;  %s267_s1 = int_to_ptr.vmem [resolvable:$true] %s266_s1 }
  0x7a   :  { %s7409_s2 = scalar_lea.vmem %s243_s26, 16  ;;  %s7413_s7 = scalar_lea.vmem %s243_s26, 32 }
  0x7b   :  { %p7410_p10 = scmp.ne.s32.totalorder %s243_s26, %s7409_s2  ;;  %p7414_p11 = scmp.lt.s32.totalorder %s243_s26, %s243_s26 }
  0x7c   :  { %p7415_p12 = scmp.lt.s32.totalorder %s7413_s7, %s7409_s2 }
  0x7e   :  { %p7416_p13 = por %p7415_p12, %p7414_p11 }
  0x80   :  { %p7417_p0 = pnand %p7416_p13, %p7410_p10 }
  0x82   :  { %7420 = shalt.err (!%p7417_p0)
}
  0x83   :  { %245 = dma.hbm_to_vmem [thread:$0]  %s7910_s27, 16, %s243_s26, [#allocation12]  }
  0x84   :  { %s7429_s12 = scalar_lea.vmem %s267_s1, 16  ;;  %s7433_s10 = scalar_lea.vmem %s267_s1, 32 }
  0x85   :  { %p7430_p1 = scmp.ne.s32.totalorder %s267_s1, %s7429_s12  ;;  %p7434_p2 = scmp.lt.s32.totalorder %s267_s1, %s267_s1 }
  0x86   :  { %p7435_p3 = scmp.lt.s32.totalorder %s7433_s10, %s7429_s12 }
  0x88   :  { %p7436_p4 = por %p7435_p3, %p7434_p2 }
  0x8a   :  { %p7437_p5 = pnand %p7436_p4, %p7430_p1 }
  0x8c   :  { %7440 = shalt.err (!%p7437_p5)
}
  0x8d   :  { %269 = dma.hbm_to_vmem [thread:$0]  %s7930_s13, 16, %s267_s1, [#allocation15]  }
  0x8e   :  { %s7694_s30 = smov [#allocation17]   ;;  %s7695_s15 = smov [#allocation2]  }
  0x8f   :  { %s286_s11 = sshll.u32 %s7694_s30, 4  ;;  %s190_s16 = sshll.u32 %s7695_s15, 4  ;;  %s287_s11 = int_to_ptr.vmem [resolvable:$true] %s286_s11  ;;  %s191_s16 = int_to_ptr.vmem [resolvable:$true] %s190_s16 }
  0x90   :  { %s7449_s18 = scalar_lea.vmem %s287_s11, 16  ;;  %s7453_s0 = scalar_lea.vmem %s287_s11, 32 }
  0x91   :  { %p7450_p6 = scmp.ne.s32.totalorder %s287_s11, %s7449_s18  ;;  %p7454_p7 = scmp.lt.s32.totalorder %s287_s11, %s287_s11 }
  0x92   :  { %p7455_p8 = scmp.lt.s32.totalorder %s7453_s0, %s7449_s18 }
  0x94   :  { %p7456_p9 = por %p7455_p8, %p7454_p7 }
  0x96   :  { %p7457_p10 = pnand %p7456_p9, %p7450_p6 }
  0x98   :  { %7460 = shalt.err (!%p7457_p10)
}
  0x99   :  { %289 = dma.hbm_to_vmem [thread:$0]  %s7940_s20, 16, %s287_s11, [#allocation18]  }
  0x9a   :  { %s7469_s27 = scalar_lea.vmem %s191_s16, 16  ;;  %s7473_s22 = scalar_lea.vmem %s191_s16, 32 }
  0x9b   :  { %p7470_p11 = scmp.ne.s32.totalorder %s191_s16, %s7469_s27  ;;  %p7474_p12 = scmp.lt.s32.totalorder %s191_s16, %s191_s16 }
  0x9c   :  { %p7475_p13 = scmp.lt.s32.totalorder %s7473_s22, %s7469_s27 }
  0x9e   :  { %p7476_p0 = por %p7475_p13, %p7474_p12 }
  0xa0   :  { %p7477_p1 = pnand %p7476_p0, %p7470_p11 }
  0xa2   :  { %7480 = shalt.err (!%p7477_p1)
}
  0xa3   :  { %193 = dma.hbm_to_vmem [thread:$0]  %s7880_s4, 16, %s191_s16, [#allocation3]  }
  0xa4   :  { %s7696_s13 = smov [#allocation7]   ;;  %s7697_s26 = smov [#allocation10]  }
  0xa5   :  { %s212_s23 = sshll.u32 %s7696_s13, 4  ;;  %s232_s28 = sshll.u32 %s7697_s26, 4  ;;  %s213_s23 = int_to_ptr.vmem [resolvable:$true] %s212_s23  ;;  %s233_s28 = int_to_ptr.vmem [resolvable:$true] %s232_s28 }
  0xa6   :  { %s7489_s1 = scalar_lea.vmem %s213_s23, 16  ;;  %s7493_s2 = scalar_lea.vmem %s213_s23, 32 }
  0xa7   :  { %p7490_p2 = scmp.ne.s32.totalorder %s213_s23, %s7489_s1  ;;  %p7494_p3 = scmp.lt.s32.totalorder %s213_s23, %s213_s23 }
  0xa8   :  { %p7495_p4 = scmp.lt.s32.totalorder %s7493_s2, %s7489_s1 }
  0xaa   :  { %p7496_p5 = por %p7495_p4, %p7494_p3 }
  0xac   :  { %p7497_p6 = pnand %p7496_p5, %p7490_p2 }
  0xae   :  { %7500 = shalt.err (!%p7497_p6)
}
  0xaf   :  { %215 = dma.hbm_to_vmem [thread:$0]  %s7895_s29, 16, %s213_s23, [#allocation6]  }
  0xb0   :  { %s7509_s20 = scalar_lea.vmem %s233_s28, 16  ;;  %s7513_s7 = scalar_lea.vmem %s233_s28, 32 }
  0xb1   :  { %p7510_p7 = scmp.ne.s32.totalorder %s233_s28, %s7509_s20  ;;  %p7514_p8 = scmp.lt.s32.totalorder %s233_s28, %s233_s28 }
  0xb2   :  { %p7515_p9 = scmp.lt.s32.totalorder %s7513_s7, %s7509_s20 }
  0xb4   :  { %p7516_p10 = por %p7515_p9, %p7514_p8 }
  0xb6   :  { %p7517_p11 = pnand %p7516_p10, %p7510_p7 }
  0xb8   :  { %7520 = shalt.err (!%p7517_p11)
}
  0xb9   :  { %235 = dma.hbm_to_vmem [thread:$0]  %s7905_s6, 16, %s233_s28, [#allocation9]  }
  0xba   :  { %s7698_s4 = smov [#allocation13]   ;;  %s7699_s10 = smov [#allocation16]  }
  0xbb   :  { %s254_s12 = sshll.u32 %s7698_s4, 4  ;;  %s276_s30 = sshll.u32 %s7699_s10, 4  ;;  %s255_s12 = int_to_ptr.vmem [resolvable:$true] %s254_s12  ;;  %s277_s30 = int_to_ptr.vmem [resolvable:$true] %s276_s30 }
  0xbc   :  { %s7529_s11 = scalar_lea.vmem %s255_s12, 16  ;;  %s7533_s15 = scalar_lea.vmem %s255_s12, 32 }
  0xbd   :  { %p7530_p12 = scmp.ne.s32.totalorder %s255_s12, %s7529_s11  ;;  %p7534_p13 = scmp.lt.s32.totalorder %s255_s12, %s255_s12 }
  0xbe   :  { %p7535_p0 = scmp.lt.s32.totalorder %s7533_s15, %s7529_s11 }
  0xc0   :  { %p7536_p1 = por %p7535_p0, %p7534_p13 }
  0xc2   :  { %p7537_p2 = pnand %p7536_p1, %p7530_p12 }
  0xc4   :  { %7540 = shalt.err (!%p7537_p2)
}
  0xc5   :  { %257 = dma.hbm_to_vmem [thread:$0]  %s7920_s9, 16, %s255_s12, [#allocation12]  }
  0xc6   :  { %s7549_s29 = scalar_lea.vmem %s277_s30, 16  ;;  %s7553_s16 = scalar_lea.vmem %s277_s30, 32 }
  0xc7   :  { %p7550_p3 = scmp.ne.s32.totalorder %s277_s30, %s7549_s29  ;;  %p7554_p4 = scmp.lt.s32.totalorder %s277_s30, %s277_s30 }
  0xc8   :  { %p7555_p5 = scmp.lt.s32.totalorder %s7553_s16, %s7549_s29 }
  0xca   :  { %p7556_p6 = por %p7555_p5, %p7554_p4 }
  0xcc   :  { %p7557_p7 = pnand %p7556_p6, %p7550_p3 }
  0xce   :  { %7560 = shalt.err (!%p7557_p7)
}
  0xcf   :  { %279 = dma.hbm_to_vmem [thread:$0]  %s7935_s17, 16, %s277_s30, [#allocation15]  }
  0xd0   :  { %s7700_s6 = smov [#allocation19]   ;;  %s7701_s0 = smov [#allocation20]  }
  0xd1   :  { %s298_s18 = sshll.u32 %s7700_s6, 4  ;;  %s308_s27 = sshll.u32 %s7701_s0, 4  ;;  %s299_s18 = int_to_ptr.vmem [resolvable:$true] %s298_s18  ;;  %s309_s27 = int_to_ptr.vmem [resolvable:$true] %s308_s27 }
  0xd2   :  { %s7569_s22 = scalar_lea.vmem %s299_s18, 16  ;;  %s7573_s13 = scalar_lea.vmem %s299_s18, 32 }
  0xd3   :  { %p7570_p8 = scmp.ne.s32.totalorder %s299_s18, %s7569_s22  ;;  %p7574_p9 = scmp.lt.s32.totalorder %s299_s18, %s299_s18 }
  0xd4   :  { %p7575_p10 = scmp.lt.s32.totalorder %s7573_s13, %s7569_s22 }
  0xd6   :  { %p7576_p11 = por %p7575_p10, %p7574_p9 }
  0xd8   :  { %p7577_p12 = pnand %p7576_p11, %p7570_p8 }
  0xda   :  { %7580 = shalt.err (!%p7577_p12)
}
  0xdb   :  { %301 = dma.hbm_to_vmem [thread:$0]  %s7950_s14, 16, %s299_s18, [#allocation18]  }
  0xdc   :  { %s7589_s9 = scalar_lea.vmem %s309_s27, 16  ;;  %s7593_s23 = scalar_lea.vmem %s309_s27, 32 }
  0xdd   :  { %p7590_p13 = scmp.ne.s32.totalorder %s309_s27, %s7589_s9  ;;  %p7594_p0 = scmp.lt.s32.totalorder %s309_s27, %s309_s27 }
  0xde   :  { %p7595_p1 = scmp.lt.s32.totalorder %s7593_s23, %s7589_s9 }
  0xe0   :  { %p7596_p2 = por %p7595_p1, %p7594_p0 }
  0xe2   :  { %p7597_p3 = pnand %p7596_p2, %p7590_p13 }
  0xe4   :  { %7600 = shalt.err (!%p7597_p3)
}
  0xe5   :  { %311 = dma.hbm_to_vmem [thread:$0]  %s7955_s19, 16, %s309_s27, [#allocation21]  }
  0xe6   :  { %7621 = dma.done.wait [#allocation3], 16  }
  0xe7   :  { %7622 = vsyncadd [#allocation3], 4294967280 }
  0xe8   :  { %7623 = dma.done.wait [#allocation6], 32  }
  0xe9   :  { %7624 = vsyncadd [#allocation6], 4294967264 }
  0xea   :  { %7625 = dma.done.wait [#allocation9], 32  }
  0xeb   :  { %7626 = vsyncadd [#allocation9], 4294967264 }
  0xec   :  { %7627 = dma.done.wait [#allocation12], 32  }
  0xed   :  { %7628 = vsyncadd [#allocation12], 4294967264 }
  0xee   :  { %7629 = dma.done.wait [#allocation15], 32  }
  0xef   :  { %7630 = vsyncadd [#allocation15], 4294967264 }
  0xf0   :  { %7631 = dma.done.wait [#allocation18], 32  }
  0xf1   :  { %7632 = vsyncadd [#allocation18], 4294967264 }
  0xf2   :  { %7633 = dma.done.wait [#allocation21], 16  }
  0xf3   :  { %7634 = vsyncadd [#allocation21], 4294967280  ;;  %vm371_vm0 = vcmask 130048   ;;  %v363_v0 = vld [vmem:[%s7960_s24 + $0x8] sm:$0xff]  ;;  %v362_v1 = vld [vmem:[%s7960_s24] sm:$0xff]  ;;  %v7702_v6 = vmov 0.0  }
  0xf4   :  { %v358_v2 = vld [vmem:[%s7970_s21] sm:$0xff]  ;;  %6585 = vmatprep.subr.mxu0 %v363_v0  ;;  %v359_v3 = vld [vmem:[%s7970_s21 + $0x8] sm:$0xff]  ;;  %v360_v4 = vld [vmem:[%s7970_s21 + $0x10] sm:$0xff]  ;;  %6595 = vmatprep.subr.mxu1 %v7702_v6  ;;  %vm7703_vm1 = vmmov 0   ;;  %vm479_vm2 = vcmask 1046528   ;;  %s9010_s17 = sld [smem:[#allocation31_spill]] }
  0xf5   :  { %6589 = vmatprep.mubr.msk.f32.mxu0 %vm371_vm0, %v358_v2  ;;  %6586 = vmatpush3.msra.mxu0 %v363_v0  ;;  %v361_v5 = vld [vmem:[%s7970_s21 + $0x18] sm:$0xff]  ;;  %v470_v7 = vld [vmem:[%s7965_s8 + $0x8] sm:$0xff]  ;;  %v471_v8 = vld [vmem:[%s7965_s8 + $0x10] sm:$0x1]  ;;  %vm565_vm3 = vcmask 1040384   ;;  %vm653_vm4 = vcmask 261120  }
  0xf6   :  { %6587 = vmatprep.subr.mxu0 %v362_v1  ;;  %6599 = vmatprep.mubr.msk.f32.mxu1 %vm7703_vm1, %v7702_v6  ;;  %v469_v9 = vld [vmem:[%s7965_s8] sm:$0xff]  ;;  %v481_v10 = vrot.slane %v470_v7, 1  ;;  %v483_v11 = vrot.slane %v471_v8, 1  ;;  %v6133_v12 = vld [vmem:[#allocation20] ss:$0 sm:$0xff]  ;;  %v475_v29 = vld [vmem:[%s7975_s3 + $0x8] sm:$0xff] }
  0xf7   :  { %6588 = vmatpush3.msra.mxu0 %v362_v1  ;;  %v480_v13 = vrot.slane %v469_v9, 1  ;;  %v474_v24 = vld [vmem:[%s7975_s3] sm:$0xff]  ;;  %vm660_vm5 = vcmask 254976   ;;  %s9011_s21 = sld [smem:[#allocation60_spill]]  ;;  %s7704_s19 = smov 96   ;;  %vm914_vm6 = vcmask 65536  }
  0xf8   :  { %6590 = vmatmul.mubr.msk.f32.vlgmr.msra.gmra.mxu0 %vm371_vm0, %v359_v3  ;;  %6609 = vmatprep.subr.mxu0 %v7702_v6  ;;  %v484_v15 = vsel %vm479_vm2, %v481_v10, %v483_v11  ;;  %s9012_s3 = sld [smem:[#allocation54_spill]]  ;;  %s7705_s24 = smov 80   ;;  %vm910_vm7 = vcmask 72704   ;;  %vm3947_vm8 = vcmask 1045504  }
  0xf9   :  { %6592 = vmatprep.mubr.msk.f32.mxu0 %vm371_vm0, %v360_v4  ;;  %v482_v18 = vsel %vm479_vm2, %v480_v13, %v481_v10  ;;  %s9013_s8 = sld [smem:[#allocation53_spill]]  ;;  %s7706_s26 = smov 112  }
  0xfa   :  { %v472_v30 = vld [vmem:[%s9010_s17] sm:$0x1]  ;;  %s9014_s14 = sld [smem:[#allocation59_spill]]  ;;  %s7707_s1 = smov 64  }
  0xfb   :  { %v473_v31 = vadd.f32 %v472_v30, %v469_v9  ;;  %s9015_s28 = sld [smem:[#allocation58_spill]]  ;;  %s7708_s2 = smov 48  }
  0xfc   :  { %6593 = vmatmul.mubr.msk.f32.gmra.mxu0 %vm371_vm0, %v361_v5  ;;  %s9016_s20 = sld [smem:[#allocation57_spill]] }
  0xfd   :  { %6617 = vmatprep.mubr.msk.f32.mxu0 %vm7703_vm1, %v7702_v6  ;;  %v718_v62 = vld [vmem:[%s9011_s21 + $0x18] sm:$0xff]  ;;  %v717_v63 = vld [vmem:[%s9011_s21 + $0x10] sm:$0xff]  ;;  %v716_v0 = vld [vmem:[%s9011_s21 + $0x8] sm:$0xff]  ;;  %s9017_s7 = sld [smem:[#allocation50_spill]] }
  0xfe   :  { %6610 = vmatpush3.msra.mxu0 %v718_v62  ;;  %v715_v1 = vld [vmem:[%s9011_s21] sm:$0xff]  ;;  %s9018_s4 = sld [smem:[#allocation56_spill]] }
  0xff   :  { %6611 = vmatprep.subr.mxu0 %v7702_v6  ;;  %v6140_v13 = vld [vmem:[%s9012_s3] ss:$0 sm:$0xff]  ;;  %s9019_s12 = sld [smem:[#allocation55_spill]] }
 0x100   :  { %6612 = vmatpush3.msra.mxu0 %v717_v63  ;;  %s9020_s10 = sld [smem:[#allocation52_spill]] }
 0x101   :  { %6613 = vmatprep.subr.mxu0 %v7702_v6  ;;  %s9021_s30 = sld [smem:[#allocation49_spill]] }
 0x102   :  { %6614 = vmatpush3.msra.mxu0 %v716_v0  ;;  %s9022_s11 = sld [smem:[#allocation51_spill]] }
 0x103   :  { %6615 = vmatprep.subr.mxu0 %v7702_v6  ;;  %s9023_s15 = sld [smem:[#allocation65_spill]] }
 0x104   :  { %6616 = vmatpush3.msra.mxu0 %v715_v1  ;;  %s9024_s29 = sld [smem:[#allocation64_spill]] }
 0x105   :  { %s9025_s16 = sld [smem:[#allocation62_spill]] }
 0x106   :  { %s9026_s6 = sld [smem:[#allocation63_spill]] }
 0x107   :  { %s9027_s18 = sld [smem:[#allocation61_spill]] }
 0x108   :  { %s9028_s0 = sld [smem:[#allocation45_spill]] }
 0x109   :  { %s9029_s27 = sld [smem:[#allocation44_spill]] }
 0x10a   :  { %s9030_s22 = sld [smem:[#allocation48_spill]] }
 0x10b   :  { %s9032_s13 = sld [smem:[#allocation37_spill]] }
 0x10c   :  { %s9033_s9 = sld [smem:[#allocation36_spill]] }
 0x10d   :  { %s9034_s23 = sld [smem:[#allocation42_spill]] }
 0x10e   :  { %s9035_s17 = sld [smem:[#allocation41_spill]] }
 0x10f   :  { %s9036_s21 = sld [smem:[#allocation40_spill]] }
 0x110   :  { %s9037_s3 = sld [smem:[#allocation33_spill]] }
 0x1b8   :  { %v6591_v14 = vpop.f32.mrf.mxu0 }
 0x1b9   :  { %v456_v16 = vadd.f32 %v6591_v14, %v6133_v12 }
 0x1ba   :  { %v450_v17 = vpop.f32.mrf.mxu0 }
 0x1bb   :  { %v451_v19 = vadd.f32 %v6133_v12, %v450_v17  ;;  %v488_v20 = vadd.f32 %v484_v15, %v456_v16 }
 0x1bc   :  { %v6594_v21 = vpop.f32.mrf.mxu0 }
 0x1bd   :  { %v487_v22 = vadd.f32 %v482_v18, %v451_v19  ;;  %v466_v23 = vadd.f32 %v6594_v21, %v6133_v12  ;;  %6596 = vmatpush3.msra.mxu1 %v488_v20 }
 0x1be   :  { %v460_v25 = vpop.f32.mrf.mxu0  ;;  %6597 = vmatprep.subr.mxu1 %v7702_v6 }
 0x1bf   :  { %v568_v26 = vadd.f32 %v484_v15, %v466_v23  ;;  %v461_v27 = vadd.f32 %v6133_v12, %v460_v25  ;;  %6598 = vmatpush3.msra.mxu1 %v487_v22  ;;  %v6141_v15 = vld [vmem:[%s9013_s8] ss:$0 sm:$0xff]  ;;  %s9038_s8 = sld [smem:[#allocation39_spill]] }
 0x1c0   :  { %6600 = vmatmul.mubr.msk.f32.vlgmr.msra.gmra.mxu1 %vm371_vm0, %v474_v24  ;;  %6602 = vmatprep.subr.mxu1 %v7702_v6 }
 0x1c1   :  { %v567_v28 = vadd.f32 %v482_v18, %v461_v27  ;;  %6603 = vmatpush3.msra.mxu1 %v568_v26  ;;  %6606 = vmatprep.mubr.msk.f32.mxu1 %vm7703_vm1, %v7702_v6  ;;  %v6142_v26 = vld [vmem:[%s9014_s14] ss:$0 sm:$0xff]  ;;  %s9039_s14 = sld [smem:[#allocation38_spill]] }
 0x1c2   :  { %6604 = vmatprep.subr.mxu1 %v7702_v6 }
 0x1c3   :  { %6605 = vmatpush3.msra.mxu1 %v567_v28 }
 0x1c4   :  { %6607 = vmatmul.mubr.msk.f32.vlgmr.msra.gmra.mxu1 %vm371_vm0, %v475_v29 }
 0x280   :  { %v558_v32 = vpop.f32.mrf.mxu1 }
 0x281   :  { %v563_v33 = vrot.slane %v558_v32, 7 }
 0x282   :  { %v6601_v34 = vpop.f32.mrf.mxu1 }
 0x283   :  { %v8031_v35 = vsel %vm565_vm3, %v473_v31, %v563_v33 }
 0x284   :  { %v638_v36 = vpop.f32.mrf.mxu1  ;;  %v654_v37 = vsel %vm653_vm4, %v8031_v35, 0.0 }
 0x285   :  { %v643_v38 = vrot.slane %v638_v36, 7  ;;  %655 = vadd.xlane.f32.xlu0 %v654_v37 }
 0x286   :  { %v6608_v39 = vpop.f32.mrf.mxu1 }
 0x287   :  { %v645_v40 = vsel %vm565_vm3, %v473_v31, %v643_v38  ;;  %v648_v42 = vrot.slane %v643_v38, 7 }
 0x288   :  { %v647_v41 = vrot.slane %v645_v40, 7 }
 0x28a   :  { %v8037_v43 = vsel %vm565_vm3, %v563_v33, %v647_v41  ;;  %v8042_v45 = vsel %vm565_vm3, %v647_v41, %v648_v42 }
 0x28b   :  { %v657_v44 = vsel %vm653_vm4, %v8037_v43, 0.0  ;;  %v661_v46 = vsel %vm660_vm5, %v8042_v45, 0.0 }
 0x28c   :  { %658 = vadd.xlane.f32.xlu0 %v657_v44 }
 0x290   :  { %662 = vadd.xlane.f32.xlu0 %v661_v46 }
 0x30e   :  { %v656_v47 = vpop.xlane.xlu0 %655 }
 0x30f   :  { %v665_v48 = vmul.f32 0.03125, %v656_v47 }
 0x311   :  { %v668_v49 = vsub.f32 %v8031_v35, %v665_v48 }
 0x313   :  { %v671_v50 = vmul.f32 %v668_v49, %v668_v49 }
 0x315   :  { %v659_v51 = vpop.xlane.xlu0 %658  ;;  %v674_v52 = vsel %vm653_vm4, %v671_v50, 0.0 }
 0x316   :  { %v666_v53 = vmul.f32 0.03125, %v659_v51  ;;  %675 = vadd.xlane.f32.xlu1 %v674_v52 }
 0x318   :  { %v669_v54 = vsub.f32 %v8037_v43, %v666_v53 }
 0x319   :  { %v663_v55 = vpop.xlane.xlu0 %662 }
 0x31a   :  { %v667_v56 = vmul.f32 0.03125, %v663_v55  ;;  %v672_v57 = vmul.f32 %v669_v54, %v669_v54 }
 0x31c   :  { %v670_v58 = vsub.f32 %v8042_v45, %v667_v56  ;;  %v677_v59 = vsel %vm653_vm4, %v672_v57, 0.0 }
 0x31d   :  { %678 = vadd.xlane.f32.xlu1 %v677_v59 }
 0x31e   :  { %v673_v60 = vmul.f32 %v670_v58, %v670_v58 }
 0x320   :  { %v680_v61 = vsel %vm660_vm5, %v673_v60, 0.0 }
 0x321   :  { %681 = vadd.xlane.f32.xlu1 %v680_v61 }
 0x39f   :  { %v676_v2 = vpop.xlane.xlu1 %675 }
 0x3a0   :  { %v683_v3 = vmul.f32 0.03125, %v676_v2 }
 0x3a2   :  { %v686_v4 = vadd.f32 1e-06, %v683_v3 }
 0x3a4   :  { %7191 = vrsqrt.f32 %v686_v4 }
 0x3a6   :  { %v679_v5 = vpop.xlane.xlu1 %678 }
 0x3a7   :  { %v684_v7 = vmul.f32 0.03125, %v679_v5 }
 0x3a9   :  { %v687_v8 = vadd.f32 1e-06, %v684_v7 }
 0x3aa   :  { %v682_v9 = vpop.xlane.xlu1 %681 }
 0x3ab   :  { %7193 = vrsqrt.f32 %v687_v8  ;;  %v685_v10 = vmul.f32 0.03125, %v682_v9 }
 0x3ad   :  { %v688_v11 = vadd.f32 1e-06, %v685_v10 }
 0x3af   :  { %7195 = vrsqrt.f32 %v688_v11 }
 0x3b1   :  { %v7192_v12 = vpop.eup %7191 }
 0x3b2   :  { %v692_v14 = vmul.f32 %v7192_v12, %v668_v49 }
 0x3b4   :  { %v702_v16 = vmul.f32 %v6140_v13, %v692_v14  ;;  %v8110_v14 = vld [vmem:[%s9015_s28 + $0x18] sm:$0xff] }
 0x3b6   :  { %v712_v17 = vadd.f32 %v6141_v15, %v702_v16 }
 0x3b8   :  { %v7194_v18 = vpop.eup %7193  ;;  %6618 = vmatmul.mubr.msk.f32.vlgmr.msra.gmra.mxu0 %vm653_vm4, %v712_v17 }
 0x3b9   :  { %6620 = vmatprep.mubr.msk.f32.mxu0 %vm7703_vm1, %v7702_v6  ;;  %v693_v19 = vmul.f32 %v7194_v18, %v669_v54 }
 0x3bb   :  { %v703_v20 = vmul.f32 %v6140_v13, %v693_v19 }
 0x3bc   :  { %v7196_v21 = vpop.eup %7195 }
 0x3bd   :  { %v713_v22 = vadd.f32 %v6141_v15, %v703_v20  ;;  %v694_v23 = vmul.f32 %v7196_v21, %v670_v58 }
 0x3bf   :  { %6621 = vmatmul.mubr.msk.f32.gmra.mxu0 %vm653_vm4, %v713_v22  ;;  %v704_v24 = vmul.f32 %v6140_v13, %v694_v23 }
 0x3c0   :  { %6623 = vmatprep.mubr.msk.f32.mxu0 %vm7703_vm1, %v7702_v6 }
 0x3c1   :  { %v714_v25 = vadd.f32 %v6141_v15, %v704_v24  ;;  %v8115_v15 = vld [vmem:[%s9015_s28 + $0x10] sm:$0xff] }
 0x3c3   :  { %6624 = vmatmul.mubr.msk.f32.gmra.mxu0 %vm653_vm4, %v714_v25 }
 0x478   :  { %v801_v27 = vpop.f32.mrf.mxu0 }
 0x479   :  { %v8069_v28 = vadd.f32 %v6142_v26, %v801_v27 }
 0x47a   :  { %v6619_v29 = vpop.f32.mrf.mxu0 }
 0x47b   :  { %6630 = vmatprep.mubr.msk.f32.mxu1 %vm371_vm0, %v8069_v28  ;;  %821 = vrot.lane.b32.xlu1 %v8069_v28, %s7704_s19 }
 0x47f   :  { %v806_v30 = vpop.f32.mrf.mxu0 }
 0x480   :  { %v8075_v31 = vadd.f32 %v6142_v26, %v806_v30 }
 0x481   :  { %v6622_v32 = vpop.f32.mrf.mxu0 }
 0x482   :  { %823 = vrot.lane.b32.xlu0 %v8075_v31, %s7704_s19  ;;  %1028 = vrot.lane.b32.xlu1 %v8075_v31, %s7705_s24  ;;  %v1388_v17 = vrot.slane %v8075_v31, 1 }
 0x483   :  { %v811_v33 = vpop.f32.mrf.mxu0 }
 0x484   :  { %v8081_v34 = vadd.f32 %v6142_v26, %v811_v33 }
 0x485   :  { %v6625_v36 = vpop.f32.mrf.mxu0 }
 0x486   :  { %1022 = vrot.lane.b32.xlu0 %v8069_v28, %s7706_s26  ;;  %1026 = vrot.lane.b32.xlu1 %v8069_v28, %s7705_s24  ;;  %v8124_v16 = vrot.slane %v8081_v34, 1 }
 0x488   :  { %v8135_v18 = vsel %vm479_vm2, %v1388_v17, %v8124_v16 }
 0x48a   :  { %1024 = vrot.lane.b32.xlu1 %v8075_v31, %s7706_s26 }
 0x4ed   :  { %v822_v37 = vpop.permute.xlu1 %821 }
 0x4f4   :  { %v1029_v38 = vpop.permute.xlu1 %1028  ;;  %v824_v39 = vpop.permute.xlu0 %823 }
 0x4f5   :  { %6626 = vmatprep.subr.msk.mxu1 %vm371_vm0, %v824_v39  ;;  %6640 = vmatprep.subr.msk.mxu0 %vm371_vm0, %v1029_v38 }
 0x4f6   :  { %6627 = vmatpush3.xpose.msk.msra.mxu1 %vm371_vm0, %v824_v39  ;;  %6641 = vmatpush3.xpose.msk.msra.mxu0 %vm371_vm0, %v1029_v38  ;;  %v8154_v38 = vld [vmem:[%s9015_s28] sm:$0xff] }
 0x4f7   :  { %6628 = vmatprep.subr.msk.mxu1 %vm371_vm0, %v822_v37 }
 0x4f8   :  { %v1027_v40 = vpop.permute.xlu1 %1026  ;;  %v1023_v41 = vpop.permute.xlu0 %1022 }
 0x4f9   :  { %6642 = vmatprep.subr.msk.mxu0 %vm371_vm0, %v1027_v40  ;;  %6644 = vmatprep.mubr.msk.f32.mxu0 %vm371_vm0, %v1023_v41 }
 0x4fa   :  { %6629 = vmatpush3.xpose.msk.msra.mxu1 %vm371_vm0, %v822_v37  ;;  %6643 = vmatpush3.xpose.msk.msra.mxu0 %vm371_vm0, %v1027_v40  ;;  %v8149_v37 = vld [vmem:[%s9015_s28 + $0x8] sm:$0xff]  ;;  %s9043_s28 = sld [smem:[#allocation66_spill]] }
 0x4fb   :  { %6654 = vmatprep.subr.mxu0 %v8110_v14 }
 0x4fc   :  { %v1025_v42 = vpop.permute.xlu1 %1024 }
 0x4fd   :  { %6631 = vmatmul.mubr.msk.f32.vlgmr.msra.gmra.mxu1 %vm371_vm0, %v8075_v31  ;;  %6645 = vmatmul.mubr.msk.f32.vlgmr.msra.gmra.mxu0 %vm371_vm0, %v1025_v42 }
 0x4fe   :  { %6655 = vmatpush3.msra.mxu0 %v8110_v14 }
 0x4ff   :  { %6656 = vmatprep.subr.mxu0 %v8115_v15 }
 0x500   :  { %6657 = vmatpush3.msra.mxu0 %v8115_v15 }
 0x5bd   :  { %v6632_v44 = vpop.f32.mrf.mxu1  ;;  %v6646_v46 = vpop.f32.mrf.mxu0 }
 0x5be   :  { %v909_v47 = vmul.f32 0.25, %v6632_v44  ;;  %v1114_v54 = vmul.f32 0.25, %v6646_v46 }
 0x5bf   :  { %v899_v48 = vpop.f32.mrf.mxu1  ;;  %v1104_v49 = vpop.f32.mrf.mxu0 }
 0x5c0   :  { %v908_v50 = vmul.f32 0.25, %v899_v48  ;;  %v915_v51 = vsel %vm914_vm6, %v909_v47, -inf  ;;  %v1113_v52 = vmul.f32 0.25, %v1104_v49  ;;  %v1118_v56 = vsel %vm914_vm6, %v1114_v54, -inf }
 0x5c1   :  { %916 = vmax.xlane.f32.xlu1 %v915_v51 }
 0x5c2   :  { %v911_v53 = vsel %vm910_vm7, %v908_v50, -inf  ;;  %v1115_v55 = vsel %vm910_vm7, %v1113_v52, -inf }
 0x5c3   :  { %912 = vmax.xlane.f32.xlu0 %v911_v53 }
 0x5c7   :  { %1116 = vmax.xlane.f32.xlu0 %v1115_v55 }
 0x5cb   :  { %1119 = vmax.xlane.f32.xlu0 %v1118_v56 }
 0x64a   :  { %v917_v57 = vpop.xlane.xlu1 %916 }
 0x64b   :  { %v919_v58 = vsub.f32 %v909_v47, %v917_v57 }
 0x64c   :  { %v913_v59 = vpop.xlane.xlu0 %912 }
 0x64d   :  { %v922_v60 = vmul.f32 1.442695, %v919_v58  ;;  %v918_v61 = vsub.f32 %v908_v50, %v913_v59 }
 0x64f   :  { %7197 = vpow2.f32 %v922_v60  ;;  %v920_v62 = vmul.f32 1.442695, %v918_v61 }
 0x650   :  { %v1117_v63 = vpop.xlane.xlu0 %1116 }
 0x651   :  { %7199 = vpow2.f32 %v920_v62  ;;  %v1121_v0 = vsub.f32 %v1113_v52, %v1117_v63 }
 0x653   :  { %v1123_v1 = vmul.f32 1.442695, %v1121_v0 }
 0x654   :  { %v1120_v2 = vpop.xlane.xlu0 %1119 }
 0x655   :  { %7201 = vpow2.f32 %v1123_v1  ;;  %v1122_v3 = vsub.f32 %v1114_v54, %v1120_v2 }
 0x657   :  { %v1125_v4 = vmul.f32 1.442695, %v1122_v3 }
 0x659   :  { %7203 = vpow2.f32 %v1125_v4 }
 0x65c   :  { %v7198_v5 = vpop.eup %7197 }
 0x65d   :  { %v927_v7 = vsel %vm914_vm6, %v7198_v5, 0.0 }
 0x65e   :  { %v7200_v8 = vpop.eup %7199  ;;  %928 = vadd.xlane.f32.xlu1 %v927_v7 }
 0x65f   :  { %v924_v9 = vsel %vm910_vm7, %v7200_v8, 0.0 }
 0x660   :  { %925 = vadd.xlane.f32.xlu0 %v924_v9 }
 0x662   :  { %v7202_v10 = vpop.eup %7201 }
 0x663   :  { %v1127_v11 = vsel %vm910_vm7, %v7202_v10, 0.0 }
 0x664   :  { %1128 = vadd.xlane.f32.xlu0 %v1127_v11 }
 0x666   :  { %v7204_v12 = vpop.eup %7203 }
 0x667   :  { %v1130_v13 = vsel %vm914_vm6, %v7204_v12, 0.0 }
 0x668   :  { %1131 = vadd.xlane.f32.xlu1 %v1130_v13 }
 0x679   :  { %934 = vrot.lane.b32.xlu1 %v8069_v28, %s7707_s1 }
 0x67a   :  { %936 = vrot.lane.b32.xlu0 %v8075_v31, %s7707_s1 }
 0x67d   :  { %1139 = vrot.lane.b32.xlu1 %v8075_v31, %s7708_s2 }
 0x67e   :  { %1393 = vrot.lane.b32.xlu0 %v8124_v16, %s7704_s19 }
 0x681   :  { %1137 = vrot.lane.b32.xlu1 %v8069_v28, %s7708_s2 }
 0x685   :  { %1391 = vrot.lane.b32.xlu1 %v8135_v18, %s7704_s19 }
 0x6e7   :  { %v929_v19 = vpop.xlane.xlu1 %928 }
 0x6e8   :  { %7205 = vrcp.f32 %v929_v19 }
 0x6e9   :  { %v926_v20 = vpop.xlane.xlu0 %925 }
 0x6ea   :  { %7207 = vrcp.f32 %v926_v20 }
 0x6ed   :  { %v1129_v21 = vpop.xlane.xlu0 %1128 }
 0x6ee   :  { %7209 = vrcp.f32 %v1129_v21 }
 0x6f1   :  { %v1132_v22 = vpop.xlane.xlu1 %1131  ;;  %v937_v23 = vpop.permute.xlu0 %936 }
 0x6f2   :  { %7211 = vrcp.f32 %v1132_v22  ;;  %6633 = vmatprep.subr.msk.mxu1 %vm565_vm3, %v937_v23 }
 0x6f3   :  { %6634 = vmatpush3.msk.msra.mxu1 %vm565_vm3, %v937_v23 }
 0x6f5   :  { %v935_v24 = vpop.permute.xlu1 %934  ;;  %v1394_v25 = vpop.permute.xlu0 %1393 }
 0x6f6   :  { %v7206_v26 = vpop.eup %7205  ;;  %6635 = vmatprep.subr.mxu1 %v935_v24  ;;  %6668 = vmatprep.subr.msk.mxu0 %vm371_vm0, %v1394_v25 }
 0x6f7   :  { %v7208_v27 = vpop.eup %7207  ;;  %6636 = vmatpush3.msra.mxu1 %v935_v24  ;;  %v933_v30 = vmul.f32 %v7206_v26, %v7198_v5 }
 0x6f8   :  { %v932_v28 = vmul.f32 %v7208_v27, %v7200_v8 }
 0x6f9   :  { %v1140_v29 = vpop.permute.xlu1 %1139 }
 0x6fa   :  { %6637 = vmatprep.mubr.msk.f32.mxu1 %vm910_vm7, %v932_v28  ;;  %6647 = vmatprep.subr.msk.mxu1 %vm565_vm3, %v1140_v29 }
 0x6fb   :  { %v7210_v31 = vpop.eup %7209  ;;  %6638 = vmatmul.mubr.msk.f32.vlgmr.msra.gmra.mxu1 %vm910_vm7, %v933_v30  ;;  %v8215_v30 = vld [vmem:[%s9016_s20] ss:$0 sm:$0xff]  ;;  %s7709_s20 = smov [#allocation22]  }
 0x6fc   :  { %6648 = vmatpush3.msk.msra.mxu1 %vm565_vm3, %v1140_v29  ;;  %v1135_v32 = vmul.f32 %v7210_v31, %v7202_v10 }
 0x6fd   :  { %v1138_v33 = vpop.permute.xlu1 %1137 }
 0x6fe   :  { %6649 = vmatprep.subr.mxu1 %v1138_v33  ;;  %6651 = vmatprep.mubr.msk.f32.mxu1 %vm910_vm7, %v1135_v32 }
 0x6ff   :  { %v7212_v34 = vpop.eup %7211  ;;  %6650 = vmatpush3.msra.mxu1 %v1138_v33 }
 0x700   :  { %v1136_v36 = vmul.f32 %v7212_v34, %v7204_v12  ;;  %6661 = vmatprep.subr.mxu1 %v8149_v37 }
 0x701   :  { %v1392_v44 = vpop.permute.xlu1 %1391 }
 0x702   :  { %6652 = vmatmul.mubr.msk.f32.vlgmr.msra.gmra.mxu1 %vm910_vm7, %v1136_v36 }
 0x703   :  { %6662 = vmatpush3.msra.mxu1 %v8149_v37 }
 0x704   :  { %6663 = vmatprep.subr.mxu1 %v8154_v38 }
 0x705   :  { %6664 = vmatpush3.msra.mxu1 %v8154_v38 }
 0x7bb   :  { %v6639_v39 = vpop.f32.mrf.mxu1 }
 0x7bd   :  { %v1013_v40 = vpop.f32.mrf.mxu1 }
 0x7be   :  { %6665 = vmatprep.mubr.msk.f32.mxu1 %vm371_vm0, %v1013_v40 }
 0x7bf   :  { %6666 = vmatmul.mubr.msk.f32.vlgmr.msra.gmra.mxu1 %vm371_vm0, %v6639_v39 }
 0x7c2   :  { %v6653_v41 = vpop.f32.mrf.mxu1 }
 0x7c4   :  { %v1216_v42 = vpop.f32.mrf.mxu1 }
 0x7c5   :  { %6658 = vmatprep.mubr.msk.f32.mxu0 %vm371_vm0, %v1216_v42 }
 0x7c6   :  { %6659 = vmatmul.mubr.msk.f32.vlgmr.msra.gmra.mxu0 %vm371_vm0, %v6653_v41 }
 0x7c7   :  { %6669 = vmatpush3.xpose.msk.msra.mxu0 %vm371_vm0, %v1394_v25  ;;  %6672 = vmatprep.mubr.msk.f32.mxu0 %vm371_vm0, %v8135_v18 }
 0x7c8   :  { %6670 = vmatprep.subr.msk.mxu0 %vm371_vm0, %v1392_v44 }
 0x7cb   :  { %6671 = vmatpush3.xpose.msk.msra.mxu0 %vm371_vm0, %v1392_v44 }
 0x7ce   :  { %6673 = vmatmul.mubr.msk.f32.vlgmr.msra.gmra.mxu0 %vm371_vm0, %v8124_v16 }
 0x87f   :  { %v6667_v46 = vpop.f32.mrf.mxu1 }
 0x881   :  { %v1378_v19 = vpop.f32.mrf.mxu1 }
 0x886   :  { %v6660_v47 = vpop.f32.mrf.mxu0 }
 0x887   :  { %v8169_v48 = vadd.f32 %v6667_v46, %v6660_v47 }
 0x888   :  { %v8171_v49 = vpop.f32.mrf.mxu0 }
 0x889   :  { %v1379_v28 = vadd.f32 %v1378_v19, %v8171_v49 }
 0x88b   :  { %v1963_v29 = vadd.f32 %v1379_v28, %v8031_v35 }
 0x88d   :  { %v8218_v31 = vadd.f32 %v8215_v30, %v1963_v29  ;;  %v8277_v29 = vld [vmem:[%s9018_s4] ss:$0 sm:$0xff] }
 0x88e   :  { %v6674_v50 = vpop.f32.mrf.mxu0 }
 0x88f   :  { %v1479_v51 = vmul.f32 0.25, %v6674_v50  ;;  %v1976_v32 = vsel %vm653_vm4, %v8218_v31, 0.0 }
 0x890   :  { %v1469_v52 = vpop.f32.mrf.mxu0 }
 0x891   :  { %v1478_v53 = vmul.f32 0.25, %v1469_v52  ;;  %v1483_v54 = vsel %vm914_vm6, %v1479_v51, -inf }
 0x892   :  { %1484 = vmax.xlane.f32.xlu1 %v1483_v54 }
 0x893   :  { %v1480_v55 = vsel %vm910_vm7, %v1478_v53, -inf }
 0x894   :  { %1481 = vmax.xlane.f32.xlu0 %v1480_v55 }
 0x8a3   :  { %1502 = vrot.lane.b32.xlu1 %v8135_v18, %s7707_s1 }
 0x8a7   :  { %1596 = vrot.lane.b32.xlu1 %v8124_v16, %s7705_s24 }
 0x8ab   :  { %1594 = vrot.lane.b32.xlu1 %v8135_v18, %s7705_s24 }
 0x8af   :  { %1592 = vrot.lane.b32.xlu1 %v8124_v16, %s7706_s26 }
 0x91b   :  { %v1485_v56 = vpop.xlane.xlu1 %1484 }
 0x91c   :  { %v1487_v57 = vsub.f32 %v1479_v51, %v1485_v56 }
 0x91d   :  { %v1482_v58 = vpop.xlane.xlu0 %1481 }
 0x91e   :  { %v1490_v59 = vmul.f32 1.442695, %v1487_v57  ;;  %v1486_v60 = vsub.f32 %v1478_v53, %v1482_v58 }
 0x91f   :  { %v1503_v4 = vpop.permute.xlu1 %1502 }
 0x920   :  { %7213 = vpow2.f32 %v1490_v59  ;;  %v1488_v61 = vmul.f32 1.442695, %v1486_v60 }
 0x922   :  { %7215 = vpow2.f32 %v1488_v61 }
 0x923   :  { %v1597_v7 = vpop.permute.xlu1 %1596 }
 0x927   :  { %v1595_v13 = vpop.permute.xlu1 %1594 }
 0x92b   :  { %v1593_v17 = vpop.permute.xlu1 %1592 }
 0x92d   :  { %v7214_v62 = vpop.eup %7213 }
 0x92e   :  { %v1495_v63 = vsel %vm914_vm6, %v7214_v62, 0.0 }
 0x92f   :  { %v7216_v0 = vpop.eup %7215  ;;  %1496 = vadd.xlane.f32.xlu0 %v1495_v63 }
 0x930   :  { %v1492_v1 = vsel %vm910_vm7, %v7216_v0, 0.0 }
 0x933   :  { %1493 = vadd.xlane.f32.xlu0 %v1492_v1 }
 0x949   :  { %1504 = vrot.lane.b32.xlu0 %v8124_v16, %s7707_s1 }
 0x94d   :  { %1590 = vrot.lane.b32.xlu0 %v8135_v18, %s7706_s26 }
 0x9b8   :  { %v1497_v2 = vpop.xlane.xlu0 %1496 }
 0x9b9   :  { %7217 = vrcp.f32 %v1497_v2 }
 0x9bc   :  { %v1494_v3 = vpop.xlane.xlu0 %1493 }
 0x9bd   :  { %7219 = vrcp.f32 %v1494_v3 }
 0x9c0   :  { %v1505_v5 = vpop.permute.xlu0 %1504 }
 0x9c1   :  { %6675 = vmatprep.subr.msk.mxu1 %vm565_vm3, %v1505_v5 }
 0x9c2   :  { %6676 = vmatpush3.msk.msra.mxu1 %vm565_vm3, %v1505_v5 }
 0x9c3   :  { %6677 = vmatprep.subr.mxu1 %v1503_v4 }
 0x9c4   :  { %6678 = vmatpush3.msra.mxu1 %v1503_v4  ;;  %v1591_v12 = vpop.permute.xlu0 %1590 }
 0x9c5   :  { %6682 = vmatprep.subr.msk.mxu1 %vm371_vm0, %v1597_v7 }
 0x9c6   :  { %v7218_v8 = vpop.eup %7217 }
 0x9c7   :  { %v1501_v11 = vmul.f32 %v7218_v8, %v7214_v62  ;;  %v2038_v8 = vld [vmem:[%s9017_s7 + $0x18] sm:$0xff] }
 0x9ca   :  { %v7220_v9 = vpop.eup %7219 }
 0x9cb   :  { %v1500_v10 = vmul.f32 %v7220_v9, %v7216_v0  ;;  %v2037_v9 = vld [vmem:[%s9017_s7 + $0x10] sm:$0xff] }
 0x9cd   :  { %6679 = vmatprep.mubr.msk.f32.mxu1 %vm910_vm7, %v1500_v10  ;;  %v2035_v10 = vld [vmem:[%s9017_s7] sm:$0xff] }
 0x9ce   :  { %6680 = vmatmul.mubr.msk.f32.vlgmr.msra.gmra.mxu1 %vm910_vm7, %v1501_v11 }
 0x9cf   :  { %6683 = vmatpush3.xpose.msk.msra.mxu1 %vm371_vm0, %v1597_v7  ;;  %6686 = vmatprep.mubr.msk.f32.mxu1 %vm371_vm0, %v1591_v12 }
 0x9d0   :  { %6684 = vmatprep.subr.msk.mxu1 %vm371_vm0, %v1595_v13 }
 0x9d3   :  { %6685 = vmatpush3.xpose.msk.msra.mxu1 %vm371_vm0, %v1595_v13 }
 0x9d4   :  { %6703 = vmatprep.subr.mxu1 %v8149_v37 }
 0x9d6   :  { %6687 = vmatmul.mubr.msk.f32.vlgmr.msra.gmra.mxu1 %vm371_vm0, %v1593_v17 }
 0x9d7   :  { %6704 = vmatpush3.msra.mxu1 %v8149_v37 }
 0x9d8   :  { %6705 = vmatprep.subr.mxu1 %v8154_v38 }
 0x9d9   :  { %6706 = vmatpush3.msra.mxu1 %v8154_v38 }
 0x9da   :  { %6710 = vmatprep.subr.mxu1 %v7702_v6 }
 0xa8e   :  { %v6681_v20 = vpop.f32.mrf.mxu1 }
 0xa90   :  { %v1581_v21 = vpop.f32.mrf.mxu1 }
 0xa91   :  { %6707 = vmatprep.mubr.msk.f32.mxu1 %vm371_vm0, %v1581_v21 }
 0xa92   :  { %6708 = vmatmul.mubr.msk.f32.vlgmr.msra.gmra.mxu1 %vm371_vm0, %v6681_v20 }
 0xa93   :  { %6718 = vmatprep.mubr.msk.f32.mxu1 %vm7703_vm1, %v7702_v6  ;;  %6711 = vmatpush3.msra.mxu1 %v2038_v8 }
 0xa94   :  { %6712 = vmatprep.subr.mxu1 %v7702_v6 }
 0xa95   :  { %6713 = vmatpush3.msra.mxu1 %v2037_v9 }
 0xa96   :  { %v6688_v22 = vpop.f32.mrf.mxu1  ;;  %6714 = vmatprep.subr.mxu1 %v7702_v6 }
 0xa97   :  { %v1682_v23 = vmul.f32 0.25, %v6688_v22 }
 0xa98   :  { %v1672_v24 = vpop.f32.mrf.mxu1 }
 0xa99   :  { %v1681_v25 = vmul.f32 0.25, %v1672_v24  ;;  %v1686_v26 = vsel %vm914_vm6, %v1682_v23, -inf }
 0xa9a   :  { %1687 = vmax.xlane.f32.xlu1 %v1686_v26 }
 0xa9b   :  { %v1683_v27 = vsel %vm910_vm7, %v1681_v25, -inf }
 0xa9c   :  { %1684 = vmax.xlane.f32.xlu0 %v1683_v27 }
 0xaab   :  { %1705 = vrot.lane.b32.xlu1 %v8135_v18, %s7708_s2 }
 0xacf   :  { %1977 = vadd.xlane.f32.xlu1 %v1976_v32  ;;  %v8280_v32 = vld [vmem:[%s9019_s12] ss:$0 sm:$0xff] }
 0xb23   :  { %v1688_v33 = vpop.xlane.xlu1 %1687 }
 0xb24   :  { %v1690_v34 = vsub.f32 %v1682_v23, %v1688_v33 }
 0xb25   :  { %v1685_v36 = vpop.xlane.xlu0 %1684 }
 0xb26   :  { %v1693_v37 = vmul.f32 1.442695, %v1690_v34  ;;  %v1689_v38 = vsub.f32 %v1681_v25, %v1685_v36  ;;  %v2177_v36 = vld [vmem:[%s9020_s10 + $0x78] sm:$0xff] }
 0xb27   :  { %v1706_v47 = vpop.permute.xlu1 %1705 }
 0xb28   :  { %7221 = vpow2.f32 %v1693_v37  ;;  %v1691_v18 = vmul.f32 1.442695, %v1689_v38  ;;  %v2176_v37 = vld [vmem:[%s9020_s10 + $0x70] sm:$0xff]  ;;  %v2175_v38 = vld [vmem:[%s9020_s10 + $0x68] sm:$0xff] }
 0xb2a   :  { %7223 = vpow2.f32 %v1691_v18  ;;  %v2174_v18 = vld [vmem:[%s9020_s10 + $0x60] sm:$0xff] }
 0xb35   :  { %v7222_v39 = vpop.eup %7221 }
 0xb36   :  { %v1698_v35 = vsel %vm914_vm6, %v7222_v39, 0.0 }
 0xb37   :  { %v7224_v40 = vpop.eup %7223  ;;  %1699 = vadd.xlane.f32.xlu0 %v1698_v35  ;;  %v2172_v35 = vld [vmem:[%s9020_s10 + $0x50] sm:$0xff] }
 0xb38   :  { %v1695_v41 = vsel %vm910_vm7, %v7224_v40, 0.0 }
 0xb3b   :  { %1696 = vadd.xlane.f32.xlu0 %v1695_v41  ;;  %v2170_v41 = vld [vmem:[%s9020_s10 + $0x40] sm:$0xff] }
 0xb51   :  { %1707 = vrot.lane.b32.xlu0 %v8124_v16, %s7708_s2 }
 0xb52   :  { %v6709_v54 = vpop.f32.mrf.mxu1 }
 0xb54   :  { %v1946_v57 = vpop.f32.mrf.mxu1 }
 0xb58   :  { %v1978_v56 = vpop.xlane.xlu1 %1977 }
 0xb59   :  { %v1985_v60 = vmul.f32 0.03125, %v1978_v56 }
 0xb5b   :  { %v1988_v63 = vsub.f32 %v8218_v31, %v1985_v60 }
 0xb5d   :  { %v1991_v5 = vmul.f32 %v1988_v63, %v1988_v63 }
 0xbc0   :  { %v1700_v42 = vpop.xlane.xlu0 %1699 }
 0xbc1   :  { %7225 = vrcp.f32 %v1700_v42  ;;  %v2169_v42 = vld [vmem:[%s9020_s10 + $0x38] sm:$0xff] }
 0xbc4   :  { %v1697_v44 = vpop.xlane.xlu0 %1696 }
 0xbc5   :  { %7227 = vrcp.f32 %v1697_v44  ;;  %v2168_v44 = vld [vmem:[%s9020_s10 + $0x30] sm:$0xff] }
 0xbc8   :  { %v1708_v46 = vpop.permute.xlu0 %1707 }
 0xbc9   :  { %6689 = vmatprep.subr.msk.mxu0 %vm565_vm3, %v1708_v46 }
 0xbca   :  { %6690 = vmatpush3.msk.msra.mxu0 %vm565_vm3, %v1708_v46  ;;  %v2167_v46 = vld [vmem:[%s9020_s10 + $0x28] sm:$0xff] }
 0xbcb   :  { %6691 = vmatprep.subr.mxu0 %v1706_v47 }
 0xbcc   :  { %6692 = vmatpush3.msra.mxu0 %v1706_v47  ;;  %v2166_v47 = vld [vmem:[%s9020_s10 + $0x20] sm:$0xff] }
 0xbcd   :  { %6696 = vmatprep.subr.mxu0 %v8110_v14 }
 0xbce   :  { %v7226_v49 = vpop.eup %7225 }
 0xbcf   :  { %v1704_v52 = vmul.f32 %v7226_v49, %v7222_v39  ;;  %v2173_v39 = vld [vmem:[%s9020_s10 + $0x58] sm:$0xff] }
 0xbd0   :  { %v2165_v49 = vld [vmem:[%s9020_s10 + $0x18] sm:$0xff] }
 0xbd2   :  { %v7228_v50 = vpop.eup %7227 }
 0xbd3   :  { %v1703_v51 = vmul.f32 %v7228_v50, %v7224_v40  ;;  %v2171_v40 = vld [vmem:[%s9020_s10 + $0x48] sm:$0xff]  ;;  %v2164_v50 = vld [vmem:[%s9020_s10 + $0x10] sm:$0xff] }
 0xbd5   :  { %6693 = vmatprep.mubr.msk.f32.mxu0 %vm910_vm7, %v1703_v51  ;;  %v2163_v51 = vld [vmem:[%s9020_s10 + $0x8] sm:$0xff] }
 0xbd6   :  { %6694 = vmatmul.mubr.msk.f32.vlgmr.msra.gmra.mxu0 %vm910_vm7, %v1704_v52  ;;  %v2162_v52 = vld [vmem:[%s9020_s10] sm:$0xff] }
 0xbd7   :  { %6697 = vmatpush3.msra.mxu0 %v8110_v14 }
 0xbd8   :  { %6698 = vmatprep.subr.mxu0 %v8115_v15 }
 0xbd9   :  { %6699 = vmatpush3.msra.mxu0 %v8115_v15 }
 0xbda   :  { %6768 = vmatprep.subr.mxu0 %v7702_v6 }
 0xc96   :  { %v6695_v16 = vpop.f32.mrf.mxu0 }
 0xc98   :  { %v1784_v53 = vpop.f32.mrf.mxu0 }
 0xc99   :  { %6700 = vmatprep.mubr.msk.f32.mxu0 %vm371_vm0, %v1784_v53 }
 0xc9a   :  { %6701 = vmatmul.mubr.msk.f32.vlgmr.msra.gmra.mxu0 %vm371_vm0, %v6695_v16 }
 0xc9b   :  { %6776 = vmatprep.mubr.msk.f32.mxu0 %vm7703_vm1, %v7702_v6 }
 0xd5a   :  { %v6702_v55 = vpop.f32.mrf.mxu0 }
 0xd5b   :  { %v1952_v58 = vadd.f32 %v6709_v54, %v6702_v55 }
 0xd5c   :  { %v1865_v14 = vpop.f32.mrf.mxu0 }
 0xd5d   :  { %v1947_v59 = vadd.f32 %v1946_v57, %v1865_v14  ;;  %v1958_v61 = vrot.slane %v1952_v58, 7 }
 0xd5f   :  { %v1957_v15 = vrot.slane %v1947_v59, 7 }
 0xd61   :  { %v1962_v62 = vsel %vm565_vm3, %v8169_v48, %v1957_v15  ;;  %v1959_v1 = vsel %vm565_vm3, %v1957_v15, %v1958_v61  ;;  %v1994_v48 = vsel %vm653_vm4, %v1991_v5, 0.0 }
 0xd62   :  { %v1964_v0 = vadd.f32 %v1962_v62, %v8037_v43  ;;  %v1965_v3 = vadd.f32 %v1959_v1, %v8042_v45  ;;  %v2036_v45 = vld [vmem:[%s9017_s7 + $0x8] sm:$0xff]  ;;  %s6062_s7 = sshll.u32 %s7709_s20, 4  ;;  %s6063_s7 = int_to_ptr.vmem [resolvable:$true] %s6062_s7 }
 0xd63   :  { %6715 = vmatpush3.msra.mxu1 %v2036_v45  ;;  %s7601_s4 = scalar_lea.vmem %s6063_s7, 512  ;;  %p7606_p5 = scmp.lt.s32.totalorder %s6063_s7, %s6063_s7 }
 0xd64   :  { %v8245_v2 = vadd.f32 %v8215_v30, %v1964_v0  ;;  %v8252_v7 = vadd.f32 %v8215_v30, %v1965_v3  ;;  %6716 = vmatprep.subr.mxu1 %v7702_v6  ;;  %v6185_v0 = vld [vmem:[%s9021_s30] ss:$0 sm:$0xff]  ;;  %p7602_p4 = scmp.ne.s32.totalorder %s6063_s7, %s7601_s4  ;;  %p7607_p6 = scmp.lt.s32.totalorder %s7601_s4, %s7601_s4 }
 0xd65   :  { %6717 = vmatpush3.msra.mxu1 %v2035_v10 }
 0xd66   :  { %v1979_v4 = vsel %vm653_vm4, %v8245_v2, 0.0  ;;  %v1982_v43 = vsel %vm660_vm5, %v8252_v7, 0.0  ;;  %6727 = vmatprep.subr.mxu1 %v7702_v6  ;;  %p7608_p7 = por %p7607_p6, %p7606_p5 }
 0xd67   :  { %1980 = vadd.xlane.f32.xlu0 %v1979_v4 }
 0xd68   :  { %p7609_p8 = pnand %p7608_p7, %p7602_p4 }
 0xd6b   :  { %1995 = vadd.xlane.f32.xlu0 %v1994_v48 }
 0xd6f   :  { %1983 = vadd.xlane.f32.xlu0 %v1982_v43 }
 0xdf0   :  { %v1981_v11 = vpop.xlane.xlu0 %1980 }
 0xdf1   :  { %v1986_v12 = vmul.f32 0.03125, %v1981_v11 }
 0xdf3   :  { %v8265_v13 = vsub.f32 %v8245_v2, %v1986_v12 }
 0xdf4   :  { %v1996_v17 = vpop.xlane.xlu0 %1995 }
 0xdf5   :  { %v2003_v19 = vmul.f32 0.03125, %v1996_v17  ;;  %v1992_v20 = vmul.f32 %v8265_v13, %v8265_v13 }
 0xdf7   :  { %v2006_v21 = vadd.f32 1e-06, %v2003_v19  ;;  %v1997_v22 = vsel %vm653_vm4, %v1992_v20, 0.0 }
 0xdf8   :  { %1998 = vadd.xlane.f32.xlu1 %v1997_v22  ;;  %v1984_v23 = vpop.xlane.xlu0 %1983 }
 0xdf9   :  { %7229 = vrsqrt.f32 %v2006_v21  ;;  %v1987_v24 = vmul.f32 0.03125, %v1984_v23 }
 0xdfb   :  { %v8271_v25 = vsub.f32 %v8252_v7, %v1987_v24 }
 0xdfd   :  { %v1993_v26 = vmul.f32 %v8271_v25, %v8271_v25 }
 0xdff   :  { %v2000_v27 = vsel %vm660_vm5, %v1993_v26, 0.0 }
 0xe00   :  { %2001 = vadd.xlane.f32.xlu1 %v2000_v27 }
 0xe06   :  { %v7230_v28 = vpop.eup %7229 }
 0xe07   :  { %v2012_v30 = vmul.f32 %v7230_v28, %v1988_v63 }
 0xe09   :  { %v2022_v33 = vmul.f32 %v8277_v29, %v2012_v30 }
 0xe0b   :  { %v2032_v34 = vadd.f32 %v8280_v32, %v2022_v33 }
 0xe0d   :  { %6719 = vmatmul.mubr.msk.f32.vlgmr.msra.gmra.mxu1 %vm653_vm4, %v2032_v34 }
 0xe0e   :  { %6721 = vmatprep.mubr.msk.f32.mxu1 %vm7703_vm1, %v7702_v6  ;;  %6728 = vmatpush3.msra.mxu1 %v2177_v36 }
 0xe0f   :  { %6729 = vmatprep.subr.mxu1 %v7702_v6 }
 0xe10   :  { %6730 = vmatpush3.msra.mxu1 %v2176_v37 }
 0xe11   :  { %6731 = vmatprep.subr.mxu1 %v7702_v6 }
 0xe12   :  { %6732 = vmatpush3.msra.mxu1 %v2175_v38 }
 0xe13   :  { %6733 = vmatprep.subr.mxu1 %v7702_v6 }
 0xe14   :  { %6734 = vmatpush3.msra.mxu1 %v2174_v18 }
 0xe15   :  { %6735 = vmatprep.subr.mxu1 %v7702_v6 }
 0xe16   :  { %6736 = vmatpush3.msra.mxu1 %v2173_v39 }
 0xe17   :  { %6737 = vmatprep.subr.mxu1 %v7702_v6 }
 0xe18   :  { %6738 = vmatpush3.msra.mxu1 %v2172_v35 }
 0xe19   :  { %6739 = vmatprep.subr.mxu1 %v7702_v6 }
 0xe1a   :  { %6740 = vmatpush3.msra.mxu1 %v2171_v40 }
 0xe1b   :  { %6741 = vmatprep.subr.mxu1 %v7702_v6 }
 0xe1c   :  { %6742 = vmatpush3.msra.mxu1 %v2170_v41  ;;  %v6189_v41 = vld [vmem:[%s9022_s11] ss:$0 sm:$0xff] }
 0xe1d   :  { %6743 = vmatprep.subr.mxu1 %v7702_v6 }
 0xe1e   :  { %6744 = vmatpush3.msra.mxu1 %v2169_v42 }
 0xe1f   :  { %6745 = vmatprep.subr.mxu1 %v7702_v6 }
 0xe20   :  { %6746 = vmatpush3.msra.mxu1 %v2168_v44 }
 0xe21   :  { %6747 = vmatprep.subr.mxu1 %v7702_v6 }
 0xe22   :  { %6748 = vmatpush3.msra.mxu1 %v2167_v46 }
 0xe23   :  { %6749 = vmatprep.subr.mxu1 %v7702_v6 }
 0xe24   :  { %6750 = vmatpush3.msra.mxu1 %v2166_v47 }
 0xe25   :  { %6751 = vmatprep.subr.mxu1 %v7702_v6 }
 0xe26   :  { %6752 = vmatpush3.msra.mxu1 %v2165_v49 }
 0xe27   :  { %6753 = vmatprep.subr.mxu1 %v7702_v6 }
 0xe28   :  { %6754 = vmatpush3.msra.mxu1 %v2164_v50 }
 0xe29   :  { %6755 = vmatprep.subr.mxu1 %v7702_v6 }
 0xe2a   :  { %6756 = vmatpush3.msra.mxu1 %v2163_v51 }
 0xe2b   :  { %6757 = vmatprep.subr.mxu1 %v7702_v6 }
 0xe2c   :  { %6758 = vmatpush3.msra.mxu1 %v2162_v52 }
 0xe81   :  { %v1999_v16 = vpop.xlane.xlu1 %1998 }
 0xe82   :  { %v2004_v53 = vmul.f32 0.03125, %v1999_v16 }
 0xe84   :  { %v2007_v54 = vadd.f32 1e-06, %v2004_v53 }
 0xe86   :  { %7231 = vrsqrt.f32 %v2007_v54 }
 0xe89   :  { %v2002_v55 = vpop.xlane.xlu1 %2001 }
 0xe8a   :  { %v2005_v56 = vmul.f32 0.03125, %v2002_v55 }
 0xe8c   :  { %v2008_v57 = vadd.f32 1e-06, %v2005_v56 }
 0xe8e   :  { %7233 = vrsqrt.f32 %v2008_v57 }
 0xe93   :  { %v7232_v14 = vpop.eup %7231 }
 0xe94   :  { %v2013_v58 = vmul.f32 %v7232_v14, %v8265_v13 }
 0xe96   :  { %v2023_v59 = vmul.f32 %v8277_v29, %v2013_v58 }
 0xe98   :  { %v2033_v60 = vadd.f32 %v8280_v32, %v2023_v59 }
 0xe9a   :  { %6722 = vmatmul.mubr.msk.f32.gmra.mxu1 %vm653_vm4, %v2033_v60 }
 0xe9b   :  { %v7234_v15 = vpop.eup %7233  ;;  %6724 = vmatprep.mubr.msk.f32.mxu1 %vm7703_vm1, %v7702_v6 }
 0xe9c   :  { %v2014_v61 = vmul.f32 %v7234_v15, %v8271_v25  ;;  %v2330_v15 = vld [vmem:[%s9023_s15 + $0x18] sm:$0xff] }
 0xe9d   :  { %6769 = vmatpush3.msra.mxu0 %v2330_v15 }
 0xe9e   :  { %v2024_v62 = vmul.f32 %v8277_v29, %v2014_v61  ;;  %v2329_v61 = vld [vmem:[%s9023_s15 + $0x10] sm:$0xff]  ;;  %6770 = vmatprep.subr.mxu0 %v7702_v6 }
 0xe9f   :  { %6771 = vmatpush3.msra.mxu0 %v2329_v61 }
 0xea0   :  { %v2034_v63 = vadd.f32 %v8280_v32, %v2024_v62  ;;  %v2328_v62 = vld [vmem:[%s9023_s15 + $0x8] sm:$0xff]  ;;  %6772 = vmatprep.subr.mxu0 %v7702_v6 }
 0xea1   :  { %6773 = vmatpush3.msra.mxu0 %v2328_v62 }
 0xea2   :  { %6725 = vmatmul.mubr.msk.f32.gmra.mxu1 %vm653_vm4, %v2034_v63  ;;  %v2327_v63 = vld [vmem:[%s9023_s15] sm:$0xff]  ;;  %6774 = vmatprep.subr.mxu0 %v7702_v6 }
 0xea3   :  { %6759 = vmatprep.mubr.msk.f32.mxu1 %vm7703_vm1, %v7702_v6  ;;  %6775 = vmatpush3.msra.mxu0 %v2327_v63 }
 0xecd   :  { %v2121_v1 = vpop.f32.mrf.mxu1 }
 0xece   :  { %v2122_v3 = vadd.f32 %v6185_v0, %v2121_v1 }
 0xecf   :  { %v6720_v4 = vpop.f32.mrf.mxu1 }
 0xed0   :  { %v2135_v5 = vmul.f32 %v2122_v3, %v2122_v3 }
 0xed2   :  { %v2138_v48 = vmul.f32 %v2135_v5, %v2122_v3 }
 0xed4   :  { %v2141_v43 = vmul.f32 0.044715, %v2138_v48 }
 0xed6   :  { %v2144_v8 = vadd.f32 %v2141_v43, %v2122_v3 }
 0xed8   :  { %v2147_v9 = vmul.f32 0.7978846, %v2144_v8 }
 0xeda   :  { %7235 = vtanh.f32 %v2147_v9 }
 0xee7   :  { %v7236_v45 = vpop.eup %7235 }
 0xee8   :  { %v2153_v10 = vadd.f32 1.0, %v7236_v45 }
 0xeea   :  { %v2156_v11 = vmul.f32 0.5, %v2153_v10 }
 0xeec   :  { %v2159_v12 = vmul.f32 %v2156_v11, %v2122_v3 }
 0xeee   :  { %6760 = vmatmul.mubr.f32.vlgmr.msra.gmra.mxu1 %v2159_v12 }
 0xeef   :  { %6762 = vmatprep.mubr.msk.f32.mxu1 %vm7703_vm1, %v7702_v6 }
 0xf5a   :  { %v2126_v13 = vpop.f32.mrf.mxu1 }
 0xf5b   :  { %v2127_v17 = vadd.f32 %v6185_v0, %v2126_v13  ;;  %v6190_v13 = vld [vmem:[#allocation7] ss:$0 sm:$0xff] }
 0xf5c   :  { %v6723_v19 = vpop.f32.mrf.mxu1 }
 0xf5d   :  { %v2136_v20 = vmul.f32 %v2127_v17, %v2127_v17  ;;  %v6191_v19 = vld [vmem:[#allocation5] ss:$0 sm:$0xff] }
 0xf5f   :  { %v2139_v21 = vmul.f32 %v2136_v20, %v2127_v17 }
 0xf61   :  { %v2142_v22 = vmul.f32 0.044715, %v2139_v21 }
 0xf62   :  { %v2131_v23 = vpop.f32.mrf.mxu1 }
 0xf63   :  { %v2145_v24 = vadd.f32 %v2142_v22, %v2127_v17  ;;  %v2132_v25 = vadd.f32 %v6185_v0, %v2131_v23 }
 0xf64   :  { %v6726_v26 = vpop.f32.mrf.mxu1 }
 0xf65   :  { %v2148_v27 = vmul.f32 0.7978846, %v2145_v24  ;;  %v2137_v28 = vmul.f32 %v2132_v25, %v2132_v25 }
 0xf67   :  { %7237 = vtanh.f32 %v2148_v27  ;;  %v2140_v29 = vmul.f32 %v2137_v28, %v2132_v25 }
 0xf69   :  { %v2143_v30 = vmul.f32 0.044715, %v2140_v29 }
 0xf6b   :  { %v2146_v32 = vadd.f32 %v2143_v30, %v2132_v25 }
 0xf6d   :  { %v2149_v33 = vmul.f32 0.7978846, %v2146_v32 }
 0xf6f   :  { %7239 = vtanh.f32 %v2149_v33 }
 0xf74   :  { %v7238_v34 = vpop.eup %7237 }
 0xf75   :  { %v2154_v36 = vadd.f32 1.0, %v7238_v34 }
 0xf77   :  { %v2157_v37 = vmul.f32 0.5, %v2154_v36 }
 0xf79   :  { %v2160_v38 = vmul.f32 %v2157_v37, %v2127_v17 }
 0xf7b   :  { %6763 = vmatmul.mubr.f32.gmra.mxu1 %v2160_v38  ;;  %v8371_v38 = vld [vmem:[#allocation13] ss:$0 sm:$0xff] }
 0xf7c   :  { %v7240_v18 = vpop.eup %7239  ;;  %6765 = vmatprep.mubr.msk.f32.mxu1 %vm7703_vm1, %v7702_v6 }
 0xf7d   :  { %v2155_v39 = vadd.f32 1.0, %v7240_v18 }
 0xf7f   :  { %v2158_v35 = vmul.f32 0.5, %v2155_v39 }
 0xf81   :  { %v2161_v40 = vmul.f32 %v2158_v35, %v2132_v25 }
 0xf83   :  { %6766 = vmatmul.mubr.f32.gmra.mxu1 %v2161_v40 }
 0xfae   :  { %v2251_v42 = vpop.f32.mrf.mxu1 }
 0xfaf   :  { %v2252_v44 = vadd.f32 %v6189_v41, %v2251_v42 }
 0xfb0   :  { %v6761_v46 = vpop.f32.mrf.mxu1 }
 0xfb1   :  { %v8337_v47 = vadd.f32 %v2252_v44, %v8218_v31 }
 0xfb3   :  { %v2268_v49 = vsel %vm653_vm4, %v8337_v47, 0.0 }
 0xfb4   :  { %2269 = vadd.xlane.f32.xlu0 %v2268_v49 }
0x103b   :  { %v2256_v50 = vpop.f32.mrf.mxu1 }
0x103c   :  { %v2257_v51 = vadd.f32 %v6189_v41, %v2256_v50 }
0x103d   :  { %v2270_v52 = vpop.xlane.xlu0 %2269  ;;  %v6764_v16 = vpop.f32.mrf.mxu1 }
0x103e   :  { %v8342_v53 = vadd.f32 %v2257_v51, %v8245_v2  ;;  %v2277_v54 = vmul.f32 0.03125, %v2270_v52 }
0x1040   :  { %v2280_v55 = vsub.f32 %v8337_v47, %v2277_v54  ;;  %v2271_v31 = vsel %vm653_vm4, %v8342_v53, 0.0 }
0x1041   :  { %2272 = vadd.xlane.f32.xlu1 %v2271_v31 }
0x1042   :  { %v2283_v56 = vmul.f32 %v2280_v55, %v2280_v55 }
0x1043   :  { %v2261_v57 = vpop.f32.mrf.mxu1 }
0x1044   :  { %v2262_v14 = vadd.f32 %v6189_v41, %v2261_v57  ;;  %v2286_v58 = vsel %vm653_vm4, %v2283_v56, 0.0 }
0x1045   :  { %2287 = vadd.xlane.f32.xlu0 %v2286_v58  ;;  %v6767_v59 = vpop.f32.mrf.mxu1 }
0x1046   :  { %v8349_v60 = vadd.f32 %v2262_v14, %v8252_v7 }
0x1048   :  { %v2274_v2 = vsel %vm660_vm5, %v8349_v60, 0.0 }
0x1049   :  { %2275 = vadd.xlane.f32.xlu0 %v2274_v2 }
0x10ca   :  { %v2273_v7 = vpop.xlane.xlu1 %2272 }
0x10cb   :  { %v2278_v0 = vmul.f32 0.03125, %v2273_v7 }
0x10cd   :  { %v2281_v1 = vsub.f32 %v8342_v53, %v2278_v0 }
0x10ce   :  { %v2288_v3 = vpop.xlane.xlu0 %2287 }
0x10cf   :  { %v2295_v4 = vmul.f32 0.03125, %v2288_v3  ;;  %v2284_v5 = vmul.f32 %v2281_v1, %v2281_v1 }
0x10d1   :  { %v2298_v48 = vadd.f32 1e-06, %v2295_v4  ;;  %v2289_v43 = vsel %vm653_vm4, %v2284_v5, 0.0 }
0x10d2   :  { %2290 = vadd.xlane.f32.xlu1 %v2289_v43  ;;  %v2276_v8 = vpop.xlane.xlu0 %2275 }
0x10d3   :  { %7241 = vrsqrt.f32 %v2298_v48  ;;  %v2279_v9 = vmul.f32 0.03125, %v2276_v8 }
0x10d5   :  { %v2282_v45 = vsub.f32 %v8349_v60, %v2279_v9 }
0x10d7   :  { %v2285_v10 = vmul.f32 %v2282_v45, %v2282_v45 }
0x10d9   :  { %v2292_v11 = vsel %vm660_vm5, %v2285_v10, 0.0 }
0x10da   :  { %2293 = vadd.xlane.f32.xlu1 %v2292_v11 }
0x10e0   :  { %v7242_v12 = vpop.eup %7241 }
0x10e1   :  { %v2304_v17 = vmul.f32 %v7242_v12, %v2280_v55 }
0x10e3   :  { %v2314_v20 = vmul.f32 %v6190_v13, %v2304_v17 }
0x10e5   :  { %v2324_v21 = vadd.f32 %v6191_v19, %v2314_v20 }
0x10e7   :  { %6777 = vmatmul.mubr.msk.f32.vlgmr.msra.gmra.mxu0 %vm653_vm4, %v2324_v21 }
0x10e8   :  { %6779 = vmatprep.mubr.msk.f32.mxu0 %vm7703_vm1, %v7702_v6 }
0x115b   :  { %v2291_v22 = vpop.xlane.xlu1 %2290 }
0x115c   :  { %v2296_v23 = vmul.f32 0.03125, %v2291_v22 }
0x115e   :  { %v2299_v24 = vadd.f32 1e-06, %v2296_v23  ;;  %v8424_v23 = vld [vmem:[%s9024_s29 + $0x18] sm:$0xff] }
0x1160   :  { %7243 = vrsqrt.f32 %v2299_v24 }
0x1163   :  { %v2294_v25 = vpop.xlane.xlu1 %2293 }
0x1164   :  { %v2297_v26 = vmul.f32 0.03125, %v2294_v25  ;;  %v8431_v25 = vld [vmem:[%s9024_s29 + $0x10] sm:$0xff] }
0x1166   :  { %v2300_v27 = vadd.f32 1e-06, %v2297_v26 }
0x1168   :  { %7245 = vrsqrt.f32 %v2300_v27 }
0x116d   :  { %v7244_v28 = vpop.eup %7243 }
0x116e   :  { %v2305_v29 = vmul.f32 %v7244_v28, %v2281_v1 }
0x1170   :  { %v2315_v30 = vmul.f32 %v6190_v13, %v2305_v29 }
0x1172   :  { %v2325_v32 = vadd.f32 %v6191_v19, %v2315_v30 }
0x1174   :  { %6780 = vmatmul.mubr.msk.f32.gmra.mxu0 %vm653_vm4, %v2325_v32 }
0x1175   :  { %v7246_v33 = vpop.eup %7245  ;;  %6782 = vmatprep.mubr.msk.f32.mxu0 %vm7703_vm1, %v7702_v6 }
0x1176   :  { %v2306_v34 = vmul.f32 %v7246_v33, %v2282_v45 }
0x1178   :  { %v2316_v36 = vmul.f32 %v6190_v13, %v2306_v34 }
0x117a   :  { %v2326_v37 = vadd.f32 %v6191_v19, %v2316_v36 }
0x117c   :  { %6783 = vmatmul.mubr.msk.f32.gmra.mxu0 %vm653_vm4, %v2326_v37 }
0x11a7   :  { %v2413_v18 = vpop.f32.mrf.mxu0 }
0x11a8   :  { %v8374_v39 = vadd.f32 %v8371_v38, %v2413_v18 }
0x11a9   :  { %v6778_v35 = vpop.f32.mrf.mxu0 }
0x11aa   :  { %2433 = vrot.lane.b32.xlu1 %v8374_v39, %s7704_s19  ;;  %6789 = vmatprep.mubr.msk.f32.mxu0 %vm371_vm0, %v8374_v39 }
0x121c   :  { %v2434_v50 = vpop.permute.xlu1 %2433 }
0x1234   :  { %v2418_v40 = vpop.f32.mrf.mxu0 }
0x1235   :  { %v8381_v41 = vadd.f32 %v8371_v38, %v2418_v40 }
0x1236   :  { %v6781_v42 = vpop.f32.mrf.mxu0 }
0x1237   :  { %2435 = vrot.lane.b32.xlu0 %v8381_v41, %s7704_s19  ;;  %v2998_v27 = vrot.slane %v8381_v41, 1 }
0x123c   :  { %v8385_v44 = vpop.f32.mrf.mxu0 }
0x123d   :  { %v2424_v24 = vadd.f32 %v8371_v38, %v8385_v44 }
0x123e   :  { %v6784_v46 = vpop.f32.mrf.mxu0 }
0x123f   :  { %v8437_v26 = vrot.slane %v2424_v24, 1 }
0x1241   :  { %v8444_v28 = vsel %vm479_vm2, %v2998_v27, %v8437_v26 }
0x12a9   :  { %v2436_v49 = vpop.permute.xlu0 %2435 }
0x12aa   :  { %6785 = vmatprep.subr.msk.mxu0 %vm371_vm0, %v2436_v49 }
0x12ab   :  { %6786 = vmatpush3.xpose.msk.msra.mxu0 %vm371_vm0, %v2436_v49  ;;  %v8456_v49 = vld [vmem:[%s9024_s29 + $0x8] sm:$0xff] }
0x12ac   :  { %6787 = vmatprep.subr.msk.mxu0 %vm371_vm0, %v2434_v50 }
0x12af   :  { %6788 = vmatpush3.xpose.msk.msra.mxu0 %vm371_vm0, %v2434_v50 }
0x12b2   :  { %6790 = vmatmul.mubr.msk.f32.vlgmr.msra.gmra.mxu0 %vm371_vm0, %v8381_v41 }
0x1372   :  { %v6791_v51 = vpop.f32.mrf.mxu0 }
0x1373   :  { %v2521_v52 = vmul.f32 0.25, %v6791_v51 }
0x1374   :  { %v2511_v16 = vpop.f32.mrf.mxu0 }
0x1375   :  { %v2520_v54 = vmul.f32 0.25, %v2511_v16  ;;  %v2525_v55 = vsel %vm914_vm6, %v2521_v52, -inf  ;;  %v8461_v16 = vld [vmem:[%s9024_s29] sm:$0xff] }
0x1376   :  { %2526 = vmax.xlane.f32.xlu0 %v2525_v55 }
0x1377   :  { %v2522_v31 = vsel %vm910_vm7, %v2520_v54, -inf }
0x1378   :  { %2523 = vmax.xlane.f32.xlu1 %v2522_v31 }
0x13ff   :  { %v2527_v56 = vpop.xlane.xlu0 %2526 }
0x1400   :  { %v2529_v57 = vsub.f32 %v2521_v52, %v2527_v56 }
0x1401   :  { %v2524_v14 = vpop.xlane.xlu1 %2523 }
0x1402   :  { %v2532_v58 = vmul.f32 1.442695, %v2529_v57  ;;  %v2528_v59 = vsub.f32 %v2520_v54, %v2524_v14 }
0x1404   :  { %7247 = vpow2.f32 %v2532_v58  ;;  %v2530_v2 = vmul.f32 1.442695, %v2528_v59 }
0x1406   :  { %7249 = vpow2.f32 %v2530_v2 }
0x1411   :  { %v7248_v15 = vpop.eup %7247 }
0x1412   :  { %v2537_v61 = vsel %vm914_vm6, %v7248_v15, 0.0 }
0x1413   :  { %v7250_v62 = vpop.eup %7249  ;;  %2538 = vadd.xlane.f32.xlu1 %v2537_v61 }
0x1414   :  { %v2534_v63 = vsel %vm910_vm7, %v7250_v62, 0.0 }
0x1415   :  { %2535 = vadd.xlane.f32.xlu0 %v2534_v63 }
0x1424   :  { %2544 = vrot.lane.b32.xlu1 %v8374_v39, %s7707_s1 }
0x1428   :  { %2638 = vrot.lane.b32.xlu1 %v8381_v41, %s7705_s24 }
0x142b   :  { %2546 = vrot.lane.b32.xlu0 %v8381_v41, %s7707_s1 }
0x142c   :  { %2636 = vrot.lane.b32.xlu1 %v8374_v39, %s7705_s24 }
0x142f   :  { %2632 = vrot.lane.b32.xlu0 %v8374_v39, %s7706_s26 }
0x1430   :  { %2634 = vrot.lane.b32.xlu1 %v8381_v41, %s7706_s26 }
0x149c   :  { %v2539_v7 = vpop.xlane.xlu1 %2538 }
0x149d   :  { %7251 = vrcp.f32 %v2539_v7 }
0x149e   :  { %v2536_v0 = vpop.xlane.xlu0 %2535 }
0x149f   :  { %7253 = vrcp.f32 %v2536_v0 }
0x14a0   :  { %v2545_v1 = vpop.permute.xlu1 %2544 }
0x14a2   :  { %v2547_v3 = vpop.permute.xlu0 %2546 }
0x14a3   :  { %6792 = vmatprep.subr.msk.mxu0 %vm565_vm3, %v2547_v3 }
0x14a4   :  { %6793 = vmatpush3.msk.msra.mxu0 %vm565_vm3, %v2547_v3  ;;  %v2639_v4 = vpop.permute.xlu1 %2638 }
0x14a5   :  { %6794 = vmatprep.subr.mxu0 %v2545_v1 }
0x14a6   :  { %6795 = vmatpush3.msra.mxu0 %v2545_v1  ;;  %v2633_v9 = vpop.permute.xlu0 %2632 }
0x14a7   :  { %6799 = vmatprep.subr.msk.mxu0 %vm371_vm0, %v2639_v4 }
0x14a8   :  { %v2637_v45 = vpop.permute.xlu1 %2636 }
0x14aa   :  { %v7252_v5 = vpop.eup %7251 }
0x14ab   :  { %v2543_v8 = vmul.f32 %v7252_v5, %v7248_v15 }
0x14ac   :  { %v7254_v48 = vpop.eup %7253  ;;  %v2635_v10 = vpop.permute.xlu1 %2634 }
0x14ad   :  { %v2542_v43 = vmul.f32 %v7254_v48, %v7250_v62 }
0x14af   :  { %6796 = vmatprep.mubr.msk.f32.mxu0 %vm910_vm7, %v2542_v43 }
0x14b0   :  { %6797 = vmatmul.mubr.msk.f32.vlgmr.msra.gmra.mxu0 %vm910_vm7, %v2543_v8 }
0x14b1   :  { %6800 = vmatpush3.xpose.msk.msra.mxu0 %vm371_vm0, %v2639_v4  ;;  %6803 = vmatprep.mubr.msk.f32.mxu0 %vm371_vm0, %v2633_v9 }
0x14b2   :  { %6801 = vmatprep.subr.msk.mxu0 %vm371_vm0, %v2637_v45 }
0x14b5   :  { %6802 = vmatpush3.xpose.msk.msra.mxu0 %vm371_vm0, %v2637_v45 }
0x14b6   :  { %6813 = vmatprep.subr.mxu0 %v8424_v23 }
0x14b8   :  { %6804 = vmatmul.mubr.msk.f32.vlgmr.msra.gmra.mxu0 %vm371_vm0, %v2635_v10 }
0x14b9   :  { %6814 = vmatpush3.msra.mxu0 %v8424_v23 }
0x14ba   :  { %6815 = vmatprep.subr.mxu0 %v8431_v25 }
0x14bb   :  { %6816 = vmatpush3.msra.mxu0 %v8431_v25 }
0x1570   :  { %v8419_v11 = vpop.f32.mrf.mxu0 }
0x1572   :  { %v2623_v12 = vpop.f32.mrf.mxu0 }
0x1578   :  { %v6805_v13 = vpop.f32.mrf.mxu0 }
0x1579   :  { %v2724_v17 = vmul.f32 0.25, %v6805_v13 }
0x157a   :  { %v2714_v19 = vpop.f32.mrf.mxu0 }
0x157b   :  { %v2723_v20 = vmul.f32 0.25, %v2714_v19  ;;  %v2728_v21 = vsel %vm914_vm6, %v2724_v17, -inf }
0x157c   :  { %2729 = vmax.xlane.f32.xlu1 %v2728_v21 }
0x157d   :  { %v2725_v22 = vsel %vm910_vm7, %v2723_v20, -inf }
0x157e   :  { %2726 = vmax.xlane.f32.xlu0 %v2725_v22 }
0x158d   :  { %2747 = vrot.lane.b32.xlu1 %v8374_v39, %s7708_s2 }
0x1591   :  { %3003 = vrot.lane.b32.xlu1 %v8437_v26, %s7704_s19 }
0x1595   :  { %3001 = vrot.lane.b32.xlu1 %v8444_v28, %s7704_s19 }
0x1605   :  { %v2730_v29 = vpop.xlane.xlu1 %2729 }
0x1606   :  { %v2732_v30 = vsub.f32 %v2724_v17, %v2730_v29 }
0x1607   :  { %v2727_v32 = vpop.xlane.xlu0 %2726 }
0x1608   :  { %v2735_v33 = vmul.f32 1.442695, %v2732_v30  ;;  %v2731_v34 = vsub.f32 %v2723_v20, %v2727_v32 }
0x1609   :  { %v2748_v36 = vpop.permute.xlu1 %2747 }
0x160a   :  { %7255 = vpow2.f32 %v2735_v33  ;;  %v2733_v37 = vmul.f32 1.442695, %v2731_v34 }
0x160c   :  { %7257 = vpow2.f32 %v2733_v37 }
0x160d   :  { %v3004_v38 = vpop.permute.xlu1 %3003 }
0x160e   :  { %6827 = vmatprep.subr.msk.mxu0 %vm371_vm0, %v3004_v38 }
0x1611   :  { %v3002_v31 = vpop.permute.xlu1 %3001 }
0x1617   :  { %v7256_v18 = vpop.eup %7255 }
0x1618   :  { %v2740_v39 = vsel %vm914_vm6, %v7256_v18, 0.0 }
0x1619   :  { %v7258_v35 = vpop.eup %7257  ;;  %2741 = vadd.xlane.f32.xlu0 %v2740_v39 }
0x161a   :  { %v2737_v40 = vsel %vm910_vm7, %v7258_v35, 0.0 }
0x161d   :  { %2738 = vadd.xlane.f32.xlu0 %v2737_v40 }
0x1633   :  { %2749 = vrot.lane.b32.xlu0 %v8381_v41, %s7708_s2 }
0x16a2   :  { %v2742_v42 = vpop.xlane.xlu0 %2741 }
0x16a3   :  { %7259 = vrcp.f32 %v2742_v42 }
0x16a6   :  { %v2739_v44 = vpop.xlane.xlu0 %2738 }
0x16a7   :  { %7261 = vrcp.f32 %v2739_v44 }
0x16aa   :  { %v2750_v46 = vpop.permute.xlu0 %2749 }
0x16ab   :  { %6806 = vmatprep.subr.msk.mxu1 %vm565_vm3, %v2750_v46 }
0x16ac   :  { %6807 = vmatpush3.msk.msra.mxu1 %vm565_vm3, %v2750_v46 }
0x16ad   :  { %6808 = vmatprep.subr.mxu1 %v2748_v36 }
0x16ae   :  { %6809 = vmatpush3.msra.mxu1 %v2748_v36 }
0x16af   :  { %6820 = vmatprep.subr.mxu1 %v8456_v49 }
0x16b0   :  { %v7260_v50 = vpop.eup %7259 }
0x16b1   :  { %v2746_v41 = vmul.f32 %v7260_v50, %v7256_v18 }
0x16b4   :  { %v7262_v51 = vpop.eup %7261 }
0x16b5   :  { %v2745_v52 = vmul.f32 %v7262_v51, %v7258_v35  ;;  %v8526_v35 = vld [vmem:[#allocation11] ss:$0 sm:$0xff] }
0x16b7   :  { %6810 = vmatprep.mubr.msk.f32.mxu1 %vm910_vm7, %v2745_v52 }
0x16b8   :  { %6811 = vmatmul.mubr.msk.f32.vlgmr.msra.gmra.mxu1 %vm910_vm7, %v2746_v41 }
0x16b9   :  { %6821 = vmatpush3.msra.mxu1 %v8456_v49  ;;  %6824 = vmatprep.mubr.msk.f32.mxu1 %vm371_vm0, %v2623_v12 }
0x16ba   :  { %6822 = vmatprep.subr.mxu1 %v8461_v16 }
0x16bb   :  { %6823 = vmatpush3.msra.mxu1 %v8461_v16 }
0x16bc   :  { %6825 = vmatmul.mubr.msk.f32.vlgmr.msra.gmra.mxu1 %vm371_vm0, %v8419_v11 }
0x1778   :  { %v6812_v54 = vpop.f32.mrf.mxu1 }
0x177a   :  { %v2826_v55 = vpop.f32.mrf.mxu1 }
0x177b   :  { %6817 = vmatprep.mubr.msk.f32.mxu0 %vm371_vm0, %v2826_v55 }
0x177c   :  { %6818 = vmatmul.mubr.msk.f32.vlgmr.msra.gmra.mxu0 %vm371_vm0, %v6812_v54  ;;  %v8514_v24 = vpop.f32.mrf.mxu1 }
0x177d   :  { %6828 = vmatpush3.xpose.msk.msra.mxu0 %vm371_vm0, %v3004_v38  ;;  %6831 = vmatprep.mubr.msk.f32.mxu0 %vm371_vm0, %v8444_v28 }
0x177e   :  { %6829 = vmatprep.subr.msk.mxu0 %vm371_vm0, %v3002_v31  ;;  %v2988_v27 = vpop.f32.mrf.mxu1 }
0x1781   :  { %6830 = vmatpush3.xpose.msk.msra.mxu0 %vm371_vm0, %v3002_v31 }
0x1784   :  { %6832 = vmatmul.mubr.msk.f32.vlgmr.msra.gmra.mxu0 %vm371_vm0, %v8437_v26 }
0x183c   :  { %v8479_v56 = vpop.f32.mrf.mxu0 }
0x183e   :  { %v8481_v57 = vpop.f32.mrf.mxu0 }
0x183f   :  { %v2989_v18 = vadd.f32 %v2988_v27, %v8481_v57  ;;  %v3780_v27 = vld [vmem:[%s9026_s6 + $0x40] sm:$0xff] }
0x1841   :  { %v3573_v39 = vadd.f32 %v2989_v18, %v8337_v47 }
0x1843   :  { %v8529_v40 = vadd.f32 %v8526_v35, %v3573_v39 }
0x1844   :  { %v6833_v14 = vpop.f32.mrf.mxu0 }
0x1845   :  { %v3089_v58 = vmul.f32 0.25, %v6833_v14  ;;  %v3586_v42 = vsel %vm653_vm4, %v8529_v40, 0.0 }
0x1846   :  { %v3079_v59 = vpop.f32.mrf.mxu0 }
0x1847   :  { %v3088_v2 = vmul.f32 0.25, %v3079_v59  ;;  %v3093_v15 = vsel %vm914_vm6, %v3089_v58, -inf }
0x1848   :  { %3094 = vmax.xlane.f32.xlu1 %v3093_v15 }
0x1849   :  { %v3090_v61 = vsel %vm910_vm7, %v3088_v2, -inf }
0x184a   :  { %3091 = vmax.xlane.f32.xlu0 %v3090_v61 }
0x1859   :  { %3112 = vrot.lane.b32.xlu1 %v8444_v28, %s7707_s1 }
0x185d   :  { %3206 = vrot.lane.b32.xlu1 %v8437_v26, %s7705_s24 }
0x1861   :  { %3204 = vrot.lane.b32.xlu1 %v8444_v28, %s7705_s24 }
0x1865   :  { %3202 = vrot.lane.b32.xlu1 %v8437_v26, %s7706_s26 }
0x18d1   :  { %v3095_v62 = vpop.xlane.xlu1 %3094 }
0x18d2   :  { %v3097_v63 = vsub.f32 %v3089_v58, %v3095_v62 }
0x18d3   :  { %v3092_v7 = vpop.xlane.xlu0 %3091 }
0x18d4   :  { %v3100_v0 = vmul.f32 1.442695, %v3097_v63  ;;  %v3096_v1 = vsub.f32 %v3088_v2, %v3092_v7 }
0x18d5   :  { %v3113_v45 = vpop.permute.xlu1 %3112 }
0x18d6   :  { %7263 = vpow2.f32 %v3100_v0  ;;  %v3098_v3 = vmul.f32 1.442695, %v3096_v1 }
0x18d8   :  { %7265 = vpow2.f32 %v3098_v3 }
0x18d9   :  { %v3207_v11 = vpop.permute.xlu1 %3206 }
0x18dd   :  { %v3205_v21 = vpop.permute.xlu1 %3204 }
0x18e1   :  { %v3203_v22 = vpop.permute.xlu1 %3202 }
0x18e3   :  { %v7264_v4 = vpop.eup %7263 }
0x18e4   :  { %v3105_v5 = vsel %vm914_vm6, %v7264_v4, 0.0 }
0x18e5   :  { %v7266_v48 = vpop.eup %7265  ;;  %3106 = vadd.xlane.f32.xlu0 %v3105_v5 }
0x18e6   :  { %v3102_v43 = vsel %vm910_vm7, %v7266_v48, 0.0 }
0x18e9   :  { %3103 = vadd.xlane.f32.xlu0 %v3102_v43  ;;  %v3648_v43 = vld [vmem:[%s9025_s16 + $0x18] sm:$0xff] }
0x18ff   :  { %3114 = vrot.lane.b32.xlu0 %v8437_v26, %s7707_s1 }
0x1903   :  { %3200 = vrot.lane.b32.xlu0 %v8444_v28, %s7706_s26 }
0x196e   :  { %v3107_v8 = vpop.xlane.xlu0 %3106 }
0x196f   :  { %7267 = vrcp.f32 %v3107_v8  ;;  %v3646_v8 = vld [vmem:[%s9025_s16 + $0x8] sm:$0xff] }
0x1972   :  { %v3104_v9 = vpop.xlane.xlu0 %3103 }
0x1973   :  { %7269 = vrcp.f32 %v3104_v9 }
0x1976   :  { %v3115_v10 = vpop.permute.xlu0 %3114 }
0x1977   :  { %6834 = vmatprep.subr.msk.mxu1 %vm565_vm3, %v3115_v10 }
0x1978   :  { %6835 = vmatpush3.msk.msra.mxu1 %vm565_vm3, %v3115_v10  ;;  %v3645_v10 = vld [vmem:[%s9025_s16] sm:$0xff] }
0x1979   :  { %6836 = vmatprep.subr.mxu1 %v3113_v45 }
0x197a   :  { %6837 = vmatpush3.msra.mxu1 %v3113_v45  ;;  %v3201_v20 = vpop.permute.xlu0 %3200  ;;  %v8559_v45 = vld [vmem:[#allocation8] ss:$0 sm:$0xff] }
0x197b   :  { %6841 = vmatprep.subr.msk.mxu1 %vm371_vm0, %v3207_v11 }
0x197c   :  { %v7268_v12 = vpop.eup %7267 }
0x197d   :  { %v3111_v19 = vmul.f32 %v7268_v12, %v7264_v4  ;;  %v3787_v12 = vld [vmem:[%s9026_s6 + $0x78] sm:$0xff] }
0x1980   :  { %v7270_v13 = vpop.eup %7269 }
0x1981   :  { %v3110_v17 = vmul.f32 %v7270_v13, %v7266_v48  ;;  %v3786_v13 = vld [vmem:[%s9026_s6 + $0x70] sm:$0xff] }
0x1983   :  { %6838 = vmatprep.mubr.msk.f32.mxu1 %vm910_vm7, %v3110_v17  ;;  %v3785_v17 = vld [vmem:[%s9026_s6 + $0x68] sm:$0xff] }
0x1984   :  { %6839 = vmatmul.mubr.msk.f32.vlgmr.msra.gmra.mxu1 %vm910_vm7, %v3111_v19  ;;  %v3784_v19 = vld [vmem:[%s9026_s6 + $0x60] sm:$0xff] }
0x1985   :  { %6842 = vmatpush3.xpose.msk.msra.mxu1 %vm371_vm0, %v3207_v11  ;;  %6845 = vmatprep.mubr.msk.f32.mxu1 %vm371_vm0, %v3201_v20  ;;  %v3783_v20 = vld [vmem:[%s9026_s6 + $0x58] sm:$0xff] }
0x1986   :  { %6843 = vmatprep.subr.msk.mxu1 %vm371_vm0, %v3205_v21 }
0x1989   :  { %6844 = vmatpush3.xpose.msk.msra.mxu1 %vm371_vm0, %v3205_v21  ;;  %v3782_v21 = vld [vmem:[%s9026_s6 + $0x50] sm:$0xff] }
0x198a   :  { %6862 = vmatprep.subr.mxu1 %v8456_v49 }
0x198c   :  { %6846 = vmatmul.mubr.msk.f32.vlgmr.msra.gmra.mxu1 %vm371_vm0, %v3203_v22  ;;  %v3781_v22 = vld [vmem:[%s9026_s6 + $0x48] sm:$0xff] }
0x198d   :  { %6863 = vmatpush3.msra.mxu1 %v8456_v49 }
0x198e   :  { %6864 = vmatprep.subr.mxu1 %v8461_v16 }
0x198f   :  { %6865 = vmatpush3.msra.mxu1 %v8461_v16 }
0x1990   :  { %6886 = vmatprep.subr.mxu1 %v7702_v6 }
0x1a44   :  { %v6840_v29 = vpop.f32.mrf.mxu1 }
0x1a46   :  { %v3191_v30 = vpop.f32.mrf.mxu1 }
0x1a47   :  { %6866 = vmatprep.mubr.msk.f32.mxu1 %vm371_vm0, %v3191_v30  ;;  %v3778_v30 = vld [vmem:[%s9026_s6 + $0x30] sm:$0xff] }
0x1a48   :  { %6867 = vmatmul.mubr.msk.f32.vlgmr.msra.gmra.mxu1 %vm371_vm0, %v6840_v29  ;;  %v3779_v29 = vld [vmem:[%s9026_s6 + $0x38] sm:$0xff] }
0x1a49   :  { %6918 = vmatprep.mubr.msk.f32.mxu1 %vm7703_vm1, %v7702_v6  ;;  %6887 = vmatpush3.msra.mxu1 %v3787_v12 }
0x1a4a   :  { %6888 = vmatprep.subr.mxu1 %v7702_v6 }
0x1a4b   :  { %6889 = vmatpush3.msra.mxu1 %v3786_v13 }
0x1a4c   :  { %v6847_v32 = vpop.f32.mrf.mxu1  ;;  %6890 = vmatprep.subr.mxu1 %v7702_v6 }
0x1a4d   :  { %v3292_v33 = vmul.f32 0.25, %v6847_v32  ;;  %6891 = vmatpush3.msra.mxu1 %v3785_v17  ;;  %v3777_v32 = vld [vmem:[%s9026_s6 + $0x28] sm:$0xff] }
0x1a4e   :  { %v3282_v34 = vpop.f32.mrf.mxu1  ;;  %6892 = vmatprep.subr.mxu1 %v7702_v6 }
0x1a4f   :  { %v3291_v36 = vmul.f32 0.25, %v3282_v34  ;;  %v3296_v37 = vsel %vm914_vm6, %v3292_v33, -inf  ;;  %6893 = vmatpush3.msra.mxu1 %v3784_v19  ;;  %v3775_v34 = vld [vmem:[%s9026_s6 + $0x18] sm:$0xff] }
0x1a50   :  { %3297 = vmax.xlane.f32.xlu1 %v3296_v37  ;;  %6894 = vmatprep.subr.mxu1 %v7702_v6  ;;  %v3773_v37 = vld [vmem:[%s9026_s6 + $0x8] sm:$0xff] }
0x1a51   :  { %v3293_v38 = vsel %vm910_vm7, %v3291_v36, -inf  ;;  %6895 = vmatpush3.msra.mxu1 %v3783_v20 }
0x1a52   :  { %3294 = vmax.xlane.f32.xlu0 %v3293_v38  ;;  %6896 = vmatprep.subr.mxu1 %v7702_v6  ;;  %v3772_v38 = vld [vmem:[%s9026_s6] sm:$0xff] }
0x1a53   :  { %6897 = vmatpush3.msra.mxu1 %v3782_v21 }
0x1a54   :  { %6898 = vmatprep.subr.mxu1 %v7702_v6 }
0x1a55   :  { %6899 = vmatpush3.msra.mxu1 %v3781_v22 }
0x1a56   :  { %6900 = vmatprep.subr.mxu1 %v7702_v6 }
0x1a57   :  { %6901 = vmatpush3.msra.mxu1 %v3780_v27 }
0x1a58   :  { %6902 = vmatprep.subr.mxu1 %v7702_v6 }
0x1a59   :  { %6903 = vmatpush3.msra.mxu1 %v3779_v29 }
0x1a5a   :  { %6904 = vmatprep.subr.mxu1 %v7702_v6 }
0x1a5b   :  { %6905 = vmatpush3.msra.mxu1 %v3778_v30 }
0x1a5c   :  { %6906 = vmatprep.subr.mxu1 %v7702_v6 }
0x1a5d   :  { %6907 = vmatpush3.msra.mxu1 %v3777_v32 }
0x1a5e   :  { %6908 = vmatprep.subr.mxu1 %v7702_v6 }
0x1a61   :  { %3315 = vrot.lane.b32.xlu1 %v8444_v28, %s7708_s2 }
0x1a85   :  { %3587 = vadd.xlane.f32.xlu1 %v3586_v42 }
0x1ad9   :  { %v3298_v44 = vpop.xlane.xlu1 %3297 }
0x1ada   :  { %v3300_v46 = vsub.f32 %v3292_v33, %v3298_v44  ;;  %v3776_v33 = vld [vmem:[%s9026_s6 + $0x20] sm:$0xff] }
0x1adb   :  { %v3295_v49 = vpop.xlane.xlu0 %3294  ;;  %6909 = vmatpush3.msra.mxu1 %v3776_v33 }
0x1adc   :  { %v3303_v50 = vmul.f32 1.442695, %v3300_v46  ;;  %v3299_v51 = vsub.f32 %v3291_v36, %v3295_v49  ;;  %6910 = vmatprep.subr.mxu1 %v7702_v6  ;;  %v3774_v36 = vld [vmem:[%s9026_s6 + $0x10] sm:$0xff] }
0x1add   :  { %v3316_v54 = vpop.permute.xlu1 %3315  ;;  %6911 = vmatpush3.msra.mxu1 %v3775_v34 }
0x1ade   :  { %7271 = vpow2.f32 %v3303_v50  ;;  %v3301_v28 = vmul.f32 1.442695, %v3299_v51  ;;  %6912 = vmatprep.subr.mxu1 %v7702_v6  ;;  %v2994_v50 = vadd.f32 %v8514_v24, %v8479_v56 }
0x1adf   :  { %6913 = vmatpush3.msra.mxu1 %v3774_v36 }
0x1ae0   :  { %7273 = vpow2.f32 %v3301_v28  ;;  %6914 = vmatprep.subr.mxu1 %v7702_v6 }
0x1ae1   :  { %6915 = vmatpush3.msra.mxu1 %v3773_v37 }
0x1ae2   :  { %6916 = vmatprep.subr.mxu1 %v7702_v6 }
0x1ae3   :  { %6917 = vmatpush3.msra.mxu1 %v3772_v38 }
0x1aeb   :  { %v7272_v52 = vpop.eup %7271 }
0x1aec   :  { %v3308_v47 = vsel %vm914_vm6, %v7272_v52, 0.0 }
0x1aed   :  { %v7274_v41 = vpop.eup %7273  ;;  %3309 = vadd.xlane.f32.xlu0 %v3308_v47 }
0x1aee   :  { %v3305_v16 = vsel %vm910_vm7, %v7274_v41, 0.0 }
0x1af1   :  { %3306 = vadd.xlane.f32.xlu0 %v3305_v16 }
0x1b07   :  { %3317 = vrot.lane.b32.xlu0 %v8437_v26, %s7708_s2 }
0x1b08   :  { %v6868_v18 = vpop.f32.mrf.mxu1 }
0x1b0a   :  { %v3556_v44 = vpop.f32.mrf.mxu1 }
0x1b0e   :  { %v3588_v55 = vpop.xlane.xlu1 %3587 }
0x1b0f   :  { %v3595_v31 = vmul.f32 0.03125, %v3588_v55 }
0x1b11   :  { %v3598_v57 = vsub.f32 %v8529_v40, %v3595_v31 }
0x1b13   :  { %v3601_v14 = vmul.f32 %v3598_v57, %v3598_v57 }
0x1b15   :  { %v3604_v58 = vsel %vm653_vm4, %v3601_v14, 0.0 }
0x1b16   :  { %3605 = vadd.xlane.f32.xlu1 %v3604_v58 }
0x1b76   :  { %v3310_v59 = vpop.xlane.xlu0 %3309 }
0x1b77   :  { %7275 = vrcp.f32 %v3310_v59 }
0x1b7a   :  { %v3307_v2 = vpop.xlane.xlu0 %3306 }
0x1b7b   :  { %7277 = vrcp.f32 %v3307_v2 }
0x1b7e   :  { %v3318_v15 = vpop.permute.xlu0 %3317 }
0x1b7f   :  { %6848 = vmatprep.subr.msk.mxu0 %vm565_vm3, %v3318_v15 }
0x1b80   :  { %6849 = vmatpush3.msk.msra.mxu0 %vm565_vm3, %v3318_v15 }
0x1b81   :  { %6850 = vmatprep.subr.mxu0 %v3316_v54 }
0x1b82   :  { %6851 = vmatpush3.msra.mxu0 %v3316_v54 }
0x1b83   :  { %6855 = vmatprep.subr.mxu0 %v8424_v23 }
0x1b84   :  { %v7276_v26 = vpop.eup %7275 }
0x1b85   :  { %v3314_v63 = vmul.f32 %v7276_v26, %v7272_v52  ;;  %v8602_v52 = vld [vmem:[%s9027_s18] ss:$0 sm:$0xff] }
0x1b88   :  { %v7278_v61 = vpop.eup %7277 }
0x1b89   :  { %v3313_v62 = vmul.f32 %v7278_v61, %v7274_v41 }
0x1b8b   :  { %6852 = vmatprep.mubr.msk.f32.mxu0 %vm910_vm7, %v3313_v62 }
0x1b8c   :  { %6853 = vmatmul.mubr.msk.f32.vlgmr.msra.gmra.mxu0 %vm910_vm7, %v3314_v63 }
0x1b8d   :  { %6856 = vmatpush3.msra.mxu0 %v8424_v23  ;;  %v8550_v23 = vld [vmem:[#allocation10] ss:$0 sm:$0xff] }
0x1b8e   :  { %6857 = vmatprep.subr.mxu0 %v8431_v25 }
0x1b8f   :  { %6858 = vmatpush3.msra.mxu0 %v8431_v25  ;;  %v3647_v25 = vld [vmem:[%s9025_s16 + $0x10] sm:$0xff] }
0x1b90   :  { %6869 = vmatprep.subr.mxu0 %v7702_v6 }
0x1b9f   :  { %v3606_v7 = vpop.xlane.xlu1 %3605 }
0x1ba0   :  { %v3613_v0 = vmul.f32 0.03125, %v3606_v7 }
0x1ba2   :  { %v3616_v1 = vadd.f32 1e-06, %v3613_v0 }
0x1ba4   :  { %7279 = vrsqrt.f32 %v3616_v1 }
0x1bb1   :  { %v7280_v3 = vpop.eup %7279 }
0x1bb2   :  { %v3622_v5 = vmul.f32 %v7280_v3, %v3598_v57 }
0x1bb4   :  { %v3632_v9 = vmul.f32 %v8550_v23, %v3622_v5 }
0x1bb6   :  { %v3642_v11 = vadd.f32 %v8559_v45, %v3632_v9 }
0x1c4c   :  { %v6854_v4 = vpop.f32.mrf.mxu0 }
0x1c4e   :  { %v3394_v48 = vpop.f32.mrf.mxu0 }
0x1c4f   :  { %6859 = vmatprep.mubr.msk.f32.mxu0 %vm371_vm0, %v3394_v48 }
0x1c50   :  { %6860 = vmatmul.mubr.msk.f32.vlgmr.msra.gmra.mxu0 %vm371_vm0, %v6854_v4 }
0x1c51   :  { %6870 = vmatpush3.msra.mxu0 %v3648_v43  ;;  %6877 = vmatprep.mubr.msk.f32.mxu0 %vm7703_vm1, %v7702_v6 }
0x1c52   :  { %6871 = vmatprep.subr.mxu0 %v7702_v6 }
0x1c53   :  { %6872 = vmatpush3.msra.mxu0 %v3647_v25 }
0x1c54   :  { %6873 = vmatprep.subr.mxu0 %v7702_v6 }
0x1c55   :  { %6874 = vmatpush3.msra.mxu0 %v3646_v8  ;;  %v8625_v8 = vld [vmem:[#allocation2] ss:$0 sm:$0xff] }
0x1c56   :  { %6875 = vmatprep.subr.mxu0 %v7702_v6 }
0x1c57   :  { %6876 = vmatpush3.msra.mxu0 %v3645_v10 }
0x1c58   :  { %6878 = vmatmul.mubr.msk.f32.vlgmr.msra.gmra.mxu0 %vm653_vm4, %v3642_v11 }
0x1c59   :  { %6880 = vmatprep.mubr.msk.f32.mxu0 %vm7703_vm1, %v7702_v6 }
0x1d10   :  { %v6861_v39 = vpop.f32.mrf.mxu0 }
0x1d11   :  { %v3562_v42 = vadd.f32 %v6868_v18, %v6861_v39 }
0x1d12   :  { %v3475_v46 = vpop.f32.mrf.mxu0 }
0x1d13   :  { %v3557_v49 = vadd.f32 %v3556_v44, %v3475_v46  ;;  %v3568_v51 = vrot.slane %v3562_v42, 7 }
0x1d15   :  { %v3567_v28 = vrot.slane %v3557_v49, 7 }
0x1d17   :  { %v3569_v47 = vsel %vm565_vm3, %v3567_v28, %v3568_v51  ;;  %v3572_v41 = vsel %vm565_vm3, %v2994_v50, %v3567_v28 }
0x1d18   :  { %v3574_v16 = vadd.f32 %v3572_v41, %v8342_v53  ;;  %v3575_v54 = vadd.f32 %v3569_v47, %v8349_v60  ;;  %v3731_v55 = vpop.f32.mrf.mxu0 }
0x1d19   :  { %v3732_v31 = vadd.f32 %v8602_v52, %v3731_v55 }
0x1d1a   :  { %v6879_v57 = vpop.f32.mrf.mxu0  ;;  %v8610_v14 = vadd.f32 %v8526_v35, %v3574_v16  ;;  %v8615_v58 = vadd.f32 %v8526_v35, %v3575_v54 }
0x1d1b   :  { %v3745_v56 = vmul.f32 %v3732_v31, %v3732_v31 }
0x1d1c   :  { %v3589_v24 = vsel %vm653_vm4, %v8610_v14, 0.0  ;;  %v3592_v53 = vsel %vm660_vm5, %v8615_v58, 0.0 }
0x1d1d   :  { %v3748_v59 = vmul.f32 %v3745_v56, %v3732_v31  ;;  %3590 = vadd.xlane.f32.xlu0 %v3589_v24 }
0x1d1f   :  { %v3751_v2 = vmul.f32 0.044715, %v3748_v59 }
0x1d21   :  { %v3754_v60 = vadd.f32 %v3751_v2, %v3732_v31  ;;  %3593 = vadd.xlane.f32.xlu0 %v3592_v53 }
0x1d23   :  { %v3757_v15 = vmul.f32 0.7978846, %v3754_v60 }
0x1d25   :  { %7281 = vtanh.f32 %v3757_v15 }
0x1d32   :  { %v7282_v26 = vpop.eup %7281 }
0x1d33   :  { %v3763_v61 = vadd.f32 1.0, %v7282_v26 }
0x1d35   :  { %v3766_v62 = vmul.f32 0.5, %v3763_v61 }
0x1d37   :  { %v3769_v63 = vmul.f32 %v3766_v62, %v3732_v31 }
0x1d39   :  { %6919 = vmatmul.mubr.f32.vlgmr.msra.gmra.mxu1 %v3769_v63 }
0x1d3a   :  { %6921 = vmatprep.mubr.msk.f32.mxu1 %vm7703_vm1, %v7702_v6 }
0x1da6   :  { %v3591_v35 = vpop.xlane.xlu0 %3590 }
0x1da7   :  { %v3596_v7 = vmul.f32 0.03125, %v3591_v35 }
0x1da9   :  { %v3599_v0 = vsub.f32 %v8610_v14, %v3596_v7 }
0x1daa   :  { %v3594_v1 = vpop.xlane.xlu0 %3593 }
0x1dab   :  { %v3597_v3 = vmul.f32 0.03125, %v3594_v1  ;;  %v3602_v4 = vmul.f32 %v3599_v0, %v3599_v0 }
0x1dad   :  { %v3600_v5 = vsub.f32 %v8615_v58, %v3597_v3  ;;  %v3607_v48 = vsel %vm653_vm4, %v3602_v4, 0.0 }
0x1dae   :  { %3608 = vadd.xlane.f32.xlu0 %v3607_v48 }
0x1daf   :  { %v3603_v43 = vmul.f32 %v3600_v5, %v3600_v5 }
0x1db1   :  { %v3610_v25 = vsel %vm660_vm5, %v3603_v43, 0.0 }
0x1db2   :  { %3611 = vadd.xlane.f32.xlu1 %v3610_v25 }
0x1df9   :  { %v3861_v9 = vpop.f32.mrf.mxu1 }
0x1dfa   :  { %v3862_v10 = vadd.f32 %v8625_v8, %v3861_v9 }
0x1dfb   :  { %v6920_v11 = vpop.f32.mrf.mxu1 }
0x1dfc   :  { %v3875_v12 = vadd.f32 %v3862_v10, %v8529_v40 }
0x1dfe   :  { %v3878_v13 = vsel %vm653_vm4, %v3875_v12, 0.0 }
0x1dff   :  { %3879 = vadd.xlane.f32.xlu0 %v3878_v13  ;;  %v3954_v13 = vld [vmem:[%s9028_s0 + $0x18] sm:$0xff] }
0x1e00   :  { %6927 = vmatprep.subr.mxu0 %v3954_v13 }
0x1e01   :  { %6928 = vmatpush3.msra.mxu0 %v3954_v13 }
0x1e37   :  { %v3609_v17 = vpop.xlane.xlu0 %3608 }
0x1e38   :  { %v3614_v19 = vmul.f32 0.03125, %v3609_v17  ;;  %v3953_v17 = vld [vmem:[%s9028_s0 + $0x10] sm:$0xff] }
0x1e39   :  { %6929 = vmatprep.subr.mxu0 %v3953_v17 }
0x1e3a   :  { %v3617_v20 = vadd.f32 1e-06, %v3614_v19  ;;  %v3952_v19 = vld [vmem:[%s9028_s0 + $0x8] sm:$0xff]  ;;  %6930 = vmatpush3.msra.mxu0 %v3953_v17 }
0x1e3b   :  { %v3612_v21 = vpop.xlane.xlu1 %3611  ;;  %6931 = vmatprep.subr.mxu0 %v3952_v19 }
0x1e3c   :  { %7283 = vrsqrt.f32 %v3617_v20  ;;  %v3615_v22 = vmul.f32 0.03125, %v3612_v21  ;;  %v3951_v20 = vld [vmem:[%s9028_s0] sm:$0xff]  ;;  %6932 = vmatpush3.msra.mxu0 %v3952_v19 }
0x1e3d   :  { %6933 = vmatprep.subr.mxu0 %v3951_v20 }
0x1e3e   :  { %v3618_v27 = vadd.f32 1e-06, %v3615_v22  ;;  %6934 = vmatpush3.msra.mxu0 %v3951_v20 }
0x1e40   :  { %7285 = vrsqrt.f32 %v3618_v27 }
0x1e49   :  { %v7284_v29 = vpop.eup %7283 }
0x1e4a   :  { %v3623_v30 = vmul.f32 %v7284_v29, %v3599_v0 }
0x1e4c   :  { %v3633_v32 = vmul.f32 %v8550_v23, %v3623_v30 }
0x1e4d   :  { %v7286_v33 = vpop.eup %7285 }
0x1e4e   :  { %v3643_v34 = vadd.f32 %v8559_v45, %v3633_v32  ;;  %v3624_v36 = vmul.f32 %v7286_v33, %v3600_v5 }
0x1e50   :  { %6881 = vmatmul.mubr.msk.f32.gmra.mxu0 %vm653_vm4, %v3643_v34  ;;  %v3634_v40 = vmul.f32 %v8550_v23, %v3624_v36 }
0x1e51   :  { %6883 = vmatprep.mubr.msk.f32.mxu0 %vm7703_vm1, %v7702_v6 }
0x1e52   :  { %v3644_v37 = vadd.f32 %v8559_v45, %v3634_v40 }
0x1e54   :  { %6884 = vmatmul.mubr.msk.f32.gmra.mxu0 %vm653_vm4, %v3644_v37 }
0x1e88   :  { %v3880_v53 = vpop.xlane.xlu0 %3879 }
0x1e89   :  { %v3887_v60 = vmul.f32 0.03125, %v3880_v53  ;;  %v3938_v53 = vld [vmem:[%s7980_s25 + $0x8] sm:$0xff] }
0x1e8b   :  { %v3890_v26 = vsub.f32 %v3875_v12, %v3887_v60  ;;  %v3939_v60 = vld [vmem:[%s7980_s25 + $0x10] sm:$0xff] }
0x1e8d   :  { %v3893_v1 = vmul.f32 %v3890_v26, %v3890_v26 }
0x1e8f   :  { %v3896_v4 = vsel %vm653_vm4, %v3893_v1, 0.0 }
0x1f10   :  { %v3736_v38 = vpop.f32.mrf.mxu0 }
0x1f11   :  { %v3737_v18 = vadd.f32 %v8602_v52, %v3736_v38  ;;  %v6240_v38 = vld [vmem:[#allocation16] ss:$0 sm:$0xff] }
0x1f12   :  { %v6882_v39 = vpop.f32.mrf.mxu0 }
0x1f13   :  { %v3746_v42 = vmul.f32 %v3737_v18, %v3737_v18 }
0x1f14   :  { %v3741_v44 = vpop.f32.mrf.mxu0 }
0x1f15   :  { %v3749_v46 = vmul.f32 %v3746_v42, %v3737_v18  ;;  %v3742_v49 = vadd.f32 %v8602_v52, %v3741_v44  ;;  %v6241_v42 = vld [vmem:[#allocation14] ss:$0 sm:$0xff] }
0x1f16   :  { %v6885_v50 = vpop.f32.mrf.mxu0 }
0x1f17   :  { %v3752_v51 = vmul.f32 0.044715, %v3749_v46  ;;  %v3747_v28 = vmul.f32 %v3742_v49, %v3742_v49 }
0x1f19   :  { %v3755_v23 = vadd.f32 %v3752_v51, %v3737_v18  ;;  %v3750_v47 = vmul.f32 %v3747_v28, %v3742_v49 }
0x1f1b   :  { %v3758_v41 = vmul.f32 0.7978846, %v3755_v23  ;;  %v3753_v16 = vmul.f32 0.044715, %v3750_v47 }
0x1f1d   :  { %7287 = vtanh.f32 %v3758_v41  ;;  %v3756_v45 = vadd.f32 %v3753_v16, %v3742_v49 }
0x1f1f   :  { %v3759_v54 = vmul.f32 0.7978846, %v3756_v45 }
0x1f21   :  { %7289 = vtanh.f32 %v3759_v54 }
0x1f2a   :  { %v7288_v55 = vpop.eup %7287 }
0x1f2b   :  { %v3764_v31 = vadd.f32 1.0, %v7288_v55 }
0x1f2d   :  { %v3767_v57 = vmul.f32 0.5, %v3764_v31 }
0x1f2e   :  { %v7290_v56 = vpop.eup %7289 }
0x1f2f   :  { %v3770_v24 = vmul.f32 %v3767_v57, %v3737_v18  ;;  %v3765_v59 = vadd.f32 1.0, %v7290_v56  ;;  %v6245_v57 = vld [vmem:[#allocation19] ss:$0 sm:$0xff]  ;;  %v3937_v56 = vld [vmem:[%s7980_s25] sm:$0xff] }
0x1f30   :  { %6938 = vmatprep.subr.mxu0 %v6245_v57 }
0x1f31   :  { %6922 = vmatmul.mubr.f32.gmra.mxu1 %v3770_v24  ;;  %v3768_v2 = vmul.f32 0.5, %v3765_v59  ;;  %v6242_v59 = vld [vmem:[%s9029_s27] ss:$0 sm:$0xff] }
0x1f32   :  { %6924 = vmatprep.mubr.msk.f32.mxu1 %vm7703_vm1, %v7702_v6 }
0x1f33   :  { %v3771_v52 = vmul.f32 %v3768_v2, %v3742_v49 }
0x1f35   :  { %6925 = vmatmul.mubr.f32.gmra.mxu1 %v3771_v52 }
0x1ff1   :  { %v3866_v15 = vpop.f32.mrf.mxu1 }
0x1ff2   :  { %v3867_v61 = vadd.f32 %v8625_v8, %v3866_v15 }
0x1ff3   :  { %v6923_v62 = vpop.f32.mrf.mxu1 }
0x1ff4   :  { %v3876_v63 = vadd.f32 %v3867_v61, %v8610_v14  ;;  %v4049_v61 = vld [vmem:[%s9030_s22 + $0x8] sm:$0xff] }
0x1ff5   :  { %v3871_v35 = vpop.f32.mrf.mxu1 }
0x1ff6   :  { %v3872_v7 = vadd.f32 %v8625_v8, %v3871_v35  ;;  %v3881_v0 = vsel %vm653_vm4, %v3876_v63, 0.0 }
0x1ff7   :  { %3882 = vadd.xlane.f32.xlu1 %v3881_v0  ;;  %v6926_v3 = vpop.f32.mrf.mxu1 }
0x1ff8   :  { %v3877_v6 = vadd.f32 %v3872_v7, %v8615_v58 }
0x1ffa   :  { %v3884_v5 = vsel %vm660_vm5, %v3877_v6, 0.0 }
0x1ffb   :  { %3897 = vadd.xlane.f32.xlu1 %v3896_v4  ;;  %3885 = vadd.xlane.f32.xlu0 %v3884_v5 }
0x2080   :  { %v3883_v48 = vpop.xlane.xlu1 %3882 }
0x2081   :  { %v3888_v14 = vmul.f32 0.03125, %v3883_v48 }
0x2083   :  { %v3891_v43 = vsub.f32 %v3876_v63, %v3888_v14  ;;  %v4048_v63 = vld [vmem:[%s9030_s22] sm:$0xff] }
0x2084   :  { %v3886_v25 = vpop.xlane.xlu0 %3885  ;;  %v3898_v21 = vpop.xlane.xlu1 %3897 }
0x2085   :  { %v3889_v8 = vmul.f32 0.03125, %v3886_v25  ;;  %v3894_v9 = vmul.f32 %v3891_v43, %v3891_v43  ;;  %v3905_v22 = vmul.f32 0.03125, %v3898_v21 }
0x2087   :  { %v3892_v10 = vsub.f32 %v3877_v6, %v3889_v8  ;;  %v3899_v11 = vsel %vm653_vm4, %v3894_v9, 0.0  ;;  %v3908_v27 = vadd.f32 1e-06, %v3905_v22 }
0x2088   :  { %3900 = vadd.xlane.f32.xlu0 %v3899_v11 }
0x2089   :  { %v3895_v58 = vmul.f32 %v3892_v10, %v3892_v10  ;;  %7291 = vrsqrt.f32 %v3908_v27 }
0x208b   :  { %v3902_v12 = vsel %vm660_vm5, %v3895_v58, 0.0 }
0x208c   :  { %3903 = vadd.xlane.f32.xlu1 %v3902_v12 }
0x2096   :  { %v7292_v40 = vpop.eup %7291 }
0x2097   :  { %v3914_v37 = vmul.f32 %v7292_v40, %v3890_v26  ;;  %v3940_v26 = vld [vmem:[%s7980_s25 + $0x18] sm:$0xff]  ;;  %s9031_s25 = sld [smem:[#allocation43_spill]] }
0x2099   :  { %v3924_v18 = vmul.f32 %v6240_v38, %v3914_v37 }
0x209b   :  { %v3934_v49 = vadd.f32 %v6241_v42, %v3924_v18 }
0x209d   :  { %v3943_v47 = vrot.slane %v3934_v49, 1  ;;  %v4289_v20 = vld [vmem:[%s9031_s25 + $0x18] sm:$0xff]  ;;  %v4288_v21 = vld [vmem:[%s9031_s25 + $0x10] sm:$0xff]  ;;  %v4287_v22 = vld [vmem:[%s9031_s25 + $0x8] sm:$0xff] }
0x209e   :  { %v4286_v27 = vld [vmem:[%s9031_s25] sm:$0xff] }
0x2111   :  { %v3901_v29 = vpop.xlane.xlu0 %3900 }
0x2112   :  { %v3906_v30 = vmul.f32 0.03125, %v3901_v29 }
0x2114   :  { %v3909_v32 = vadd.f32 1e-06, %v3906_v30 }
0x2115   :  { %v3904_v33 = vpop.xlane.xlu1 %3903 }
0x2116   :  { %7293 = vrsqrt.f32 %v3909_v32  ;;  %v3907_v34 = vmul.f32 0.03125, %v3904_v33 }
0x2118   :  { %v3910_v36 = vadd.f32 1e-06, %v3907_v34 }
0x211a   :  { %7295 = vrsqrt.f32 %v3910_v36 }
0x2123   :  { %v7294_v39 = vpop.eup %7293 }
0x2124   :  { %v3915_v44 = vmul.f32 %v7294_v39, %v3891_v43 }
0x2126   :  { %v3925_v46 = vmul.f32 %v6240_v38, %v3915_v44 }
0x2127   :  { %v7296_v50 = vpop.eup %7295 }
0x2128   :  { %v3916_v51 = vmul.f32 %v7296_v50, %v3892_v10  ;;  %v3935_v28 = vadd.f32 %v6241_v42, %v3925_v46 }
0x212a   :  { %v3926_v23 = vmul.f32 %v6240_v38, %v3916_v51  ;;  %v3944_v41 = vrot.slane %v3935_v28, 1  ;;  %v3948_v54 = vrot.slane %v3935_v28, 2 }
0x212c   :  { %v3936_v16 = vadd.f32 %v6241_v42, %v3926_v23  ;;  %v3945_v45 = vsel %vm479_vm2, %v3943_v47, %v3944_v41  ;;  %v6250_v23 = vld [vmem:[%s9032_s13] ss:$0 sm:$0xff] }
0x212d   :  { %6935 = vmatprep.mubr.msk.f32.mxu0 %vm653_vm4, %v3945_v45 }
0x212e   :  { %v3949_v55 = vrot.slane %v3936_v16, 2 }
0x2130   :  { %v3950_v31 = vsel %vm3947_vm8, %v3948_v54, %v3949_v55  ;;  %v6251_v54 = vld [vmem:[%s9033_s9] ss:$0 sm:$0xff] }
0x2131   :  { %6936 = vmatmul.mubr.msk.f32.vlgmr.msra.gmra.mxu0 %vm653_vm4, %v3950_v31 }
0x2132   :  { %6939 = vmatpush3.msra.mxu0 %v6245_v57  ;;  %6942 = vmatprep.mubr.msk.f32.mxu0 %vm371_vm0, %v3937_v56 }
0x21f1   :  { %v6937_v24 = vpop.f32.mrf.mxu0 }
0x21f2   :  { %v4038_v15 = vadd.f32 %v6937_v24, %v6242_v59 }
0x21f3   :  { %v4032_v2 = vpop.f32.mrf.mxu0 }
0x21f4   :  { %v4033_v52 = vadd.f32 %v6242_v59, %v4032_v2 }
0x21f6   :  { %6940 = vmatprep.subr.mxu0 %v4033_v52 }
0x21f7   :  { %6941 = vmatpush3.msra.mxu0 %v4033_v52 }
0x21f8   :  { %6943 = vmatmul.mubr.msk.f32.vlgmr.msra.gmra.mxu0 %vm371_vm0, %v3938_v53  ;;  %6945 = vmatprep.subr.mxu0 %v6245_v57 }
0x21f9   :  { %6946 = vmatpush3.msra.mxu0 %v6245_v57  ;;  %6949 = vmatprep.mubr.msk.f32.mxu0 %vm371_vm0, %v3939_v60 }
0x21fa   :  { %6947 = vmatprep.subr.mxu0 %v4038_v15 }
0x21fb   :  { %6948 = vmatpush3.msra.mxu0 %v4038_v15 }
0x21fc   :  { %6950 = vmatmul.mubr.msk.f32.vlgmr.msra.gmra.mxu0 %vm371_vm0, %v3940_v26  ;;  %6952 = vmatprep.subr.mxu0 %v4289_v20 }
0x21fd   :  { %6953 = vmatpush3.msra.mxu0 %v4289_v20 }
0x21fe   :  { %6954 = vmatprep.subr.mxu0 %v4288_v21 }
0x21ff   :  { %6955 = vmatpush3.msra.mxu0 %v4288_v21 }
0x2200   :  { %6956 = vmatprep.subr.mxu0 %v4287_v22 }
0x2201   :  { %6957 = vmatpush3.msra.mxu0 %v4287_v22 }
0x2202   :  { %6958 = vmatprep.subr.mxu0 %v4286_v27 }
0x2203   :  { %6959 = vmatpush3.msra.mxu0 %v4286_v27 }
0x22b8   :  { %v6944_v62 = vpop.f32.mrf.mxu0 }
0x22b9   :  { %v8669_v35 = vadd.f32 %v6944_v62, %v4049_v61 }
0x22ba   :  { %v4122_v7 = vpop.f32.mrf.mxu0 }
0x22bb   :  { %v8671_v0 = vadd.f32 %v4122_v7, %v4048_v63  ;;  %v4215_v1 = vsel %vm653_vm4, %v8669_v35, 0.0 }
0x22bc   :  { %4216 = vadd.xlane.f32.xlu1 %v4215_v1  ;;  %v6951_v4 = vpop.f32.mrf.mxu0  ;;  %v8704_v1 = vld [vmem:[%s9034_s23] ss:$0 sm:$0xff] }
0x22bd   :  { %v4212_v3 = vsel %vm653_vm4, %v8671_v0, 0.0  ;;  %v8679_v10 = vadd.f32 %v6951_v4, %v4049_v61 }
0x22be   :  { %4213 = vadd.xlane.f32.xlu0 %v4212_v3  ;;  %v4203_v25 = vpop.f32.mrf.mxu0 }
0x22bf   :  { %v8682_v58 = vadd.f32 %v4203_v25, %v4048_v63  ;;  %v4221_v17 = vsel %vm653_vm4, %v8679_v10, 0.0 }
0x22c1   :  { %v4218_v19 = vsel %vm653_vm4, %v8682_v58, 0.0 }
0x2345   :  { %v4217_v6 = vpop.xlane.xlu1 %4216 }
0x2346   :  { %v4225_v5 = vmul.f32 0.03125, %v4217_v6 }
0x2347   :  { %v4214_v48 = vpop.xlane.xlu0 %4213 }
0x2348   :  { %v4229_v14 = vsub.f32 %v8669_v35, %v4225_v5  ;;  %v4224_v43 = vmul.f32 0.03125, %v4214_v48 }
0x234a   :  { %v4228_v8 = vsub.f32 %v8671_v0, %v4224_v43  ;;  %v4233_v9 = vmul.f32 %v4229_v14, %v4229_v14 }
0x234c   :  { %v4239_v11 = vsel %vm653_vm4, %v4233_v9, 0.0  ;;  %v4232_v12 = vmul.f32 %v4228_v8, %v4228_v8 }
0x234d   :  { %4240 = vadd.xlane.f32.xlu1 %v4239_v11 }
0x234e   :  { %v4236_v13 = vsel %vm653_vm4, %v4232_v12, 0.0 }
0x234f   :  { %4237 = vadd.xlane.f32.xlu0 %v4236_v13 }
0x2351   :  { %4222 = vadd.xlane.f32.xlu1 %v4221_v17 }
0x2353   :  { %4219 = vadd.xlane.f32.xlu0 %v4218_v19 }
0x23d6   :  { %v4241_v29 = vpop.xlane.xlu1 %4240 }
0x23d7   :  { %v4249_v30 = vmul.f32 0.03125, %v4241_v29 }
0x23d8   :  { %v4238_v32 = vpop.xlane.xlu0 %4237 }
0x23d9   :  { %v4253_v33 = vadd.f32 1e-06, %v4249_v30  ;;  %v4248_v34 = vmul.f32 0.03125, %v4238_v32 }
0x23da   :  { %v4223_v36 = vpop.xlane.xlu1 %4222 }
0x23db   :  { %7297 = vrsqrt.f32 %v4253_v33  ;;  %v4252_v40 = vadd.f32 1e-06, %v4248_v34  ;;  %v4227_v37 = vmul.f32 0.03125, %v4223_v36 }
0x23dc   :  { %v4220_v38 = vpop.xlane.xlu0 %4219 }
0x23dd   :  { %7299 = vrsqrt.f32 %v4252_v40  ;;  %v4231_v18 = vsub.f32 %v8679_v10, %v4227_v37  ;;  %v4226_v39 = vmul.f32 0.03125, %v4220_v38 }
0x23df   :  { %v4230_v42 = vsub.f32 %v8682_v58, %v4226_v39  ;;  %v4235_v44 = vmul.f32 %v4231_v18, %v4231_v18 }
0x23e1   :  { %v4245_v46 = vsel %vm653_vm4, %v4235_v44, 0.0  ;;  %v4234_v49 = vmul.f32 %v4230_v42, %v4230_v42 }
0x23e2   :  { %4246 = vadd.xlane.f32.xlu1 %v4245_v46 }
0x23e3   :  { %v4242_v50 = vsel %vm653_vm4, %v4234_v49, 0.0 }
0x23e4   :  { %4243 = vadd.xlane.f32.xlu0 %v4242_v50 }
0x23e8   :  { %v7298_v51 = vpop.eup %7297 }
0x23e9   :  { %v4261_v28 = vmul.f32 %v7298_v51, %v4229_v14 }
0x23ea   :  { %v7300_v47 = vpop.eup %7299 }
0x23eb   :  { %v4260_v41 = vmul.f32 %v7300_v47, %v4228_v8  ;;  %v4272_v16 = vmul.f32 %v6250_v23, %v4261_v28 }
0x23ed   :  { %v4271_v45 = vmul.f32 %v6250_v23, %v4260_v41  ;;  %v4283_v31 = vadd.f32 %v6251_v54, %v4272_v16 }
0x23ef   :  { %v4282_v55 = vadd.f32 %v6251_v54, %v4271_v45 }
0x23f1   :  { %6960 = vmatprep.mubr.msk.f32.mxu0 %vm653_vm4, %v4282_v55 }
0x23f2   :  { %6961 = vmatmul.mubr.msk.f32.vlgmr.msra.gmra.mxu0 %vm653_vm4, %v4283_v31 }
0x246b   :  { %v4247_v57 = vpop.xlane.xlu1 %4246 }
0x246c   :  { %v4251_v56 = vmul.f32 0.03125, %v4247_v57 }
0x246d   :  { %v4244_v24 = vpop.xlane.xlu0 %4243 }
0x246e   :  { %v4255_v59 = vadd.f32 1e-06, %v4251_v56  ;;  %v4250_v2 = vmul.f32 0.03125, %v4244_v24 }
0x2470   :  { %7301 = vrsqrt.f32 %v4255_v59  ;;  %v4254_v52 = vadd.f32 1e-06, %v4250_v2 }
0x2472   :  { %7303 = vrsqrt.f32 %v4254_v52 }
0x247d   :  { %v7302_v53 = vpop.eup %7301 }
0x247e   :  { %v4263_v60 = vmul.f32 %v7302_v53, %v4231_v18 }
0x247f   :  { %v7304_v15 = vpop.eup %7303 }
0x2480   :  { %v4262_v26 = vmul.f32 %v7304_v15, %v4230_v42  ;;  %v4274_v61 = vmul.f32 %v6250_v23, %v4263_v60 }
0x2482   :  { %v4273_v62 = vmul.f32 %v6250_v23, %v4262_v26  ;;  %v4285_v7 = vadd.f32 %v6251_v54, %v4274_v61 }
0x2484   :  { %v4284_v63 = vadd.f32 %v6251_v54, %v4273_v62 }
0x2486   :  { %6963 = vmatprep.mubr.msk.f32.mxu0 %vm653_vm4, %v4284_v63 }
0x2487   :  { %6964 = vmatmul.mubr.msk.f32.gmra.mxu0 %vm653_vm4, %v4285_v7 }
0x24b2   :  { %v6962_v3 = vpop.f32.mrf.mxu0 }
0x24b3   :  { %v8707_v6 = vadd.f32 %v6962_v3, %v8704_v1  ;;  %v8767_v3 = vld [vmem:[%s9035_s17 + $0x18] sm:$0xff] }
0x24b4   :  { %v4375_v4 = vpop.f32.mrf.mxu0 }
0x24b5   :  { %v8710_v5 = vadd.f32 %v8704_v1, %v4375_v4  ;;  %4402 = vrot.lane.b32.xlu0 %v8707_v6, %s7704_s19 }
0x24b7   :  { %4400 = vrot.lane.b32.xlu1 %v8710_v5, %s7704_s19  ;;  %6970 = vmatprep.mubr.msk.f32.mxu0 %vm371_vm0, %v8710_v5 }
0x24b9   :  { %4598 = vrot.lane.b32.xlu0 %v8710_v5, %s7706_s26 }
0x24bb   :  { %4604 = vrot.lane.b32.xlu1 %v8707_v6, %s7705_s24 }
0x24bf   :  { %4602 = vrot.lane.b32.xlu1 %v8710_v5, %s7705_s24 }
0x24c3   :  { %4600 = vrot.lane.b32.xlu1 %v8707_v6, %s7706_s26 }
0x2527   :  { %v4403_v48 = vpop.permute.xlu0 %4402 }
0x2528   :  { %6966 = vmatprep.subr.msk.mxu0 %vm371_vm0, %v4403_v48 }
0x2529   :  { %v4401_v14 = vpop.permute.xlu1 %4400  ;;  %6967 = vmatpush3.xpose.msk.msra.mxu0 %vm371_vm0, %v4403_v48 }
0x252a   :  { %6968 = vmatprep.subr.msk.mxu0 %vm371_vm0, %v4401_v14 }
0x252b   :  { %v4599_v25 = vpop.permute.xlu0 %4598 }
0x252d   :  { %v4605_v43 = vpop.permute.xlu1 %4604  ;;  %6969 = vmatpush3.xpose.msk.msra.mxu0 %vm371_vm0, %v4401_v14  ;;  %v8780_v14 = vld [vmem:[%s9035_s17 + $0x8] sm:$0xff] }
0x252e   :  { %6980 = vmatprep.subr.msk.mxu0 %vm371_vm0, %v4605_v43 }
0x2530   :  { %6971 = vmatmul.mubr.msk.f32.vlgmr.msra.gmra.mxu0 %vm371_vm0, %v8707_v6 }
0x2531   :  { %v4603_v8 = vpop.permute.xlu1 %4602  ;;  %6981 = vmatpush3.xpose.msk.msra.mxu0 %vm371_vm0, %v4605_v43  ;;  %6984 = vmatprep.mubr.msk.f32.mxu0 %vm371_vm0, %v4599_v25  ;;  %v8785_v43 = vld [vmem:[%s9035_s17] sm:$0xff] }
0x2532   :  { %6982 = vmatprep.subr.msk.mxu0 %vm371_vm0, %v4603_v8 }
0x2535   :  { %6983 = vmatpush3.xpose.msk.msra.mxu0 %vm371_vm0, %v4603_v8  ;;  %v4601_v9 = vpop.permute.xlu1 %4600 }
0x2536   :  { %7001 = vmatprep.subr.mxu0 %v8780_v14 }
0x2538   :  { %6985 = vmatmul.mubr.msk.f32.vlgmr.msra.gmra.mxu0 %vm371_vm0, %v4601_v9 }
0x2539   :  { %7002 = vmatpush3.msra.mxu0 %v8780_v14 }
0x253a   :  { %7003 = vmatprep.subr.mxu0 %v8785_v43 }
0x253b   :  { %7004 = vmatpush3.msra.mxu0 %v8785_v43 }
0x2547   :  { %v6965_v11 = vpop.f32.mrf.mxu0 }
0x2548   :  { %v8751_v31 = vadd.f32 %v6965_v11, %v8704_v1 }
0x2549   :  { %v4385_v12 = vpop.f32.mrf.mxu0 }
0x254a   :  { %v8760_v57 = vadd.f32 %v8704_v1, %v4385_v12 }
0x25f0   :  { %v6972_v13 = vpop.f32.mrf.mxu0 }
0x25f1   :  { %v4488_v17 = vmul.f32 0.25, %v6972_v13 }
0x25f2   :  { %v4478_v19 = vpop.f32.mrf.mxu0 }
0x25f3   :  { %v4487_v20 = vmul.f32 0.25, %v4478_v19  ;;  %v4492_v21 = vsel %vm371_vm0, %v4488_v17, -inf }
0x25f4   :  { %4493 = vmax.xlane.f32.xlu1 %v4492_v21 }
0x25f5   :  { %v4489_v22 = vsel %vm371_vm0, %v4487_v20, -inf }
0x25f6   :  { %4490 = vmax.xlane.f32.xlu0 %v4489_v22 }
0x25f8   :  { %v6986_v27 = vpop.f32.mrf.mxu0 }
0x25f9   :  { %v4690_v32 = vmul.f32 0.25, %v6986_v27 }
0x25fa   :  { %v4680_v29 = vpop.f32.mrf.mxu0 }
0x25fb   :  { %v4689_v30 = vmul.f32 0.25, %v4680_v29  ;;  %v4694_v34 = vsel %vm371_vm0, %v4690_v32, -inf }
0x25fd   :  { %v4691_v33 = vsel %vm371_vm0, %v4689_v30, -inf }
0x25fe   :  { %4692 = vmax.xlane.f32.xlu0 %v4691_v33 }
0x2602   :  { %4695 = vmax.xlane.f32.xlu0 %v4694_v34 }
0x267d   :  { %v4494_v36 = vpop.xlane.xlu1 %4493 }
0x267e   :  { %v4496_v40 = vsub.f32 %v4488_v17, %v4494_v36 }
0x267f   :  { %v4491_v37 = vpop.xlane.xlu0 %4490 }
0x2680   :  { %v4499_v38 = vmul.f32 1.442695, %v4496_v40  ;;  %v4495_v18 = vsub.f32 %v4487_v20, %v4491_v37 }
0x2682   :  { %7305 = vpow2.f32 %v4499_v38  ;;  %v4497_v39 = vmul.f32 1.442695, %v4495_v18 }
0x2684   :  { %7307 = vpow2.f32 %v4497_v39 }
0x2687   :  { %v4693_v42 = vpop.xlane.xlu0 %4692 }
0x2688   :  { %v4697_v44 = vsub.f32 %v4689_v30, %v4693_v42 }
0x268a   :  { %v4699_v46 = vmul.f32 1.442695, %v4697_v44 }
0x268b   :  { %v4696_v49 = vpop.xlane.xlu0 %4695 }
0x268c   :  { %7309 = vpow2.f32 %v4699_v46  ;;  %v4698_v50 = vsub.f32 %v4690_v32, %v4696_v49 }
0x268e   :  { %v4701_v51 = vmul.f32 1.442695, %v4698_v50 }
0x268f   :  { %v7306_v28 = vpop.eup %7305 }
0x2690   :  { %7311 = vpow2.f32 %v4701_v51  ;;  %v4504_v23 = vsel %vm371_vm0, %v7306_v28, 0.0 }
0x2691   :  { %v7308_v47 = vpop.eup %7307  ;;  %4505 = vadd.xlane.f32.xlu1 %v4504_v23 }
0x2692   :  { %v4501_v41 = vsel %vm371_vm0, %v7308_v47, 0.0 }
0x2693   :  { %4502 = vadd.xlane.f32.xlu0 %v4501_v41 }
0x2699   :  { %v7310_v16 = vpop.eup %7309 }
0x269a   :  { %v4703_v45 = vsel %vm371_vm0, %v7310_v16, 0.0 }
0x269b   :  { %4704 = vadd.xlane.f32.xlu0 %v4703_v45 }
0x269d   :  { %v7312_v54 = vpop.eup %7311 }
0x269e   :  { %v4706_v55 = vsel %vm371_vm0, %v7312_v54, 0.0 }
0x269f   :  { %4707 = vadd.xlane.f32.xlu1 %v4706_v55 }
0x26b0   :  { %4511 = vrot.lane.b32.xlu1 %v8710_v5, %s7707_s1 }
0x26b1   :  { %4513 = vrot.lane.b32.xlu0 %v8707_v6, %s7707_s1 }
0x26b4   :  { %4715 = vrot.lane.b32.xlu1 %v8707_v6, %s7708_s2 }
0x26b5   :  { %4966 = vrot.lane.b32.xlu0 %v8751_v31, %s7704_s19 }
0x26b8   :  { %4713 = vrot.lane.b32.xlu1 %v8710_v5, %s7708_s2  ;;  %v8772_v5 = vld [vmem:[%s9035_s17 + $0x10] sm:$0xff] }
0x26bc   :  { %4964 = vrot.lane.b32.xlu1 %v8760_v57, %s7704_s19  ;;  %s9040_s19 = sld [smem:[#allocation35_spill]] }
0x271a   :  { %v4506_v56 = vpop.xlane.xlu1 %4505 }
0x271b   :  { %7313 = vrcp.f32 %v4506_v56 }
0x271c   :  { %v4503_v24 = vpop.xlane.xlu0 %4502 }
0x271d   :  { %7315 = vrcp.f32 %v4503_v24 }
0x2724   :  { %v4705_v59 = vpop.xlane.xlu0 %4704 }
0x2725   :  { %7317 = vrcp.f32 %v4705_v59 }
0x2728   :  { %v4708_v2 = vpop.xlane.xlu1 %4707  ;;  %v4514_v52 = vpop.permute.xlu0 %4513 }
0x2729   :  { %v7314_v53 = vpop.eup %7313  ;;  %7319 = vrcp.f32 %v4708_v2  ;;  %6973 = vmatprep.subr.mxu1 %v4514_v52 }
0x272a   :  { %v7316_v60 = vpop.eup %7315  ;;  %6974 = vmatpush3.msra.mxu1 %v4514_v52  ;;  %v4510_v61 = vmul.f32 %v7314_v53, %v7306_v28 }
0x272b   :  { %v4509_v15 = vmul.f32 %v7316_v60, %v7308_v47 }
0x272c   :  { %v4512_v26 = vpop.permute.xlu1 %4511  ;;  %v4967_v48 = vpop.permute.xlu0 %4966 }
0x272d   :  { %6975 = vmatprep.subr.mxu1 %v4512_v26  ;;  %6977 = vmatprep.mubr.msk.f32.mxu1 %vm371_vm0, %v4509_v15 }
0x272e   :  { %6976 = vmatpush3.msra.mxu1 %v4512_v26 }
0x272f   :  { %6978 = vmatmul.mubr.msk.f32.vlgmr.msra.gmra.mxu1 %vm371_vm0, %v4510_v61 }
0x2730   :  { %v4716_v62 = vpop.permute.xlu1 %4715 }
0x2731   :  { %6987 = vmatprep.subr.mxu1 %v4716_v62 }
0x2732   :  { %v7318_v63 = vpop.eup %7317  ;;  %6988 = vmatpush3.msra.mxu1 %v4716_v62 }
0x2733   :  { %v4711_v7 = vmul.f32 %v7318_v63, %v7310_v16  ;;  %v6289_v63 = vld [vmem:[%s9036_s21] ss:$0 sm:$0xff] }
0x2734   :  { %v4714_v1 = vpop.permute.xlu1 %4713 }
0x2735   :  { %6989 = vmatprep.subr.mxu1 %v4714_v1  ;;  %6991 = vmatprep.mubr.msk.f32.mxu1 %vm371_vm0, %v4711_v7 }
0x2736   :  { %v7320_v6 = vpop.eup %7319  ;;  %6990 = vmatpush3.msra.mxu1 %v4714_v1 }
0x2737   :  { %6994 = vmatprep.subr.mxu1 %v8767_v3  ;;  %v4712_v4 = vmul.f32 %v7320_v6, %v7312_v54 }
0x2738   :  { %v4965_v12 = vpop.permute.xlu1 %4964 }
0x2739   :  { %6992 = vmatmul.mubr.msk.f32.vlgmr.msra.gmra.mxu1 %vm371_vm0, %v4712_v4 }
0x273a   :  { %6995 = vmatpush3.msra.mxu1 %v8767_v3 }
0x273b   :  { %6996 = vmatprep.subr.mxu1 %v8772_v5 }
0x273c   :  { %6997 = vmatpush3.msra.mxu1 %v8772_v5 }
0x273d   :  { %7008 = vmatprep.subr.msk.mxu1 %vm371_vm0, %v4967_v48 }
0x27ef   :  { %v6979_v25 = vpop.f32.mrf.mxu1 }
0x27f1   :  { %v4589_v8 = vpop.f32.mrf.mxu1 }
0x27f2   :  { %7005 = vmatprep.mubr.msk.f32.mxu0 %vm371_vm0, %v4589_v8 }
0x27f3   :  { %7006 = vmatmul.mubr.msk.f32.vlgmr.msra.gmra.mxu0 %vm371_vm0, %v6979_v25 }
0x27f9   :  { %v6993_v9 = vpop.f32.mrf.mxu1 }
0x27fb   :  { %v4791_v11 = vpop.f32.mrf.mxu1 }
0x27fc   :  { %6998 = vmatprep.mubr.msk.f32.mxu1 %vm371_vm0, %v4791_v11 }
0x27fd   :  { %6999 = vmatmul.mubr.msk.f32.vlgmr.msra.gmra.mxu1 %vm371_vm0, %v6993_v9 }
0x27fe   :  { %7009 = vmatpush3.xpose.msk.msra.mxu1 %vm371_vm0, %v4967_v48  ;;  %7012 = vmatprep.mubr.msk.f32.mxu1 %vm371_vm0, %v8760_v57 }
0x27ff   :  { %7010 = vmatprep.subr.msk.mxu1 %vm371_vm0, %v4965_v12 }
0x2802   :  { %7011 = vmatpush3.xpose.msk.msra.mxu1 %vm371_vm0, %v4965_v12 }
0x2805   :  { %7013 = vmatmul.mubr.msk.f32.vlgmr.msra.gmra.mxu1 %vm371_vm0, %v8751_v31 }
0x28b3   :  { %v7007_v13 = vpop.f32.mrf.mxu0 }
0x28b5   :  { %v4953_v56 = vpop.f32.mrf.mxu0 }
0x28bd   :  { %v7000_v17 = vpop.f32.mrf.mxu1 }
0x28be   :  { %v8800_v19 = vadd.f32 %v7007_v13, %v7000_v17 }
0x28bf   :  { %v8802_v20 = vpop.f32.mrf.mxu1 }
0x28c0   :  { %v4954_v61 = vadd.f32 %v4953_v56, %v8802_v20  ;;  %v5527_v11 = vadd.f32 %v8800_v19, %v8669_v35 }
0x28c2   :  { %v5526_v62 = vadd.f32 %v4954_v61, %v8671_v0  ;;  %v8851_v12 = vadd.f32 %v6289_v63, %v5527_v11 }
0x28c4   :  { %v8841_v7 = vadd.f32 %v6289_v63, %v5526_v62  ;;  %v5544_v13 = vsel %vm653_vm4, %v8851_v12, 0.0 }
0x28c5   :  { %v7014_v21 = vpop.f32.mrf.mxu1 }
0x28c6   :  { %v5052_v22 = vmul.f32 0.25, %v7014_v21  ;;  %v5541_v1 = vsel %vm653_vm4, %v8841_v7, 0.0 }
0x28c7   :  { %v5042_v27 = vpop.f32.mrf.mxu1 }
0x28c8   :  { %v5051_v29 = vmul.f32 0.25, %v5042_v27  ;;  %v5056_v30 = vsel %vm371_vm0, %v5052_v22, -inf }
0x28c9   :  { %5057 = vmax.xlane.f32.xlu1 %v5056_v30 }
0x28ca   :  { %v5053_v32 = vsel %vm371_vm0, %v5051_v29, -inf }
0x28cb   :  { %5054 = vmax.xlane.f32.xlu0 %v5053_v32 }
0x28da   :  { %5075 = vrot.lane.b32.xlu1 %v8760_v57, %s7707_s1 }
0x28de   :  { %5168 = vrot.lane.b32.xlu1 %v8751_v31, %s7705_s24 }
0x28e2   :  { %5166 = vrot.lane.b32.xlu1 %v8760_v57, %s7705_s24  ;;  %s9041_s24 = sld [smem:[#allocation32_spill]] }
0x28e6   :  { %5164 = vrot.lane.b32.xlu1 %v8751_v31, %s7706_s26 }
0x2952   :  { %v5058_v33 = vpop.xlane.xlu1 %5057 }
0x2953   :  { %v5060_v34 = vsub.f32 %v5052_v22, %v5058_v33 }
0x2954   :  { %v5055_v36 = vpop.xlane.xlu0 %5054 }
0x2955   :  { %v5063_v40 = vmul.f32 1.442695, %v5060_v34  ;;  %v5059_v37 = vsub.f32 %v5051_v29, %v5055_v36 }
0x2956   :  { %v5076_v50 = vpop.permute.xlu1 %5075 }
0x2957   :  { %7321 = vpow2.f32 %v5063_v40  ;;  %v5061_v38 = vmul.f32 1.442695, %v5059_v37 }
0x2959   :  { %7323 = vpow2.f32 %v5061_v38 }
0x295a   :  { %v5169_v28 = vpop.permute.xlu1 %5168 }
0x295e   :  { %v5167_v54 = vpop.permute.xlu1 %5166 }
0x2962   :  { %v5165_v55 = vpop.permute.xlu1 %5164 }
0x2964   :  { %v7322_v18 = vpop.eup %7321 }
0x2965   :  { %v5068_v39 = vsel %vm371_vm0, %v7322_v18, 0.0 }
0x2966   :  { %v7324_v42 = vpop.eup %7323  ;;  %5069 = vadd.xlane.f32.xlu0 %v5068_v39 }
0x2967   :  { %v5065_v44 = vsel %vm371_vm0, %v7324_v42, 0.0 }
0x296a   :  { %5066 = vadd.xlane.f32.xlu0 %v5065_v44 }
0x2980   :  { %5077 = vrot.lane.b32.xlu0 %v8751_v31, %s7707_s1  ;;  %s9044_s1 = sld [smem:[#allocation47_spill]] }
0x2984   :  { %5162 = vrot.lane.b32.xlu0 %v8760_v57, %s7706_s26  ;;  %s9042_s26 = sld [smem:[#allocation34_spill]] }
0x29ef   :  { %v5070_v46 = vpop.xlane.xlu0 %5069 }
0x29f0   :  { %7325 = vrcp.f32 %v5070_v46 }
0x29f3   :  { %v5067_v49 = vpop.xlane.xlu0 %5066 }
0x29f4   :  { %7327 = vrcp.f32 %v5067_v49 }
0x29f7   :  { %v5078_v51 = vpop.permute.xlu0 %5077 }
0x29f8   :  { %7015 = vmatprep.subr.mxu0 %v5078_v51 }
0x29f9   :  { %7016 = vmatpush3.msra.mxu0 %v5078_v51 }
0x29fa   :  { %7017 = vmatprep.subr.mxu0 %v5076_v50 }
0x29fb   :  { %7018 = vmatpush3.msra.mxu0 %v5076_v50  ;;  %v5163_v45 = vpop.permute.xlu0 %5162 }
0x29fc   :  { %7022 = vmatprep.subr.msk.mxu0 %vm371_vm0, %v5169_v28 }
0x29fd   :  { %v7326_v23 = vpop.eup %7325 }
0x29fe   :  { %v5074_v16 = vmul.f32 %v7326_v23, %v7322_v18 }
0x2a01   :  { %v7328_v47 = vpop.eup %7327 }
0x2a02   :  { %v5073_v41 = vmul.f32 %v7328_v47, %v7324_v42 }
0x2a04   :  { %7019 = vmatprep.mubr.msk.f32.mxu0 %vm371_vm0, %v5073_v41 }
0x2a05   :  { %7020 = vmatmul.mubr.msk.f32.vlgmr.msra.gmra.mxu0 %vm371_vm0, %v5074_v16  ;;  %v5617_v16 = vld [vmem:[%s9037_s3 + $0x10] sm:$0xff] }
0x2a06   :  { %7023 = vmatpush3.xpose.msk.msra.mxu0 %vm371_vm0, %v5169_v28  ;;  %7026 = vmatprep.mubr.msk.f32.mxu0 %vm371_vm0, %v5163_v45  ;;  %v5616_v45 = vld [vmem:[%s9037_s3 + $0x8] sm:$0xff] }
0x2a07   :  { %7024 = vmatprep.subr.msk.mxu0 %vm371_vm0, %v5167_v54 }
0x2a0a   :  { %7025 = vmatpush3.xpose.msk.msra.mxu0 %vm371_vm0, %v5167_v54  ;;  %v5615_v54 = vld [vmem:[%s9037_s3] sm:$0xff] }
0x2a0b   :  { %7043 = vmatprep.subr.mxu0 %v8780_v14 }
0x2a0d   :  { %7027 = vmatmul.mubr.msk.f32.vlgmr.msra.gmra.mxu0 %vm371_vm0, %v5165_v55 }
0x2a0e   :  { %7044 = vmatpush3.msra.mxu0 %v8780_v14 }
0x2a0f   :  { %7045 = vmatprep.subr.mxu0 %v8785_v43 }
0x2a10   :  { %7046 = vmatpush3.msra.mxu0 %v8785_v43 }
0x2ac5   :  { %v7021_v24 = vpop.f32.mrf.mxu0 }
0x2ac7   :  { %v5153_v59 = vpop.f32.mrf.mxu0 }
0x2ac8   :  { %7047 = vmatprep.mubr.msk.f32.mxu0 %vm371_vm0, %v5153_v59 }
0x2ac9   :  { %7048 = vmatmul.mubr.msk.f32.vlgmr.msra.gmra.mxu0 %vm371_vm0, %v7021_v24 }
0x2acd   :  { %v7028_v2 = vpop.f32.mrf.mxu0 }
0x2ace   :  { %v5254_v52 = vmul.f32 0.25, %v7028_v2 }
0x2acf   :  { %v5244_v53 = vpop.f32.mrf.mxu0 }
0x2ad0   :  { %v5253_v60 = vmul.f32 0.25, %v5244_v53  ;;  %v5258_v15 = vsel %vm371_vm0, %v5254_v52, -inf }
0x2ad1   :  { %5259 = vmax.xlane.f32.xlu1 %v5258_v15 }
0x2ad2   :  { %v5255_v26 = vsel %vm371_vm0, %v5253_v60, -inf }
0x2ad3   :  { %5256 = vmax.xlane.f32.xlu0 %v5255_v26 }
0x2ae2   :  { %5277 = vrot.lane.b32.xlu1 %v8760_v57, %s7708_s2 }
0x2b06   :  { %5542 = vadd.xlane.f32.xlu1 %v5541_v1 }
0x2b5a   :  { %v5260_v6 = vpop.xlane.xlu1 %5259 }
0x2b5b   :  { %v5262_v4 = vsub.f32 %v5254_v52, %v5260_v6 }
0x2b5c   :  { %v5257_v48 = vpop.xlane.xlu0 %5256 }
0x2b5d   :  { %v5265_v14 = vmul.f32 1.442695, %v5262_v4  ;;  %v5261_v43 = vsub.f32 %v5253_v60, %v5257_v48 }
0x2b5e   :  { %v5278_v22 = vpop.permute.xlu1 %5277 }
0x2b5f   :  { %7329 = vpow2.f32 %v5265_v14  ;;  %v5263_v25 = vmul.f32 1.442695, %v5261_v43  ;;  %v8894_v43 = vld [vmem:[%s9038_s8] ss:$0 sm:$0xff] }
0x2b61   :  { %7331 = vpow2.f32 %v5263_v25 }
0x2b6c   :  { %v7330_v57 = vpop.eup %7329 }
0x2b6d   :  { %v5270_v8 = vsel %vm371_vm0, %v7330_v57, 0.0 }
0x2b6e   :  { %v7332_v9 = vpop.eup %7331  ;;  %5271 = vadd.xlane.f32.xlu0 %v5270_v8 }
0x2b6f   :  { %v5267_v0 = vsel %vm371_vm0, %v7332_v9, 0.0 }
0x2b72   :  { %5268 = vadd.xlane.f32.xlu0 %v5267_v0  ;;  %v8899_v0 = vld [vmem:[%s9039_s14] ss:$0 sm:$0xff] }
0x2b88   :  { %5279 = vrot.lane.b32.xlu0 %v8751_v31, %s7708_s2  ;;  %s9045_s2 = sld [smem:[#allocation46_spill]] }
0x2b89   :  { %v7049_v33 = vpop.f32.mrf.mxu0 }
0x2b8b   :  { %v5517_v18 = vpop.f32.mrf.mxu0 }
0x2b8f   :  { %v5543_v34 = vpop.xlane.xlu1 %5542 }
0x2b90   :  { %v5553_v37 = vmul.f32 0.03125, %v5543_v34  ;;  %v5762_v34 = vld [vmem:[%s9040_s19 + $0x18] sm:$0xff] }
0x2b92   :  { %v5557_v44 = vsub.f32 %v8841_v7, %v5553_v37  ;;  %v5759_v37 = vld [vmem:[%s9040_s19] sm:$0xff] }
0x2b94   :  { %v5561_v23 = vmul.f32 %v5557_v44, %v5557_v44 }
0x2b96   :  { %v5565_v41 = vsel %vm653_vm4, %v5561_v23, 0.0 }
0x2ba7   :  { %5545 = vadd.xlane.f32.xlu0 %v5544_v13 }
0x2bf7   :  { %v5272_v17 = vpop.xlane.xlu0 %5271 }
0x2bf8   :  { %7333 = vrcp.f32 %v5272_v17  ;;  %v5774_v17 = vld [vmem:[%s9040_s19 + $0x78] sm:$0xff] }
0x2bf9   :  { %7064 = vmatprep.subr.mxu0 %v5774_v17 }
0x2bfa   :  { %7065 = vmatpush3.msra.mxu0 %v5774_v17 }
0x2bfb   :  { %v5269_v20 = vpop.xlane.xlu0 %5268 }
0x2bfc   :  { %7335 = vrcp.f32 %v5269_v20  ;;  %v5773_v20 = vld [vmem:[%s9040_s19 + $0x70] sm:$0xff] }
0x2bfd   :  { %7066 = vmatprep.subr.mxu0 %v5773_v20 }
0x2bfe   :  { %7067 = vmatpush3.msra.mxu0 %v5773_v20 }
0x2bff   :  { %v5280_v21 = vpop.permute.xlu0 %5279 }
0x2c00   :  { %7029 = vmatprep.subr.mxu1 %v5280_v21 }
0x2c01   :  { %7030 = vmatpush3.msra.mxu1 %v5280_v21  ;;  %v5772_v21 = vld [vmem:[%s9040_s19 + $0x68] sm:$0xff] }
0x2c02   :  { %7031 = vmatprep.subr.mxu1 %v5278_v22  ;;  %7068 = vmatprep.subr.mxu0 %v5772_v21 }
0x2c03   :  { %7032 = vmatpush3.msra.mxu1 %v5278_v22  ;;  %7069 = vmatpush3.msra.mxu0 %v5772_v21  ;;  %v5771_v22 = vld [vmem:[%s9040_s19 + $0x60] sm:$0xff] }
0x2c04   :  { %7036 = vmatprep.subr.mxu1 %v8767_v3  ;;  %7070 = vmatprep.subr.mxu0 %v5771_v22 }
0x2c05   :  { %v7334_v31 = vpop.eup %7333  ;;  %7071 = vmatpush3.msra.mxu0 %v5771_v22 }
0x2c06   :  { %v5276_v27 = vmul.f32 %v7334_v31, %v7330_v57  ;;  %v5770_v31 = vld [vmem:[%s9040_s19 + $0x58] sm:$0xff] }
0x2c07   :  { %7072 = vmatprep.subr.mxu0 %v5770_v31 }
0x2c08   :  { %7073 = vmatpush3.msra.mxu0 %v5770_v31 }
0x2c09   :  { %v7336_v35 = vpop.eup %7335 }
0x2c0a   :  { %v5275_v19 = vmul.f32 %v7336_v35, %v7332_v9  ;;  %v5769_v35 = vld [vmem:[%s9040_s19 + $0x50] sm:$0xff] }
0x2c0b   :  { %7074 = vmatprep.subr.mxu0 %v5769_v35 }
0x2c0c   :  { %7033 = vmatprep.mubr.msk.f32.mxu1 %vm371_vm0, %v5275_v19  ;;  %7075 = vmatpush3.msra.mxu0 %v5769_v35  ;;  %v5768_v19 = vld [vmem:[%s9040_s19 + $0x48] sm:$0xff] }
0x2c0d   :  { %7034 = vmatmul.mubr.msk.f32.vlgmr.msra.gmra.mxu1 %vm371_vm0, %v5276_v27  ;;  %v5767_v27 = vld [vmem:[%s9040_s19 + $0x40] sm:$0xff]  ;;  %7076 = vmatprep.subr.mxu0 %v5768_v19 }
0x2c0e   :  { %7037 = vmatpush3.msra.mxu1 %v8767_v3  ;;  %7077 = vmatpush3.msra.mxu0 %v5768_v19 }
0x2c0f   :  { %7038 = vmatprep.subr.mxu1 %v8772_v5  ;;  %7078 = vmatprep.subr.mxu0 %v5767_v27 }
0x2c10   :  { %7039 = vmatpush3.msra.mxu1 %v8772_v5  ;;  %7079 = vmatpush3.msra.mxu0 %v5767_v27 }
0x2c30   :  { %v5546_v32 = vpop.xlane.xlu0 %5545 }
0x2c31   :  { %v5554_v36 = vmul.f32 0.03125, %v5546_v32  ;;  %v5764_v32 = vld [vmem:[%s9040_s19 + $0x28] sm:$0xff] }
0x2c33   :  { %v5558_v3 = vsub.f32 %v8851_v12, %v5554_v36  ;;  %v5761_v36 = vld [vmem:[%s9040_s19 + $0x10] sm:$0xff] }
0x2c35   :  { %v5562_v28 = vmul.f32 %v5558_v3, %v5558_v3 }
0x2c37   :  { %v5568_v47 = vsel %vm653_vm4, %v5562_v28, 0.0 }
0x2ccd   :  { %v7035_v29 = vpop.f32.mrf.mxu1 }
0x2ccf   :  { %v5355_v30 = vpop.f32.mrf.mxu1 }
0x2cd0   :  { %7040 = vmatprep.mubr.msk.f32.mxu1 %vm371_vm0, %v5355_v30  ;;  %v5765_v30 = vld [vmem:[%s9040_s19 + $0x30] sm:$0xff] }
0x2cd1   :  { %7041 = vmatmul.mubr.msk.f32.vlgmr.msra.gmra.mxu1 %vm371_vm0, %v7035_v29  ;;  %v5766_v29 = vld [vmem:[%s9040_s19 + $0x38] sm:$0xff] }
0x2cd2   :  { %7080 = vmatprep.subr.mxu0 %v5766_v29 }
0x2cd3   :  { %7081 = vmatpush3.msra.mxu0 %v5766_v29 }
0x2cd4   :  { %7082 = vmatprep.subr.mxu0 %v5765_v30 }
0x2cd5   :  { %7083 = vmatpush3.msra.mxu0 %v5765_v30 }
0x2cd6   :  { %7084 = vmatprep.subr.mxu0 %v5764_v32 }
0x2cd7   :  { %7085 = vmatpush3.msra.mxu0 %v5764_v32 }
0x2d91   :  { %v7042_v40 = vpop.f32.mrf.mxu1 }
0x2d92   :  { %v5523_v38 = vadd.f32 %v7049_v33, %v7042_v40  ;;  %v5763_v33 = vld [vmem:[%s9040_s19 + $0x20] sm:$0xff]  ;;  %v5760_v40 = vld [vmem:[%s9040_s19 + $0x8] sm:$0xff] }
0x2d93   :  { %v5436_v39 = vpop.f32.mrf.mxu1  ;;  %7086 = vmatprep.subr.mxu0 %v5763_v33 }
0x2d94   :  { %v5529_v42 = vadd.f32 %v5523_v38, %v8679_v10  ;;  %v5518_v5 = vadd.f32 %v5517_v18, %v5436_v39  ;;  %7087 = vmatpush3.msra.mxu0 %v5763_v33 }
0x2d95   :  { %7088 = vmatprep.subr.mxu0 %v5762_v34 }
0x2d96   :  { %v8866_v46 = vadd.f32 %v6289_v63, %v5529_v42  ;;  %v5528_v49 = vadd.f32 %v5518_v5, %v8682_v58  ;;  %v5618_v58 = vld [vmem:[%s9037_s3 + $0x18] sm:$0xff]  ;;  %7089 = vmatpush3.msra.mxu0 %v5762_v34 }
0x2d97   :  { %7050 = vmatprep.subr.mxu1 %v5618_v58  ;;  %7090 = vmatprep.subr.mxu0 %v5761_v36 }
0x2d98   :  { %v8869_v50 = vadd.f32 %v6289_v63, %v5528_v49  ;;  %v5550_v51 = vsel %vm653_vm4, %v8866_v46, 0.0  ;;  %7051 = vmatpush3.msra.mxu1 %v5618_v58  ;;  %7091 = vmatpush3.msra.mxu0 %v5761_v36  ;;  %v6292_v58 = vld [vmem:[%s9041_s24] ss:$0 sm:$0xff] }
0x2d99   :  { %5551 = vadd.xlane.f32.xlu1 %v5550_v51  ;;  %7052 = vmatprep.subr.mxu1 %v5617_v16 }
0x2d9a   :  { %v5547_v10 = vsel %vm653_vm4, %v8869_v50, 0.0  ;;  %7053 = vmatpush3.msra.mxu1 %v5617_v16  ;;  %7092 = vmatprep.subr.mxu0 %v5760_v40 }
0x2d9b   :  { %5548 = vadd.xlane.f32.xlu0 %v5547_v10  ;;  %7054 = vmatprep.subr.mxu1 %v5616_v45 }
0x2d9c   :  { %7055 = vmatpush3.msra.mxu1 %v5616_v45  ;;  %7093 = vmatpush3.msra.mxu0 %v5760_v40 }
0x2d9d   :  { %5569 = vadd.xlane.f32.xlu1 %v5568_v47  ;;  %7056 = vmatprep.subr.mxu1 %v5615_v54 }
0x2d9e   :  { %7057 = vmatpush3.msra.mxu1 %v5615_v54  ;;  %7094 = vmatprep.subr.mxu0 %v5759_v37 }
0x2d9f   :  { %5566 = vadd.xlane.f32.xlu0 %v5565_v41  ;;  %7095 = vmatpush3.msra.mxu0 %v5759_v37  ;;  %v6297_v37 = vld [vmem:[%s9042_s26] ss:$0 sm:$0xff] }
0x2e22   :  { %v5552_v55 = vpop.xlane.xlu1 %5551 }
0x2e23   :  { %v5556_v56 = vmul.f32 0.03125, %v5552_v55 }
0x2e24   :  { %v5549_v24 = vpop.xlane.xlu0 %5548 }
0x2e25   :  { %v8882_v59 = vsub.f32 %v8866_v46, %v5556_v56  ;;  %v5555_v2 = vmul.f32 0.03125, %v5549_v24 }
0x2e26   :  { %v5570_v52 = vpop.xlane.xlu1 %5569 }
0x2e27   :  { %v8885_v53 = vsub.f32 %v8869_v50, %v5555_v2  ;;  %v5578_v60 = vmul.f32 0.03125, %v5570_v52  ;;  %v5564_v15 = vmul.f32 %v8882_v59, %v8882_v59 }
0x2e28   :  { %v5567_v26 = vpop.xlane.xlu0 %5566 }
0x2e29   :  { %v5582_v61 = vadd.f32 1e-06, %v5578_v60  ;;  %v5577_v62 = vmul.f32 0.03125, %v5567_v26  ;;  %v5574_v63 = vsel %vm653_vm4, %v5564_v15, 0.0  ;;  %v5563_v1 = vmul.f32 %v8885_v53, %v8885_v53 }
0x2e2a   :  { %5575 = vadd.xlane.f32.xlu1 %v5574_v63 }
0x2e2b   :  { %7337 = vrsqrt.f32 %v5582_v61  ;;  %v5581_v6 = vadd.f32 1e-06, %v5577_v62  ;;  %v5571_v4 = vsel %vm653_vm4, %v5563_v1, 0.0 }
0x2e2c   :  { %5572 = vadd.xlane.f32.xlu0 %v5571_v4 }
0x2e2d   :  { %7339 = vrsqrt.f32 %v5581_v6 }
0x2e38   :  { %v7338_v48 = vpop.eup %7337 }
0x2e39   :  { %v5590_v14 = vmul.f32 %v7338_v48, %v5558_v3 }
0x2e3a   :  { %v7340_v25 = vpop.eup %7339 }
0x2e3b   :  { %v5589_v57 = vmul.f32 %v7340_v25, %v5557_v44  ;;  %v5601_v8 = vmul.f32 %v8894_v43, %v5590_v14 }
0x2e3d   :  { %v5600_v9 = vmul.f32 %v8894_v43, %v5589_v57  ;;  %v5612_v13 = vadd.f32 %v8899_v0, %v5601_v8 }
0x2e3f   :  { %v5611_v11 = vadd.f32 %v8899_v0, %v5600_v9 }
0x2e41   :  { %7058 = vmatprep.mubr.msk.f32.mxu1 %vm653_vm4, %v5611_v11 }
0x2e42   :  { %7059 = vmatmul.mubr.msk.f32.vlgmr.msra.gmra.mxu1 %vm653_vm4, %v5612_v13 }
0x2eb3   :  { %v5576_v38 = vpop.xlane.xlu1 %5575 }
0x2eb4   :  { %v5580_v18 = vmul.f32 0.03125, %v5576_v38 }
0x2eb5   :  { %v5573_v39 = vpop.xlane.xlu0 %5572 }
0x2eb6   :  { %v5584_v3 = vadd.f32 1e-06, %v5580_v18  ;;  %v5579_v42 = vmul.f32 0.03125, %v5573_v39 }
0x2eb8   :  { %7341 = vrsqrt.f32 %v5584_v3  ;;  %v5583_v5 = vadd.f32 1e-06, %v5579_v42 }
0x2eba   :  { %7343 = vrsqrt.f32 %v5583_v5 }
0x2ec5   :  { %v7342_v44 = vpop.eup %7341 }
0x2ec6   :  { %v5592_v49 = vmul.f32 %v7342_v44, %v8882_v59 }
0x2ec7   :  { %v7344_v51 = vpop.eup %7343 }
0x2ec8   :  { %v5591_v28 = vmul.f32 %v7344_v51, %v8885_v53  ;;  %v5603_v10 = vmul.f32 %v8894_v43, %v5592_v49 }
0x2eca   :  { %v5602_v23 = vmul.f32 %v8894_v43, %v5591_v28  ;;  %v5614_v41 = vadd.f32 %v8899_v0, %v5603_v10 }
0x2ecc   :  { %v5613_v47 = vadd.f32 %v8899_v0, %v5602_v23 }
0x2ece   :  { %7061 = vmatprep.mubr.msk.f32.mxu1 %vm653_vm4, %v5613_v47 }
0x2ecf   :  { %7062 = vmatmul.mubr.msk.f32.gmra.mxu1 %vm653_vm4, %v5614_v41 }
0x2f02   :  { %v7060_v16 = vpop.f32.mrf.mxu1 }
0x2f03   :  { %v5710_v45 = vadd.f32 %v7060_v16, %v6292_v58 }
0x2f04   :  { %v5704_v54 = vpop.f32.mrf.mxu1 }
0x2f05   :  { %v5724_v55 = vmul.f32 %v5710_v45, %v5710_v45  ;;  %v5705_v56 = vadd.f32 %v6292_v58, %v5704_v54 }
0x2f07   :  { %v5728_v24 = vmul.f32 %v5724_v55, %v5710_v45  ;;  %v5723_v59 = vmul.f32 %v5705_v56, %v5705_v56 }
0x2f09   :  { %v5732_v2 = vmul.f32 0.044715, %v5728_v24  ;;  %v5727_v52 = vmul.f32 %v5723_v59, %v5705_v56 }
0x2f0b   :  { %v5736_v53 = vadd.f32 %v5732_v2, %v5710_v45  ;;  %v5731_v60 = vmul.f32 0.044715, %v5727_v52  ;;  %v5948_v52 = vld [vmem:[%s9043_s28 + $0x18] sm:$0xff] }
0x2f0c   :  { %7102 = vmatprep.subr.mxu1 %v5948_v52 }
0x2f0d   :  { %v5740_v15 = vmul.f32 0.7978846, %v5736_v53  ;;  %v5735_v26 = vadd.f32 %v5731_v60, %v5705_v56  ;;  %7103 = vmatpush3.msra.mxu1 %v5948_v52  ;;  %v5946_v53 = vld [vmem:[%s9043_s28 + $0x8] sm:$0xff]  ;;  %v5945_v60 = vld [vmem:[%s9043_s28] sm:$0xff] }
0x2f0f   :  { %7345 = vtanh.f32 %v5740_v15  ;;  %v5739_v61 = vmul.f32 0.7978846, %v5735_v26 }
0x2f11   :  { %7347 = vtanh.f32 %v5739_v61 }
0x2f1c   :  { %v7346_v62 = vpop.eup %7345 }
0x2f1d   :  { %v5748_v63 = vadd.f32 1.0, %v7346_v62 }
0x2f1e   :  { %v7348_v1 = vpop.eup %7347 }
0x2f1f   :  { %v5747_v6 = vadd.f32 1.0, %v7348_v1  ;;  %v5752_v4 = vmul.f32 0.5, %v5748_v63 }
0x2f21   :  { %v5751_v48 = vmul.f32 0.5, %v5747_v6  ;;  %v5756_v43 = vmul.f32 %v5752_v4, %v5710_v45 }
0x2f23   :  { %v5755_v14 = vmul.f32 %v5751_v48, %v5705_v56 }
0x2f25   :  { %7096 = vmatprep.mubr.f32.mxu0 %v5755_v14 }
0x2f26   :  { %7097 = vmatmul.mubr.f32.vlgmr.msra.gmra.mxu0 %v5756_v43 }
0x2f8f   :  { %v7063_v25 = vpop.f32.mrf.mxu1 }
0x2f90   :  { %v5720_v57 = vadd.f32 %v7063_v25, %v6292_v58 }
0x2f91   :  { %v5714_v8 = vpop.f32.mrf.mxu1 }
0x2f92   :  { %v5726_v9 = vmul.f32 %v5720_v57, %v5720_v57  ;;  %v5715_v0 = vadd.f32 %v6292_v58, %v5714_v8 }
0x2f94   :  { %v5730_v11 = vmul.f32 %v5726_v9, %v5720_v57  ;;  %v5725_v13 = vmul.f32 %v5715_v0, %v5715_v0 }
0x2f96   :  { %v5734_v17 = vmul.f32 0.044715, %v5730_v11  ;;  %v5729_v20 = vmul.f32 %v5725_v13, %v5715_v0 }
0x2f98   :  { %v5738_v21 = vadd.f32 %v5734_v17, %v5720_v57  ;;  %v5733_v22 = vmul.f32 0.044715, %v5729_v20  ;;  %v6298_v17 = vld [vmem:[%s9044_s1] ss:$0 sm:$0xff] }
0x2f9a   :  { %v5742_v31 = vmul.f32 0.7978846, %v5738_v21  ;;  %v5737_v35 = vadd.f32 %v5733_v22, %v5715_v0 }
0x2f9c   :  { %7349 = vtanh.f32 %v5742_v31  ;;  %v5741_v19 = vmul.f32 0.7978846, %v5737_v35  ;;  %v6299_v35 = vld [vmem:[%s9045_s2] ss:$0 sm:$0xff] }
0x2f9e   :  { %7351 = vtanh.f32 %v5741_v19 }
0x2fa9   :  { %v7350_v27 = vpop.eup %7349 }
0x2faa   :  { %v5750_v29 = vadd.f32 1.0, %v7350_v27 }
0x2fab   :  { %v7352_v30 = vpop.eup %7351 }
0x2fac   :  { %v5749_v32 = vadd.f32 1.0, %v7352_v30  ;;  %v5754_v33 = vmul.f32 0.5, %v5750_v29 }
0x2fae   :  { %v5753_v34 = vmul.f32 0.5, %v5749_v32  ;;  %v5758_v40 = vmul.f32 %v5754_v33, %v5720_v57 }
0x2fb0   :  { %v5757_v36 = vmul.f32 %v5753_v34, %v5715_v0 }
0x2fb2   :  { %7099 = vmatprep.mubr.f32.mxu0 %v5757_v36 }
0x2fb3   :  { %7100 = vmatmul.mubr.f32.gmra.mxu0 %v5758_v40 }
0x2fe6   :  { %v7098_v38 = vpop.f32.mrf.mxu0 }
0x2fe7   :  { %v5854_v18 = vadd.f32 %v7098_v38, %v6297_v37 }
0x2fe8   :  { %v5848_v39 = vpop.f32.mrf.mxu0 }
0x2fe9   :  { %v5868_v3 = vadd.f32 %v5854_v18, %v8851_v12  ;;  %v5849_v42 = vadd.f32 %v6297_v37, %v5848_v39 }
0x2feb   :  { %v5867_v5 = vadd.f32 %v5849_v42, %v8841_v7  ;;  %v5874_v44 = vsel %vm653_vm4, %v5868_v3, 0.0 }
0x2fec   :  { %5875 = vadd.xlane.f32.xlu1 %v5874_v44  ;;  %v6300_v44 = vld [vmem:[#allocation17] ss:$0 sm:$0xff] }
0x2fed   :  { %v5871_v49 = vsel %vm653_vm4, %v5867_v5, 0.0 }
0x2fee   :  { %5872 = vadd.xlane.f32.xlu0 %v5871_v49 }
0x3073   :  { %v7101_v51 = vpop.f32.mrf.mxu0 }
0x3074   :  { %v5864_v28 = vadd.f32 %v7101_v51, %v6297_v37 }
0x3075   :  { %v5876_v10 = vpop.xlane.xlu1 %5875  ;;  %v5858_v23 = vpop.f32.mrf.mxu0 }
0x3076   :  { %v5870_v47 = vadd.f32 %v5864_v28, %v8866_v46  ;;  %v5884_v41 = vmul.f32 0.03125, %v5876_v10  ;;  %v5859_v58 = vadd.f32 %v6297_v37, %v5858_v23 }
0x3077   :  { %v5873_v16 = vpop.xlane.xlu0 %5872 }
0x3078   :  { %v5888_v12 = vsub.f32 %v5868_v3, %v5884_v41  ;;  %v5869_v7 = vadd.f32 %v5859_v58, %v8869_v50  ;;  %v5883_v45 = vmul.f32 0.03125, %v5873_v16  ;;  %v5880_v54 = vsel %vm653_vm4, %v5870_v47, 0.0  ;;  %v5947_v50 = vld [vmem:[%s9043_s28 + $0x10] sm:$0xff] }
0x3079   :  { %5881 = vadd.xlane.f32.xlu1 %v5880_v54  ;;  %7104 = vmatprep.subr.mxu1 %v5947_v50 }
0x307a   :  { %v5887_v55 = vsub.f32 %v5867_v5, %v5883_v45  ;;  %v5877_v56 = vsel %vm653_vm4, %v5869_v7, 0.0  ;;  %v5892_v24 = vmul.f32 %v5888_v12, %v5888_v12  ;;  %7105 = vmatpush3.msra.mxu1 %v5947_v50 }
0x307b   :  { %5878 = vadd.xlane.f32.xlu0 %v5877_v56  ;;  %7106 = vmatprep.subr.mxu1 %v5946_v53 }
0x307c   :  { %v5898_v46 = vsel %vm653_vm4, %v5892_v24, 0.0  ;;  %v5891_v59 = vmul.f32 %v5887_v55, %v5887_v55  ;;  %7107 = vmatpush3.msra.mxu1 %v5946_v53 }
0x307d   :  { %5899 = vadd.xlane.f32.xlu1 %v5898_v46  ;;  %7108 = vmatprep.subr.mxu1 %v5945_v60 }
0x307e   :  { %v5895_v2 = vsel %vm653_vm4, %v5891_v59, 0.0  ;;  %7109 = vmatpush3.msra.mxu1 %v5945_v60 }
0x307f   :  { %5896 = vadd.xlane.f32.xlu0 %v5895_v2 }
0x3102   :  { %v5882_v15 = vpop.xlane.xlu1 %5881 }
0x3103   :  { %v5886_v26 = vmul.f32 0.03125, %v5882_v15 }
0x3104   :  { %v5879_v61 = vpop.xlane.xlu0 %5878 }
0x3105   :  { %v5890_v62 = vsub.f32 %v5870_v47, %v5886_v26  ;;  %v5885_v63 = vmul.f32 0.03125, %v5879_v61 }
0x3106   :  { %v5900_v1 = vpop.xlane.xlu1 %5899 }
0x3107   :  { %v5889_v6 = vsub.f32 %v5869_v7, %v5885_v63  ;;  %v5908_v4 = vmul.f32 0.03125, %v5900_v1  ;;  %v5894_v48 = vmul.f32 %v5890_v62, %v5890_v62 }
0x3108   :  { %v5897_v14 = vpop.xlane.xlu0 %5896 }
0x3109   :  { %v5912_v43 = vadd.f32 1e-06, %v5908_v4  ;;  %v5907_v25 = vmul.f32 0.03125, %v5897_v14  ;;  %v5904_v57 = vsel %vm653_vm4, %v5894_v48, 0.0  ;;  %v5893_v8 = vmul.f32 %v5889_v6, %v5889_v6 }
0x310a   :  { %5905 = vadd.xlane.f32.xlu1 %v5904_v57 }
0x310b   :  { %7353 = vrsqrt.f32 %v5912_v43  ;;  %v5911_v9 = vadd.f32 1e-06, %v5907_v25  ;;  %v5901_v0 = vsel %vm653_vm4, %v5893_v8, 0.0 }
0x310c   :  { %5902 = vadd.xlane.f32.xlu0 %v5901_v0 }
0x310d   :  { %7355 = vrsqrt.f32 %v5911_v9 }
0x3118   :  { %v7354_v11 = vpop.eup %7353 }
0x3119   :  { %v5920_v13 = vmul.f32 %v7354_v11, %v5888_v12 }
0x311a   :  { %v7356_v20 = vpop.eup %7355 }
0x311b   :  { %v5919_v21 = vmul.f32 %v7356_v20, %v5887_v55  ;;  %v5931_v22 = vmul.f32 %v6298_v17, %v5920_v13 }
0x311d   :  { %v5930_v31 = vmul.f32 %v6298_v17, %v5919_v21  ;;  %v5942_v27 = vadd.f32 %v6299_v35, %v5931_v22 }
0x311f   :  { %v5941_v19 = vadd.f32 %v6299_v35, %v5930_v31 }
0x3121   :  { %7110 = vmatprep.mubr.msk.f32.mxu1 %vm653_vm4, %v5941_v19 }
0x3122   :  { %7111 = vmatmul.mubr.msk.f32.vlgmr.msra.gmra.mxu1 %vm653_vm4, %v5942_v27 }
0x3193   :  { %v5906_v29 = vpop.xlane.xlu1 %5905 }
0x3194   :  { %v5910_v30 = vmul.f32 0.03125, %v5906_v29 }
0x3195   :  { %v5903_v32 = vpop.xlane.xlu0 %5902 }
0x3196   :  { %v5914_v33 = vadd.f32 1e-06, %v5910_v30  ;;  %v5909_v34 = vmul.f32 0.03125, %v5903_v32 }
0x3198   :  { %7357 = vrsqrt.f32 %v5914_v33  ;;  %v5913_v36 = vadd.f32 1e-06, %v5909_v34 }
0x319a   :  { %7359 = vrsqrt.f32 %v5913_v36 }
0x31a5   :  { %v7358_v40 = vpop.eup %7357 }
0x31a6   :  { %v5922_v37 = vmul.f32 %v7358_v40, %v5890_v62 }
0x31a7   :  { %v7360_v38 = vpop.eup %7359 }
0x31a8   :  { %v5921_v18 = vmul.f32 %v7360_v38, %v5889_v6  ;;  %v5933_v39 = vmul.f32 %v6298_v17, %v5922_v37 }
0x31aa   :  { %v5932_v3 = vmul.f32 %v6298_v17, %v5921_v18  ;;  %v5944_v5 = vadd.f32 %v6299_v35, %v5933_v39 }
0x31ac   :  { %v5943_v42 = vadd.f32 %v6299_v35, %v5932_v3 }
0x31ae   :  { %7113 = vmatprep.mubr.msk.f32.mxu1 %vm653_vm4, %v5943_v42 }
0x31af   :  { %7114 = vmatmul.mubr.msk.f32.gmra.mxu1 %vm653_vm4, %v5944_v5 }
0x31e2   :  { %v7112_v49 = vpop.f32.mrf.mxu1 }
0x31e3   :  { %v6040_v51 = vadd.f32 %v7112_v49, %v6300_v44 }
0x31e4   :  { %v6034_v28 = vpop.f32.mrf.mxu1 }
0x31e5   :  { %6054 = vst.msk [vmem:[#allocation22 + $0x8] sm:$0xff] %vm371_vm0, %v6040_v51  ;;  %v6035_v10 = vadd.f32 %v6300_v44, %v6034_v28 }
0x31e7   :  { %6053 = vst.msk [vmem:[#allocation22] sm:$0xff] %vm371_vm0, %v6035_v10 }
0x326f   :  { %v7115_v23 = vpop.f32.mrf.mxu1 }
0x3270   :  { %v6050_v47 = vadd.f32 %v7115_v23, %v6300_v44 }
0x3271   :  { %v6044_v41 = vpop.f32.mrf.mxu1 }
0x3272   :  { %6056 = vst.msk [vmem:[#allocation22 + $0x18] sm:$0xff] %vm371_vm0, %v6050_v47  ;;  %v6045_v58 = vadd.f32 %v6300_v44, %v6044_v41 }
0x3274   :  { %6055 = vst.msk [vmem:[#allocation22 + $0x10] sm:$0xff] %vm371_vm0, %v6045_v58 }
0x3275   :  { %7612 = shalt.err (!%p7609_p8)
}
0x3276   :  { %s7710_s12 = smov 128   ;;  %s7711_s10 = smov 8  }
0x3277   :  { %6068 = dma.vmem_to_hbm [thread:$0]  %s6063_s7, 512, %s7985_s5, [#allocation4], %s7710_s12, %s7710_s12, %s7711_s10  }
0x3278   :  { %7635 = dma.done.wait [#allocation4], 512  }
0x3279   :  { %7636 = vsyncadd [#allocation4], 4294966784 }
0x327a   :  { %6072 = vsyncpa [#allocation3], 1 }
0x327b   :  { %6073 = vsyncpa [#allocation6], 1 }
0x327c   :  { %6074 = vsyncpa [#allocation9], 1 }
0x327d   :  { %6075 = vsyncpa [#allocation12], 1 }
0x327e   :  { %6076 = vsyncpa [#allocation15], 1 }
0x327f   :  { %6077 = vsyncpa [#allocation18], 1 }
0x3280   :  { %6078 = vsyncpa [#allocation21], 1 }
0x3281   :  { %6079 = vsyncpa [#allocation4], 1 }

</bundles_post_ra>
